<compile_context>
chip_gen: v6e
topology: v6e:2x2x1
jax: 0.10.0
libtpu: 0.0.40
codegen_flags: <defaults>
</compile_context>

<pallas_src>
import functools

import jax
import jax.numpy as jnp
from jax.experimental import pallas as pl
from jax.experimental.pallas import tpu as pltpu


_VMEM_LIMIT = 48 * 1024 * 1024  # safe on v7x (64 MiB VMEM), above default scoped limit elsewhere


def _pick_tile(dim, pref, align):
    """Largest tile <= pref that divides dim exactly and is a multiple of align.
    Falls back to the full dim (which always satisfies the (8,128) rule)."""
    if dim <= pref:
        return dim
    t = (pref // align) * align
    while t >= align:
        if dim % t == 0:
            return t
        t -= align
    return dim


def _pick_q_tile(N, W, pref=256):
    """Query tile: multiple of the key-grid width W so rel-pos rows stay aligned."""
    if N <= pref:
        return N
    t = (pref // W) * W
    while t >= W:
        if N % t == 0 and t % 8 == 0:
            return t
        t -= W
    return N


# ----------------------------- Pallas kernels -----------------------------

def _matmul_kernel(x_ref, w_ref, b_ref, o_ref, acc_ref):
    @pl.when(pl.program_id(2) == 0)
    def _():
        acc_ref[...] = jnp.zeros_like(acc_ref)

    acc_ref[...] += jnp.dot(x_ref[...], w_ref[...],
                            preferred_element_type=jnp.float32)

    @pl.when(pl.program_id(2) == pl.num_programs(2) - 1)
    def _():
        o_ref[...] = (acc_ref[...] + b_ref[...]).astype(o_ref.dtype)


def _matmul_res_kernel(x_ref, w_ref, b_ref, r_ref, o_ref, acc_ref):
    @pl.when(pl.program_id(2) == 0)
    def _():
        acc_ref[...] = jnp.zeros_like(acc_ref)

    acc_ref[...] += jnp.dot(x_ref[...], w_ref[...],
                            preferred_element_type=jnp.float32)

    @pl.when(pl.program_id(2) == pl.num_programs(2) - 1)
    def _():
        o_ref[...] = (acc_ref[...] + b_ref[...] + r_ref[...]).astype(o_ref.dtype)


def pallas_linear(x, w, b=None, residual=None, tm=256, tn=256, tk=512):
    """y = x @ w + b (+ residual): bf16 MXU operands, f32 accumulation."""
    M, K = x.shape
    N = w.shape[1]
    if b is None:
        b = jnp.zeros((N,), jnp.float32)
    tm = _pick_tile(M, tm, 8)
    tn = _pick_tile(N, tn, 128)
    tk = _pick_tile(K, tk, 128)
    grid = (M // tm, N // tn, K // tk)
    in_specs = [pl.BlockSpec((tm, tk), lambda i, j, k: (i, k)),
                pl.BlockSpec((tk, tn), lambda i, j, k: (k, j)),
                pl.BlockSpec((1, tn), lambda i, j, k: (0, j))]
    args = [x.astype(jnp.bfloat16), w.astype(jnp.bfloat16),
            b.reshape(1, N).astype(jnp.float32)]
    kern = _matmul_kernel
    if residual is not None:
        in_specs.append(pl.BlockSpec((tm, tn), lambda i, j, k: (i, j)))
        args.append(residual.astype(jnp.float32))
        kern = _matmul_res_kernel
    return pl.pallas_call(
        kern,
        out_shape=jax.ShapeDtypeStruct((M, N), jnp.float32),
        grid=grid,
        in_specs=in_specs,
        out_specs=pl.BlockSpec((tm, tn), lambda i, j, k: (i, j)),
        scratch_shapes=[pltpu.VMEM((tm, tn), jnp.float32)],
        compiler_params=pltpu.CompilerParams(
            dimension_semantics=("parallel", "parallel", "arbitrary"),
            vmem_limit_bytes=_VMEM_LIMIT),
    )(*args)


def _layernorm_kernel(x_ref, g_ref, b_ref, o_ref, *, eps):
    x = x_ref[...]
    mu = jnp.mean(x, axis=-1, keepdims=True)
    var = jnp.mean((x - mu) ** 2, axis=-1, keepdims=True)
    y = (x - mu) * jax.lax.rsqrt(var + eps)
    o_ref[...] = (y * g_ref[...] + b_ref[...]).astype(o_ref.dtype)


def pallas_layernorm(x, g, b, eps=1e-6, tm=512):
    """LayerNorm over the last axis, tiled over rows (also used for LayerNorm2d)."""
    M, C = x.shape
    tm = _pick_tile(M, tm, 8)
    kern = functools.partial(_layernorm_kernel, eps=eps)
    return pl.pallas_call(
        kern,
        out_shape=jax.ShapeDtypeStruct((M, C), jnp.float32),
        grid=(M // tm,),
        in_specs=[pl.BlockSpec((tm, C), lambda i: (i, 0)),
                  pl.BlockSpec((1, C), lambda i: (0, 0)),
                  pl.BlockSpec((1, C), lambda i: (0, 0))],
        out_specs=pl.BlockSpec((tm, C), lambda i: (i, 0)),
        compiler_params=pltpu.CompilerParams(
            dimension_semantics=("parallel",),
            vmem_limit_bytes=_VMEM_LIMIT),
    )(x.astype(jnp.float32),
      g.reshape(1, C).astype(jnp.float32),
      b.reshape(1, C).astype(jnp.float32))


def _ln_matmul_kernel(x_ref, g_ref, be_ref, w_ref, b_ref, o_ref, *, eps):
    x = x_ref[...]                                   # (tm, K) f32
    mu = jnp.mean(x, axis=-1, keepdims=True)
    var = jnp.mean((x - mu) ** 2, axis=-1, keepdims=True)
    xn = (x - mu) * jax.lax.rsqrt(var + eps)
    xn = (xn * g_ref[...] + be_ref[...]).astype(jnp.bfloat16)
    acc = jnp.dot(xn, w_ref[...], preferred_element_type=jnp.float32)
    o_ref[...] = (acc + b_ref[...]).astype(o_ref.dtype)


def pallas_ln_linear(x, g, beta, w, b, eps=1e-6, tm=512, tn=512):
    """Fused LayerNorm(last axis) + linear: y = LN(x) @ w + b (K kept whole)."""
    M, K = x.shape
    N = w.shape[1]
    if b is None:
        b = jnp.zeros((N,), jnp.float32)
    tm = _pick_tile(M, tm, 8)
    tn = _pick_tile(N, tn, 128)
    kern = functools.partial(_ln_matmul_kernel, eps=eps)
    return pl.pallas_call(
        kern,
        out_shape=jax.ShapeDtypeStruct((M, N), jnp.float32),
        grid=(M // tm, N // tn),
        in_specs=[pl.BlockSpec((tm, K), lambda i, j: (i, 0)),
                  pl.BlockSpec((1, K), lambda i, j: (0, 0)),
                  pl.BlockSpec((1, K), lambda i, j: (0, 0)),
                  pl.BlockSpec((K, tn), lambda i, j: (0, j)),
                  pl.BlockSpec((1, tn), lambda i, j: (0, j))],
        out_specs=pl.BlockSpec((tm, tn), lambda i, j: (i, j)),
        compiler_params=pltpu.CompilerParams(
            dimension_semantics=("parallel", "parallel"),
            vmem_limit_bytes=_VMEM_LIMIT),
    )(x.astype(jnp.float32),
      g.reshape(1, K).astype(jnp.float32),
      beta.reshape(1, K).astype(jnp.float32),
      w.astype(jnp.bfloat16),
      b.reshape(1, N).astype(jnp.float32))


def _attn_kernel(q_ref, k_ref, v_ref, rh_ref, rw_ref, eh_ref, ew_ref, o_ref, *, scale):
    q = q_ref[0]                        # (tq, hd) bf16
    k = k_ref[0]                        # (N,  hd) bf16
    v = v_ref[0]                        # (N,  hd) bf16
    s = jax.lax.dot_general(q, k, (((1,), (1,)), ((), ())),
                            preferred_element_type=jnp.float32) * scale    # (tq, N)
    # decomposed rel-pos bias: (tq,H)/(tq,W) terms expanded to (tq,N) with
    # 0/1 selection matmuls on the MXU (no (N,N,d) tensor, no reshapes of s).
    s = s + jnp.dot(rh_ref[0], eh_ref[...], preferred_element_type=jnp.float32)
    s = s + jnp.dot(rw_ref[0], ew_ref[...], preferred_element_type=jnp.float32)
    s = s - jnp.max(s, axis=-1, keepdims=True)
    p = jnp.exp(s)
    p = p * pl.reciprocal(jnp.sum(p, axis=-1, keepdims=True), approx=True)
    o_ref[0] = jnp.dot(p.astype(v.dtype), v,
                       preferred_element_type=jnp.float32).astype(o_ref.dtype)


def pallas_attention(q, k, v, rel_h, rel_w, scale, H, W):
    """q,k,v: (BH, N, hd) bf16; rel_h: (BH, N, H); rel_w: (BH, N, W).
    Query-tiled attention with decomposed relative-position bias."""
    BH, N, hd = q.shape
    tq = _pick_q_tile(N, W, 256)
    # TODO(synk): heads could be packed per grid step (hd<128 leaves lanes idle)
    # and the KV axis could be flash-tiled with online softmax; q-tiling already
    # bounds the per-step score slab to (tq, N) f32 (a few MiB at SAM scale).
    Eh = (jnp.arange(N, dtype=jnp.int32)[None, :] // W ==
          jnp.arange(H, dtype=jnp.int32)[:, None]).astype(jnp.bfloat16)    # (H, N)
    Ew = (jnp.arange(N, dtype=jnp.int32)[None, :] % W ==
          jnp.arange(W, dtype=jnp.int32)[:, None]).astype(jnp.bfloat16)    # (W, N)
    kern = functools.partial(_attn_kernel, scale=scale)
    return pl.pallas_call(
        kern,
        out_shape=jax.ShapeDtypeStruct((BH, N, hd), jnp.float32),
        grid=(BH, N // tq),
        in_specs=[pl.BlockSpec((1, tq, hd), lambda b, i: (b, i, 0)),
                  pl.BlockSpec((1, N, hd), lambda b, i: (b, 0, 0)),
                  pl.BlockSpec((1, N, hd), lambda b, i: (b, 0, 0)),
                  pl.BlockSpec((1, tq, H), lambda b, i: (b, i, 0)),
                  pl.BlockSpec((1, tq, W), lambda b, i: (b, i, 0)),
                  pl.BlockSpec((H, N), lambda b, i: (0, 0)),
                  pl.BlockSpec((W, N), lambda b, i: (0, 0))],
        out_specs=pl.BlockSpec((1, tq, hd), lambda b, i: (b, i, 0)),
        compiler_params=pltpu.CompilerParams(
            dimension_semantics=("parallel", "parallel"),
            vmem_limit_bytes=_VMEM_LIMIT),
    )(q, k, v, rel_h.astype(jnp.bfloat16), rel_w.astype(jnp.bfloat16), Eh, Ew)


def _conv3x3_kernel(x_ref, w_ref, o_ref, *, H, W):
    x = x_ref[0]                                    # (H+2, W+2, C) bf16
    Cout = o_ref.shape[-1]
    acc = jnp.zeros((H * W, Cout), jnp.float32)
    for t in range(9):                              # 9-tap accumulation in VMEM
        kh, kw = t // 3, t % 3
        patch = x[kh:kh + H, kw:kw + W, :].reshape(H * W, -1)
        acc = acc + jnp.dot(patch, w_ref[t], preferred_element_type=jnp.float32)
    o_ref[0] = acc.reshape(H, W, Cout).astype(o_ref.dtype)


def conv3x3_nhwc(x, w):
    """3x3 conv, pad=1, stride 1, no bias.  w: (Cout, Cin, 3, 3)."""
    B, H, W, C = x.shape
    Cout = w.shape[0]
    xp = jnp.pad(x, ((0, 0), (1, 1), (1, 1), (0, 0))).astype(jnp.bfloat16)
    wm = jnp.transpose(w, (2, 3, 1, 0)).reshape(9, C, Cout).astype(jnp.bfloat16)
    kern = functools.partial(_conv3x3_kernel, H=H, W=W)
    return pl.pallas_call(
        kern,
        out_shape=jax.ShapeDtypeStruct((B, H, W, Cout), jnp.float32),
        grid=(B,),
        in_specs=[pl.BlockSpec((1, H + 2, W + 2, C), lambda b: (b, 0, 0, 0)),
                  pl.BlockSpec((9, C, Cout), lambda b: (0, 0, 0))],
        out_specs=pl.BlockSpec((1, H, W, Cout), lambda b: (b, 0, 0, 0)),
        compiler_params=pltpu.CompilerParams(
            dimension_semantics=("parallel",),
            vmem_limit_bytes=_VMEM_LIMIT),
    )(xp, wm)


# ----------------------------- JAX glue -----------------------------------

def gelu_exact(x):
    # TODO(synk): exact erf GELU stays in plain-JAX glue (erf lowering inside
    # Mosaic is not guaranteed); kept in f32 as recommended.
    return jax.nn.gelu(x, approximate=False)


def get_rel_pos(q_size, k_size, rel_pos):
    max_rel_dist = int(2 * max(q_size, k_size) - 1)
    assert rel_pos.shape[0] == max_rel_dist
    q_coords = jnp.arange(q_size)[:, None] * max(k_size / q_size, 1.0)
    k_coords = jnp.arange(k_size)[None, :] * max(q_size / k_size, 1.0)
    rel = q_coords - k_coords + (k_size - 1) * max(q_size / k_size, 1.0)
    return rel_pos[rel.astype(jnp.int32)]          # (q_size, k_size, head_dim)


def window_partition(x, ws):
    B, H, W, C = x.shape
    pad_h = (ws - H % ws) % ws
    pad_w = (ws - W % ws) % ws
    if pad_h > 0 or pad_w > 0:
        x = jnp.pad(x, ((0, 0), (0, pad_h), (0, pad_w), (0, 0)))
    Hp, Wp = H + pad_h, W + pad_w
    x = x.reshape(B, Hp // ws, ws, Wp // ws, ws, C)
    windows = jnp.transpose(x, (0, 1, 3, 2, 4, 5)).reshape(-1, ws, ws, C)
    return windows, (Hp, Wp)


def window_unpartition(windows, ws, pad_hw, hw):
    Hp, Wp = pad_hw
    H, W = hw
    B = windows.shape[0] // (Hp * Wp // ws // ws)
    x = windows.reshape(B, Hp // ws, Wp // ws, ws, ws, -1)
    x = jnp.transpose(x, (0, 1, 3, 2, 4, 5)).reshape(B, Hp, Wp, -1)
    if Hp > H or Wp > W:
        x = x[:, :H, :W, :]
    return x


def attention_core(qkv, num_heads, rel_pos_h, rel_pos_w, proj_w, proj_b,
                   residual=None):
    """qkv: (Bw, H, W, 3C) -> attention output (Bw, H, W, C).
    If `residual` (shape (Bw*H*W, C)) is given, it is fused into the proj matmul."""
    Bw, H, W, C3 = qkv.shape
    C = C3 // 3
    hd = C // num_heads
    N = H * W
    scale = hd ** -0.5
    qkv = qkv.reshape(Bw, N, 3, num_heads, hd).astype(jnp.bfloat16)
    # TODO(synk): this head-split transpose is still plain-JAX data movement;
    # folding it into the attention BlockSpec needs sub-128-lane head blocks.
    qkv = jnp.transpose(qkv, (2, 0, 3, 1, 4)).reshape(3, Bw * num_heads, N, hd)
    q, k, v = qkv[0], qkv[1], qkv[2]
    Rh = get_rel_pos(H, H, rel_pos_h)                      # (H, H, hd)
    Rw = get_rel_pos(W, W, rel_pos_w)                      # (W, W, hd)
    q4 = q.astype(jnp.float32).reshape(Bw * num_heads, H, W, hd)
    rel_h = jnp.einsum('bhwc,hkc->bhwk', q4, Rh).reshape(Bw * num_heads, N, H)
    rel_w = jnp.einsum('bhwc,wkc->bhwk', q4, Rw).reshape(Bw * num_heads, N, W)
    o = pallas_attention(q, k, v, rel_h, rel_w, scale, H, W)   # (Bw*nh, N, hd)
    o = o.reshape(Bw, num_heads, H, W, hd)
    o = jnp.transpose(o, (0, 2, 3, 1, 4)).reshape(Bw * N, C)
    o = pallas_linear(o, proj_w, proj_b, residual=residual)
    return o.reshape(Bw, H, W, C)


def block_forward(x, p, num_heads, window_size):
    B, H, W, C = x.shape
    shortcut = x
    ws = window_size
    no_pad = (ws == 0) or (H % ws == 0 and W % ws == 0)
    if no_pad:
        # Fused LN1 + qkv on all tokens (valid: window partition is a pure
        # token permutation when no padding is needed).
        qkv = pallas_ln_linear(x.reshape(-1, C), p['norm1_w'], p['norm1_b'],
                               p['qkv_w'], p['qkv_b']).reshape(B, H, W, 3 * C)
        if ws > 0:
            qkv_win, pad_hw = window_partition(qkv, ws)
            xa = attention_core(qkv_win, num_heads, p['rel_pos_h'], p['rel_pos_w'],
                                p['proj_w'], p['proj_b'])
            xa = window_unpartition(xa, ws, pad_hw, (H, W))
            x = shortcut + xa
        else:
            # Residual fused into the proj matmul (token ordering matches).
            x = attention_core(qkv, num_heads, p['rel_pos_h'], p['rel_pos_w'],
                               p['proj_w'], p['proj_b'],
                               residual=shortcut.reshape(-1, C))
    else:
        # Padding path: LN first so padded tokens go through qkv (bias-only rows),
        # exactly matching the reference semantics.
        xn = pallas_layernorm(x.reshape(-1, C), p['norm1_w'], p['norm1_b'])
        xw, pad_hw = window_partition(xn.reshape(B, H, W, C), ws)
        Bw = xw.shape[0]
        qkv = pallas_linear(xw.reshape(-1, C), p['qkv_w'], p['qkv_b'])
        qkv = qkv.reshape(Bw, ws, ws, 3 * C)
        xa = attention_core(qkv, num_heads, p['rel_pos_h'], p['rel_pos_w'],
                            p['proj_w'], p['proj_b'])
        xa = window_unpartition(xa, ws, pad_hw, (H, W))
        x = shortcut + xa
    # Fused LN2 + lin1, exact GELU, lin2 with fused residual add.
    h = pallas_ln_linear(x.reshape(-1, C), p['norm2_w'], p['norm2_b'],
                         p['lin1_w'], p['lin1_b'])
    h = gelu_exact(h)
    h = pallas_linear(h, p['lin2_w'], p['lin2_b'], residual=x.reshape(-1, C))
    return h.reshape(B, H, W, C)


def patch_embed(x_nchw, w, b, patch):
    B, C, H, W = x_nchw.shape
    Hg, Wg = H // patch, W // patch
    xp = x_nchw.reshape(B, C, Hg, patch, Wg, patch)
    xp = jnp.transpose(xp, (0, 2, 4, 1, 3, 5)).reshape(B * Hg * Wg, C * patch * patch)
    wm = w.reshape(w.shape[0], -1).T          # (C*p*p, E), ordering (c, kh, kw)
    y = pallas_linear(xp, wm, b)
    return y.reshape(B, Hg, Wg, -1)


def conv1x1_nhwc(x, w):                        # w: (out, in, 1, 1), no bias
    B, H, W, C = x.shape
    wm = w.reshape(w.shape[0], C).T
    return pallas_linear(x.reshape(-1, C), wm, None).reshape(B, H, W, -1)


def conv_transpose2x2_nhwc(x, w, b):           # w: (in, out, 2, 2), stride 2
    B, H, W, C = x.shape
    Cout = w.shape[1]
    wm = w.reshape(C, Cout * 4)                # columns ordered (o, kh, kw)
    bexp = jnp.repeat(b, 4)
    y = pallas_linear(x.reshape(-1, C), wm, bexp)
    y = y.reshape(B, H, W, Cout, 2, 2)
    y = jnp.transpose(y, (0, 1, 4, 2, 5, 3)).reshape(B, 2 * H, 2 * W, Cout)
    return y


def layernorm2d_nhwc(x, w, b, eps=1e-6):
    B, H, W, C = x.shape
    return pallas_layernorm(x.reshape(-1, C), w, b, eps).reshape(B, H, W, C)


def maxpool2x2_nhwc(x):
    B, H, W, C = x.shape
    return jnp.max(x.reshape(B, H // 2, 2, W // 2, 2, C), axis=(2, 4))


# ----------------------------- Full forward -------------------------------

def vit_forward(x_nchw, params, cfg):
    x = patch_embed(x_nchw, params['patch_w'], params['patch_b'], cfg['patch_size'])
    x = x + params['pos_embed']
    for i, bp in enumerate(params['blocks']):
        ws = 0 if i in cfg['global_attn_indexes'] else cfg['window_size']
        x = block_forward(x, bp, cfg['num_heads'], ws)
    # neck (channels-last equivalent of the NCHW conv stack)
    y = conv1x1_nhwc(x, params['neck_w0'])
    y = layernorm2d_nhwc(y, params['neck_ln0_w'], params['neck_ln0_b'])
    y = conv3x3_nhwc(y, params['neck_w1'])
    y = layernorm2d_nhwc(y, params['neck_ln1_w'], params['neck_ln1_b'])
    res4 = y
    res5 = maxpool2x2_nhwc(y)
    res3 = conv_transpose2x2_nhwc(y, params['t2_w'], params['t2_b'])
    z = conv_transpose2x2_nhwc(y, params['t1a_w'], params['t1a_b'])
    z = layernorm2d_nhwc(z, params['t1_ln_w'], params['t1_ln_b'])
    z = gelu_exact(z)
    z = conv_transpose2x2_nhwc(z, params['t1b_w'], params['t1b_b'])
    res2 = z
    to_nchw = lambda t: jnp.transpose(t, (0, 3, 1, 2))
    out_features = ('res2', 'res3', 'res4', 'res5')   # cfg.MODEL.SWIN.OUT_FEATURES
    y_all = {'res2': to_nchw(res2), 'res3': to_nchw(res3),
             'res4': to_nchw(res4), 'res5': to_nchw(res5)}
    return {k: v for k, v in y_all.items() if k in out_features}


# ----------------------------- Parameter init -----------------------------

def init_params(key, cfg):
    E = cfg['embed_dim']
    nh = cfg['num_heads']
    hd = E // nh
    mlp = int(E * cfg['mlp_ratio'])
    out = cfg['out_chans']
    Cin = cfg['in_chans']
    p = cfg['patch_size']
    Hg = cfg['img_size'] // p
    keys = iter(jax.random.split(key, 256))

    def nrm(shape, std=0.02):
        return std * jax.random.normal(next(keys), shape, dtype=jnp.float32)

    params = {
        'patch_w': nrm((E, Cin, p, p)),
        'patch_b': jnp.zeros((E,), jnp.float32),
        'pos_embed': nrm((1, Hg, Hg, E)),
        'blocks': [],
        'neck_w0': nrm((out, E, 1, 1)),
        'neck_ln0_w': jnp.ones((out,), jnp.float32),
        'neck_ln0_b': jnp.zeros((out,), jnp.float32),
        'neck_w1': nrm((out, out, 3, 3)),
        'neck_ln1_w': jnp.ones((out,), jnp.float32),
        'neck_ln1_b': jnp.zeros((out,), jnp.float32),
        't1a_w': nrm((out, out, 2, 2)), 't1a_b': jnp.zeros((out,), jnp.float32),
        't1_ln_w': jnp.ones((out,), jnp.float32),
        't1_ln_b': jnp.zeros((out,), jnp.float32),
        't1b_w': nrm((out, out, 2, 2)), 't1b_b': jnp.zeros((out,), jnp.float32),
        't2_w': nrm((out, out, 2, 2)), 't2_b': jnp.zeros((out,), jnp.float32),
    }
    for i in range(cfg['depth']):
        ws = 0 if i in cfg['global_attn_indexes'] else cfg['window_size']
        S = Hg if ws == 0 else ws
        params['blocks'].append({
            'norm1_w': jnp.ones((E,), jnp.float32),
            'norm1_b': jnp.zeros((E,), jnp.float32),
            'qkv_w': nrm((E, 3 * E)), 'qkv_b': jnp.zeros((3 * E,), jnp.float32),
            'proj_w': nrm((E, E)), 'proj_b': jnp.zeros((E,), jnp.float32),
            # NOTE: torch zero-inits rel_pos (rel_pos_zero_init=True); small random
            # values are used here so the rel-pos path is exercised non-trivially.
            'rel_pos_h': nrm((2 * S - 1, hd)),
            'rel_pos_w': nrm((2 * S - 1, hd)),
            'norm2_w': jnp.ones((E,), jnp.float32),
            'norm2_b': jnp.zeros((E,), jnp.float32),
            'lin1_w': nrm((E, mlp)), 'lin1_b': jnp.zeros((mlp,), jnp.float32),
            'lin2_w': nrm((mlp, E)), 'lin2_b': jnp.zeros((E,), jnp.float32),
        })
    return params


# ----------------------------- Main ----------------------------------------

if __name__ == "__main__":
    # Small synthetic config (real D2BaseViT: img=1024, patch=16, E=768, depth=12,
    # heads=12, window=14, global=[2,5,8,11], out=256).
    cfg = dict(img_size=32, patch_size=8, in_chans=3, embed_dim=64, depth=4,
               num_heads=4, mlp_ratio=4.0, out_chans=32, window_size=2,
               global_attn_indexes=(1, 3))

    key = jax.random.PRNGKey(0)
    pkey, xkey = jax.random.split(key)
    params = init_params(pkey, cfg)
    x = jax.random.normal(
        xkey, (2, cfg['in_chans'], cfg['img_size'], cfg['img_size']),
        dtype=jnp.float32)

    fwd = jax.jit(functools.partial(vit_forward, cfg=cfg))
    outs = fwd(x, params)
    for k in sorted(outs):
        jax.block_until_ready(outs[k])

    assert outs['res4'].shape == (2, cfg['out_chans'], 4, 4)
    assert outs['res5'].shape == (2, cfg['out_chans'], 2, 2)
    assert outs['res3'].shape == (2, cfg['out_chans'], 8, 8)
    assert outs['res2'].shape == (2, cfg['out_chans'], 16, 16)
    print("KERNEL_OK")
</pallas_src>

<mosaic_0001>
module attributes {stable_mosaic.version = 11 : i64} {
  func.func @_matmul_kernel(%arg0: i32, %arg1: i32, %arg2: i32, %arg3: memref<32x192xbf16, #tpu.memory_space<vmem>>, %arg4: memref<192x64xbf16, #tpu.memory_space<vmem>>, %arg5: memref<1x64xf32, #tpu.memory_space<vmem>>, %arg6: memref<32x64xf32, #tpu.memory_space<vmem>>, %arg7: memref<32x64xf32, #tpu.memory_space<vmem>>) attributes {dimension_semantics = [#tpu.dimension_semantics<parallel>, #tpu.dimension_semantics<parallel>, #tpu.dimension_semantics<arbitrary>], iteration_bounds = array<i64: 1, 1, 1>, scalar_prefetch = 0 : i64, scratch_operands = 1 : i64, tpu.core_type = #tpu.core_type<tc>, window_params = [{transform_indices = @transform_0, window_bounds = array<i64: 32, 192>}, {transform_indices = @transform_1, window_bounds = array<i64: 192, 64>}, {transform_indices = @transform_2, window_bounds = array<i64: 1, 64>}, {transform_indices = @transform_3, window_bounds = array<i64: 32, 64>}]} {
    %c0_i32 = arith.constant 0 : i32
    %0 = arith.cmpi eq, %arg2, %c0_i32 : i32
    %1 = arith.extui %0 : i1 to i32
    %c0_i32_0 = arith.constant 0 : i32
    %2 = arith.cmpi ne, %1, %c0_i32_0 : i32
    scf.if %2 {
      %cst_10 = arith.constant 0.000000e+00 : f32
      %12 = vector.broadcast %cst_10 : f32 to vector<32x64xf32>
      %c0_11 = arith.constant 0 : index
      %c0_12 = arith.constant 0 : index
      %13 = vector.load %arg7[%c0_11, %c0_12] : memref<32x64xf32, #tpu.memory_space<vmem>>, vector<32x64xf32>
      tpu.vector_store %arg7[%c0_11, %c0_12], %12 {strides = array<i32>} : memref<32x64xf32, #tpu.memory_space<vmem>>, vector<32x64xf32>,
    } else {
    }
    %c0 = arith.constant 0 : index
    %c0_1 = arith.constant 0 : index
    %3 = vector.load %arg7[%c0, %c0_1] : memref<32x64xf32, #tpu.memory_space<vmem>>, vector<32x64xf32>
    %c0_2 = arith.constant 0 : index
    %c0_3 = arith.constant 0 : index
    %4 = vector.load %arg3[%c0_2, %c0_3] : memref<32x192xbf16, #tpu.memory_space<vmem>>, vector<32x192xbf16>
    %c0_4 = arith.constant 0 : index
    %c0_5 = arith.constant 0 : index
    %5 = vector.load %arg4[%c0_4, %c0_5] : memref<192x64xbf16, #tpu.memory_space<vmem>>, vector<192x64xbf16>
    %cst = arith.constant dense<0.000000e+00> : vector<32x64xf32>
    %6 = tpu.matmul %4, %5, %cst {dimension_numbers = #tpu.dot_dimension_numbers<[1], [0], [0], [1], [0, 0, 1, 1], [], []>} : vector<32x192xbf16>, vector<192x64xbf16>, vector<32x64xf32> -> vector<32x64xf32>
    %7 = arith.addf %3, %6 : vector<32x64xf32>
    %c0_6 = arith.constant 0 : index
    %c0_7 = arith.constant 0 : index
    %8 = vector.load %arg7[%c0_6, %c0_7] : memref<32x64xf32, #tpu.memory_space<vmem>>, vector<32x64xf32>
    tpu.vector_store %arg7[%c0_6, %c0_7], %7 {strides = array<i32>} : memref<32x64xf32, #tpu.memory_space<vmem>>, vector<32x64xf32>,
    %c0_i32_8 = arith.constant 0 : i32
    %9 = arith.cmpi eq, %arg2, %c0_i32_8 : i32
    %10 = arith.extui %9 : i1 to i32
    %c0_i32_9 = arith.constant 0 : i32
    %11 = arith.cmpi ne, %10, %c0_i32_9 : i32
    scf.if %11 {
      %c0_10 = arith.constant 0 : index
      %c0_11 = arith.constant 0 : index
      %12 = vector.load %arg7[%c0_10, %c0_11] : memref<32x64xf32, #tpu.memory_space<vmem>>, vector<32x64xf32>
      %c0_12 = arith.constant 0 : index
      %c0_13 = arith.constant 0 : index
      %13 = vector.load %arg5[%c0_12, %c0_13] : memref<1x64xf32, #tpu.memory_space<vmem>>, vector<1x64xf32>
      %14 = vector.broadcast %13 : vector<1x64xf32> to vector<32x64xf32>
      %15 = arith.addf %12, %14 : vector<32x64xf32>
      %c0_14 = arith.constant 0 : index
      %c0_15 = arith.constant 0 : index
      %16 = vector.load %arg6[%c0_14, %c0_15] : memref<32x64xf32, #tpu.memory_space<vmem>>, vector<32x64xf32>
      tpu.vector_store %arg6[%c0_14, %c0_15], %15 {strides = array<i32>} : memref<32x64xf32, #tpu.memory_space<vmem>>, vector<32x64xf32>,
    } else {
    }
    return
  }
  func.func @transform_0(%arg0: i32, %arg1: i32, %arg2: i32) -> (i32, i32) {
    %c0_i32 = arith.constant 0 : i32
    return %arg0, %arg2 : i32, i32
  }
  func.func @transform_1(%arg0: i32, %arg1: i32, %arg2: i32) -> (i32, i32) {
    %c0_i32 = arith.constant 0 : i32
    return %arg2, %arg1 : i32, i32
  }
  func.func @transform_2(%arg0: i32, %arg1: i32, %arg2: i32) -> (i32, i32) {
    %c0_i32 = arith.constant 0 : i32
    %c0_i32_0 = arith.constant 0 : i32
    return %c0_i32, %arg1 : i32, i32
  }
  func.func @transform_3(%arg0: i32, %arg1: i32, %arg2: i32) -> (i32, i32) {
    %c0_i32 = arith.constant 0 : i32
    return %arg0, %arg1 : i32, i32
  }
}

module attributes {stable_mosaic.version = 11 : i64} {
  func.func @_ln_matmul_kernel(%arg0: i32, %arg1: i32, %arg2: memref<32x64xf32, #tpu.memory_space<vmem>>, %arg3: memref<1x64xf32, #tpu.memory_space<vmem>>, %arg4: memref<1x64xf32, #tpu.memory_space<vmem>>, %arg5: memref<64x192xbf16, #tpu.memory_space<vmem>>, %arg6: memref<1x192xf32, #tpu.memory_space<vmem>>, %arg7: memref<32x192xf32, #tpu.memory_space<vmem>>) attributes {dimension_semantics = [#tpu.dimension_semantics<parallel>, #tpu.dimension_semantics<parallel>], iteration_bounds = array<i64: 1, 1>, scalar_prefetch = 0 : i64, scratch_operands = 0 : i64, tpu.core_type = #tpu.core_type<tc>, window_params = [{transform_indices = @transform_0, window_bounds = array<i64: 32, 64>}, {pipeline_mode = #tpu.pipeline_mode<synchronous>, transform_indices = @transform_1, window_bounds = array<i64: 1, 64>}, {pipeline_mode = #tpu.pipeline_mode<synchronous>, transform_indices = @transform_2, window_bounds = array<i64: 1, 64>}, {transform_indices = @transform_3, window_bounds = array<i64: 64, 192>}, {transform_indices = @transform_4, window_bounds = array<i64: 1, 192>}, {transform_indices = @transform_5, window_bounds = array<i64: 32, 192>}]} {
    %c0 = arith.constant 0 : index
    %c0_0 = arith.constant 0 : index
    %0 = vector.load %arg2[%c0, %c0_0] : memref<32x64xf32, #tpu.memory_space<vmem>>, vector<32x64xf32>
    %cst = arith.constant dense<0.000000e+00> : vector<32xf32>
    %1 = vector.multi_reduction <add>, %0, %cst [1] : vector<32x64xf32> to vector<32xf32>
    %2 = vector.shape_cast %1 : vector<32xf32> to vector<32x1xf32>
    %cst_1 = arith.constant 6.400000e+01 : f32
    %3 = vector.broadcast %cst_1 : f32 to vector<32x1xf32>
    %4 = arith.divf %2, %3 : vector<32x1xf32>
    %5 = vector.broadcast %4 : vector<32x1xf32> to vector<32x64xf32>
    %6 = arith.subf %0, %5 : vector<32x64xf32>
    %7 = arith.mulf %6, %6 : vector<32x64xf32>
    %cst_2 = arith.constant dense<0.000000e+00> : vector<32xf32>
    %8 = vector.multi_reduction <add>, %7, %cst_2 [1] : vector<32x64xf32> to vector<32xf32>
    %9 = vector.shape_cast %8 : vector<32xf32> to vector<32x1xf32>
    %cst_3 = arith.constant 6.400000e+01 : f32
    %10 = vector.broadcast %cst_3 : f32 to vector<32x1xf32>
    %11 = arith.divf %9, %10 : vector<32x1xf32>
    %12 = vector.broadcast %4 : vector<32x1xf32> to vector<32x64xf32>
    %13 = arith.subf %0, %12 : vector<32x64xf32>
    %cst_4 = arith.constant 9.99999997E-7 : f32
    %14 = vector.broadcast %cst_4 : f32 to vector<32x1xf32>
    %15 = arith.addf %11, %14 : vector<32x1xf32>
    %16 = math.rsqrt %15 : vector<32x1xf32>
    %17 = vector.broadcast %16 : vector<32x1xf32> to vector<32x64xf32>
    %18 = arith.mulf %13, %17 : vector<32x64xf32>
    %c0_5 = arith.constant 0 : index
    %c0_6 = arith.constant 0 : index
    %19 = vector.load %arg3[%c0_5, %c0_6] : memref<1x64xf32, #tpu.memory_space<vmem>>, vector<1x64xf32>
    %20 = vector.broadcast %19 : vector<1x64xf32> to vector<32x64xf32>
    %21 = arith.mulf %18, %20 : vector<32x64xf32>
    %c0_7 = arith.constant 0 : index
    %c0_8 = arith.constant 0 : index
    %22 = vector.load %arg4[%c0_7, %c0_8] : memref<1x64xf32, #tpu.memory_space<vmem>>, vector<1x64xf32>
    %23 = vector.broadcast %22 : vector<1x64xf32> to vector<32x64xf32>
    %24 = arith.addf %21, %23 : vector<32x64xf32>
    %25 = arith.truncf %24 : vector<32x64xf32> to vector<32x64xbf16>
    %c0_9 = arith.constant 0 : index
    %c0_10 = arith.constant 0 : index
    %26 = vector.load %arg5[%c0_9, %c0_10] : memref<64x192xbf16, #tpu.memory_space<vmem>>, vector<64x192xbf16>
    %cst_11 = arith.constant dense<0.000000e+00> : vector<32x192xf32>
    %27 = tpu.matmul %25, %26, %cst_11 {dimension_numbers = #tpu.dot_dimension_numbers<[1], [0], [0], [1], [0, 0, 1, 1], [], []>} : vector<32x64xbf16>, vector<64x192xbf16>, vector<32x192xf32> -> vector<32x192xf32>
    %c0_12 = arith.constant 0 : index
    %c0_13 = arith.constant 0 : index
    %28 = vector.load %arg6[%c0_12, %c0_13] : memref<1x192xf32, #tpu.memory_space<vmem>>, vector<1x192xf32>
    %29 = vector.broadcast %28 : vector<1x192xf32> to vector<32x192xf32>
    %30 = arith.addf %27, %29 : vector<32x192xf32>
    %c0_14 = arith.constant 0 : index
    %c0_15 = arith.constant 0 : index
    %31 = vector.load %arg7[%c0_14, %c0_15] : memref<32x192xf32, #tpu.memory_space<vmem>>, vector<32x192xf32>
    tpu.vector_store %arg7[%c0_14, %c0_15], %30 {strides = array<i32>} : memref<32x192xf32, #tpu.memory_space<vmem>>, vector<32x192xf32>,
    return
  }
  func.func @transform_0(%arg0: i32, %arg1: i32) -> (i32, i32) {
    %c0_i32 = arith.constant 0 : i32
    %c0_i32_0 = arith.constant 0 : i32
    return %arg0, %c0_i32 : i32, i32
  }
  func.func @transform_1(%arg0: i32, %arg1: i32) -> (i32, i32) {
    %c0_i32 = arith.constant 0 : i32
    %c0_i32_0 = arith.constant 0 : i32
    %c0_i32_1 = arith.constant 0 : i32
    return %c0_i32, %c0_i32_0 : i32, i32
  }
  func.func @transform_2(%arg0: i32, %arg1: i32) -> (i32, i32) {
    %c0_i32 = arith.constant 0 : i32
    %c0_i32_0 = arith.constant 0 : i32
    %c0_i32_1 = arith.constant 0 : i32
    return %c0_i32, %c0_i32_0 : i32, i32
  }
  func.func @transform_3(%arg0: i32, %arg1: i32) -> (i32, i32) {
    %c0_i32 = arith.constant 0 : i32
    %c0_i32_0 = arith.constant 0 : i32
    return %c0_i32, %arg1 : i32, i32
  }
  func.func @transform_4(%arg0: i32, %arg1: i32) -> (i32, i32) {
    %c0_i32 = arith.constant 0 : i32
    %c0_i32_0 = arith.constant 0 : i32
    return %c0_i32, %arg1 : i32, i32
  }
  func.func @transform_5(%arg0: i32, %arg1: i32) -> (i32, i32) {
    %c0_i32 = arith.constant 0 : i32
    return %arg0, %arg1 : i32, i32
  }
}

module attributes {stable_mosaic.version = 11 : i64} {
  func.func @_attn_kernel(%arg0: i32, %arg1: i32, %arg2: memref<1x4x16xbf16, #tpu.memory_space<vmem>>, %arg3: memref<1x4x16xbf16, #tpu.memory_space<vmem>>, %arg4: memref<1x4x16xbf16, #tpu.memory_space<vmem>>, %arg5: memref<1x4x2xbf16, #tpu.memory_space<vmem>>, %arg6: memref<1x4x2xbf16, #tpu.memory_space<vmem>>, %arg7: memref<2x4xbf16, #tpu.memory_space<vmem>>, %arg8: memref<2x4xbf16, #tpu.memory_space<vmem>>, %arg9: memref<1x4x16xf32, #tpu.memory_space<vmem>>) attributes {dimension_semantics = [#tpu.dimension_semantics<parallel>, #tpu.dimension_semantics<parallel>], iteration_bounds = array<i64: 32, 1>, scalar_prefetch = 0 : i64, scratch_operands = 0 : i64, tpu.core_type = #tpu.core_type<tc>, window_params = [{transform_indices = @transform_0, window_bounds = array<i64: 1, 4, 16>}, {transform_indices = @transform_1, window_bounds = array<i64: 1, 4, 16>}, {transform_indices = @transform_2, window_bounds = array<i64: 1, 4, 16>}, {transform_indices = @transform_3, window_bounds = array<i64: 1, 4, 2>}, {transform_indices = @transform_4, window_bounds = array<i64: 1, 4, 2>}, {pipeline_mode = #tpu.pipeline_mode<synchronous>, transform_indices = @transform_5, window_bounds = array<i64: 2, 4>}, {pipeline_mode = #tpu.pipeline_mode<synchronous>, transform_indices = @transform_6, window_bounds = array<i64: 2, 4>}, {transform_indices = @transform_7, window_bounds = array<i64: 1, 4, 16>}]} {
    %c0 = arith.constant 0 : index
    %c0_0 = arith.constant 0 : index
    %c0_1 = arith.constant 0 : index
    %0 = vector.load %arg2[%c0, %c0_0, %c0_1] : memref<1x4x16xbf16, #tpu.memory_space<vmem>>, vector<1x4x16xbf16>
    %1 = vector.shape_cast %0 : vector<1x4x16xbf16> to vector<4x16xbf16>
    %c0_2 = arith.constant 0 : index
    %c0_3 = arith.constant 0 : index
    %c0_4 = arith.constant 0 : index
    %2 = vector.load %arg3[%c0_2, %c0_3, %c0_4] : memref<1x4x16xbf16, #tpu.memory_space<vmem>>, vector<1x4x16xbf16>
    %3 = vector.shape_cast %2 : vector<1x4x16xbf16> to vector<4x16xbf16>
    %c0_5 = arith.constant 0 : index
    %c0_6 = arith.constant 0 : index
    %c0_7 = arith.constant 0 : index
    %4 = vector.load %arg4[%c0_5, %c0_6, %c0_7] : memref<1x4x16xbf16, #tpu.memory_space<vmem>>, vector<1x4x16xbf16>
    %5 = vector.shape_cast %4 : vector<1x4x16xbf16> to vector<4x16xbf16>
    %cst = arith.constant dense<0.000000e+00> : vector<4x4xf32>
    %6 = tpu.matmul %1, %3, %cst {dimension_numbers = #tpu.dot_dimension_numbers<[1], [1], [0], [0], [0, 0, 1, 0], [], []>} : vector<4x16xbf16>, vector<4x16xbf16>, vector<4x4xf32> -> vector<4x4xf32>
    %cst_8 = arith.constant 2.500000e-01 : f32
    %7 = vector.broadcast %cst_8 : f32 to vector<4x4xf32>
    %8 = arith.mulf %6, %7 : vector<4x4xf32>
    %c0_9 = arith.constant 0 : index
    %c0_10 = arith.constant 0 : index
    %c0_11 = arith.constant 0 : index
    %9 = vector.load %arg5[%c0_9, %c0_10, %c0_11] : memref<1x4x2xbf16, #tpu.memory_space<vmem>>, vector<1x4x2xbf16>
    %10 = vector.shape_cast %9 : vector<1x4x2xbf16> to vector<4x2xbf16>
    %c0_12 = arith.constant 0 : index
    %c0_13 = arith.constant 0 : index
    %11 = vector.load %arg7[%c0_12, %c0_13] : memref<2x4xbf16, #tpu.memory_space<vmem>>, vector<2x4xbf16>
    %cst_14 = arith.constant dense<0.000000e+00> : vector<4x4xf32>
    %12 = tpu.matmul %10, %11, %cst_14 {dimension_numbers = #tpu.dot_dimension_numbers<[1], [0], [0], [1], [0, 0, 1, 1], [], []>} : vector<4x2xbf16>, vector<2x4xbf16>, vector<4x4xf32> -> vector<4x4xf32>
    %13 = arith.addf %8, %12 : vector<4x4xf32>
    %c0_15 = arith.constant 0 : index
    %c0_16 = arith.constant 0 : index
    %c0_17 = arith.constant 0 : index
    %14 = vector.load %arg6[%c0_15, %c0_16, %c0_17] : memref<1x4x2xbf16, #tpu.memory_space<vmem>>, vector<1x4x2xbf16>
    %15 = vector.shape_cast %14 : vector<1x4x2xbf16> to vector<4x2xbf16>
    %c0_18 = arith.constant 0 : index
    %c0_19 = arith.constant 0 : index
    %16 = vector.load %arg8[%c0_18, %c0_19] : memref<2x4xbf16, #tpu.memory_space<vmem>>, vector<2x4xbf16>
    %cst_20 = arith.constant dense<0.000000e+00> : vector<4x4xf32>
    %17 = tpu.matmul %15, %16, %cst_20 {dimension_numbers = #tpu.dot_dimension_numbers<[1], [0], [0], [1], [0, 0, 1, 1], [], []>} : vector<4x2xbf16>, vector<2x4xbf16>, vector<4x4xf32> -> vector<4x4xf32>
    %18 = arith.addf %13, %17 : vector<4x4xf32>
    %cst_21 = arith.constant dense<0xFF800000> : vector<4xf32>
    %19 = vector.multi_reduction <maximumf>, %18, %cst_21 [1] : vector<4x4xf32> to vector<4xf32>
    %20 = vector.shape_cast %19 : vector<4xf32> to vector<4x1xf32>
    %21 = vector.broadcast %20 : vector<4x1xf32> to vector<4x4xf32>
    %22 = arith.subf %18, %21 : vector<4x4xf32>
    %23 = math.exp %22 : vector<4x4xf32>
    %cst_22 = arith.constant dense<0.000000e+00> : vector<4xf32>
    %24 = vector.multi_reduction <add>, %23, %cst_22 [1] : vector<4x4xf32> to vector<4xf32>
    %25 = vector.shape_cast %24 : vector<4xf32> to vector<4x1xf32>
    %26 = tpu.reciprocal %25 {approx = true} : vector<4x1xf32> -> vector<4x1xf32>
    %27 = vector.broadcast %26 : vector<4x1xf32> to vector<4x4xf32>
    %28 = arith.mulf %23, %27 : vector<4x4xf32>
    %29 = arith.truncf %28 : vector<4x4xf32> to vector<4x4xbf16>
    %cst_23 = arith.constant dense<0.000000e+00> : vector<4x16xf32>
    %30 = tpu.matmul %29, %5, %cst_23 {dimension_numbers = #tpu.dot_dimension_numbers<[1], [0], [0], [1], [0, 0, 1, 1], [], []>} : vector<4x4xbf16>, vector<4x16xbf16>, vector<4x16xf32> -> vector<4x16xf32>
    %c0_24 = arith.constant 0 : index
    %c0_25 = arith.constant 0 : index
    %c0_26 = arith.constant 0 : index
    %31 = vector.load %arg9[%c0_24, %c0_25, %c0_26] : memref<1x4x16xf32, #tpu.memory_space<vmem>>, vector<1x4x16xf32>
    %32 = vector.shape_cast %31 : vector<1x4x16xf32> to vector<4x16xf32>
    %33 = vector.shape_cast %30 : vector<4x16xf32> to vector<1x4x16xf32>
    tpu.vector_store %arg9[%c0_24, %c0_25, %c0_26], %33 {strides = array<i32>} : memref<1x4x16xf32, #tpu.memory_space<vmem>>, vector<1x4x16xf32>,
    return
  }
  func.func @transform_0(%arg0: i32, %arg1: i32) -> (i32, i32, i32) {
    %c0_i32 = arith.constant 0 : i32
    %c0_i32_0 = arith.constant 0 : i32
    return %arg0, %arg1, %c0_i32 : i32, i32, i32
  }
  func.func @transform_1(%arg0: i32, %arg1: i32) -> (i32, i32, i32) {
    %c0_i32 = arith.constant 0 : i32
    %c0_i32_0 = arith.constant 0 : i32
    %c0_i32_1 = arith.constant 0 : i32
    return %arg0, %c0_i32, %c0_i32_0 : i32, i32, i32
  }
  func.func @transform_2(%arg0: i32, %arg1: i32) -> (i32, i32, i32) {
    %c0_i32 = arith.constant 0 : i32
    %c0_i32_0 = arith.constant 0 : i32
    %c0_i32_1 = arith.constant 0 : i32
    return %arg0, %c0_i32, %c0_i32_0 : i32, i32, i32
  }
  func.func @transform_3(%arg0: i32, %arg1: i32) -> (i32, i32, i32) {
    %c0_i32 = arith.constant 0 : i32
    %c0_i32_0 = arith.constant 0 : i32
    return %arg0, %arg1, %c0_i32 : i32, i32, i32
  }
  func.func @transform_4(%arg0: i32, %arg1: i32) -> (i32, i32, i32) {
    %c0_i32 = arith.constant 0 : i32
    %c0_i32_0 = arith.constant 0 : i32
    return %arg0, %arg1, %c0_i32 : i32, i32, i32
  }
  func.func @transform_5(%arg0: i32, %arg1: i32) -> (i32, i32) {
    %c0_i32 = arith.constant 0 : i32
    %c0_i32_0 = arith.constant 0 : i32
    %c0_i32_1 = arith.constant 0 : i32
    return %c0_i32, %c0_i32_0 : i32, i32
  }
  func.func @transform_6(%arg0: i32, %arg1: i32) -> (i32, i32) {
    %c0_i32 = arith.constant 0 : i32
    %c0_i32_0 = arith.constant 0 : i32
    %c0_i32_1 = arith.constant 0 : i32
    return %c0_i32, %c0_i32_0 : i32, i32
  }
  func.func @transform_7(%arg0: i32, %arg1: i32) -> (i32, i32, i32) {
    %c0_i32 = arith.constant 0 : i32
    %c0_i32_0 = arith.constant 0 : i32
    return %arg0, %arg1, %c0_i32 : i32, i32, i32
  }
}

module attributes {stable_mosaic.version = 11 : i64} {
  func.func @_matmul_kernel(%arg0: i32, %arg1: i32, %arg2: i32, %arg3: memref<32x64xbf16, #tpu.memory_space<vmem>>, %arg4: memref<64x64xbf16, #tpu.memory_space<vmem>>, %arg5: memref<1x64xf32, #tpu.memory_space<vmem>>, %arg6: memref<32x64xf32, #tpu.memory_space<vmem>>, %arg7: memref<32x64xf32, #tpu.memory_space<vmem>>) attributes {dimension_semantics = [#tpu.dimension_semantics<parallel>, #tpu.dimension_semantics<parallel>, #tpu.dimension_semantics<arbitrary>], iteration_bounds = array<i64: 1, 1, 1>, scalar_prefetch = 0 : i64, scratch_operands = 1 : i64, tpu.core_type = #tpu.core_type<tc>, window_params = [{transform_indices = @transform_0, window_bounds = array<i64: 32, 64>}, {transform_indices = @transform_1, window_bounds = array<i64: 64, 64>}, {transform_indices = @transform_2, window_bounds = array<i64: 1, 64>}, {transform_indices = @transform_3, window_bounds = array<i64: 32, 64>}]} {
    %c0_i32 = arith.constant 0 : i32
    %0 = arith.cmpi eq, %arg2, %c0_i32 : i32
    %1 = arith.extui %0 : i1 to i32
    %c0_i32_0 = arith.constant 0 : i32
    %2 = arith.cmpi ne, %1, %c0_i32_0 : i32
    scf.if %2 {
      %cst_10 = arith.constant 0.000000e+00 : f32
      %12 = vector.broadcast %cst_10 : f32 to vector<32x64xf32>
      %c0_11 = arith.constant 0 : index
      %c0_12 = arith.constant 0 : index
      %13 = vector.load %arg7[%c0_11, %c0_12] : memref<32x64xf32, #tpu.memory_space<vmem>>, vector<32x64xf32>
      tpu.vector_store %arg7[%c0_11, %c0_12], %12 {strides = array<i32>} : memref<32x64xf32, #tpu.memory_space<vmem>>, vector<32x64xf32>,
    } else {
    }
    %c0 = arith.constant 0 : index
    %c0_1 = arith.constant 0 : index
    %3 = vector.load %arg7[%c0, %c0_1] : memref<32x64xf32, #tpu.memory_space<vmem>>, vector<32x64xf32>
    %c0_2 = arith.constant 0 : index
    %c0_3 = arith.constant 0 : index
    %4 = vector.load %arg3[%c0_2, %c0_3] : memref<32x64xbf16, #tpu.memory_space<vmem>>, vector<32x64xbf16>
    %c0_4 = arith.constant 0 : index
    %c0_5 = arith.constant 0 : index
    %5 = vector.load %arg4[%c0_4, %c0_5] : memref<64x64xbf16, #tpu.memory_space<vmem>>, vector<64x64xbf16>
    %cst = arith.constant dense<0.000000e+00> : vector<32x64xf32>
    %6 = tpu.matmul %4, %5, %cst {dimension_numbers = #tpu.dot_dimension_numbers<[1], [0], [0], [1], [0, 0, 1, 1], [], []>} : vector<32x64xbf16>, vector<64x64xbf16>, vector<32x64xf32> -> vector<32x64xf32>
    %7 = arith.addf %3, %6 : vector<32x64xf32>
    %c0_6 = arith.constant 0 : index
    %c0_7 = arith.constant 0 : index
    %8 = vector.load %arg7[%c0_6, %c0_7] : memref<32x64xf32, #tpu.memory_space<vmem>>, vector<32x64xf32>
    tpu.vector_store %arg7[%c0_6, %c0_7], %7 {strides = array<i32>} : memref<32x64xf32, #tpu.memory_space<vmem>>, vector<32x64xf32>,
    %c0_i32_8 = arith.constant 0 : i32
    %9 = arith.cmpi eq, %arg2, %c0_i32_8 : i32
    %10 = arith.extui %9 : i1 to i32
    %c0_i32_9 = arith.constant 0 : i32
    %11 = arith.cmpi ne, %10, %c0_i32_9 : i32
    scf.if %11 {
      %c0_10 = arith.constant 0 : index
      %c0_11 = arith.constant 0 : index
      %12 = vector.load %arg7[%c0_10, %c0_11] : memref<32x64xf32, #tpu.memory_space<vmem>>, vector<32x64xf32>
      %c0_12 = arith.constant 0 : index
      %c0_13 = arith.constant 0 : index
      %13 = vector.load %arg5[%c0_12, %c0_13] : memref<1x64xf32, #tpu.memory_space<vmem>>, vector<1x64xf32>
      %14 = vector.broadcast %13 : vector<1x64xf32> to vector<32x64xf32>
      %15 = arith.addf %12, %14 : vector<32x64xf32>
      %c0_14 = arith.constant 0 : index
      %c0_15 = arith.constant 0 : index
      %16 = vector.load %arg6[%c0_14, %c0_15] : memref<32x64xf32, #tpu.memory_space<vmem>>, vector<32x64xf32>
      tpu.vector_store %arg6[%c0_14, %c0_15], %15 {strides = array<i32>} : memref<32x64xf32, #tpu.memory_space<vmem>>, vector<32x64xf32>,
    } else {
    }
    return
  }
  func.func @transform_0(%arg0: i32, %arg1: i32, %arg2: i32) -> (i32, i32) {
    %c0_i32 = arith.constant 0 : i32
    return %arg0, %arg2 : i32, i32
  }
  func.func @transform_1(%arg0: i32, %arg1: i32, %arg2: i32) -> (i32, i32) {
    %c0_i32 = arith.constant 0 : i32
    return %arg2, %arg1 : i32, i32
  }
  func.func @transform_2(%arg0: i32, %arg1: i32, %arg2: i32) -> (i32, i32) {
    %c0_i32 = arith.constant 0 : i32
    %c0_i32_0 = arith.constant 0 : i32
    return %c0_i32, %arg1 : i32, i32
  }
  func.func @transform_3(%arg0: i32, %arg1: i32, %arg2: i32) -> (i32, i32) {
    %c0_i32 = arith.constant 0 : i32
    return %arg0, %arg1 : i32, i32
  }
}

module attributes {stable_mosaic.version = 11 : i64} {
  func.func @_ln_matmul_kernel(%arg0: i32, %arg1: i32, %arg2: memref<32x64xf32, #tpu.memory_space<vmem>>, %arg3: memref<1x64xf32, #tpu.memory_space<vmem>>, %arg4: memref<1x64xf32, #tpu.memory_space<vmem>>, %arg5: memref<64x256xbf16, #tpu.memory_space<vmem>>, %arg6: memref<1x256xf32, #tpu.memory_space<vmem>>, %arg7: memref<32x256xf32, #tpu.memory_space<vmem>>) attributes {dimension_semantics = [#tpu.dimension_semantics<parallel>, #tpu.dimension_semantics<parallel>], iteration_bounds = array<i64: 1, 1>, scalar_prefetch = 0 : i64, scratch_operands = 0 : i64, tpu.core_type = #tpu.core_type<tc>, window_params = [{transform_indices = @transform_0, window_bounds = array<i64: 32, 64>}, {pipeline_mode = #tpu.pipeline_mode<synchronous>, transform_indices = @transform_1, window_bounds = array<i64: 1, 64>}, {pipeline_mode = #tpu.pipeline_mode<synchronous>, transform_indices = @transform_2, window_bounds = array<i64: 1, 64>}, {transform_indices = @transform_3, window_bounds = array<i64: 64, 256>}, {transform_indices = @transform_4, window_bounds = array<i64: 1, 256>}, {transform_indices = @transform_5, window_bounds = array<i64: 32, 256>}]} {
    %c0 = arith.constant 0 : index
    %c0_0 = arith.constant 0 : index
    %0 = vector.load %arg2[%c0, %c0_0] : memref<32x64xf32, #tpu.memory_space<vmem>>, vector<32x64xf32>
    %cst = arith.constant dense<0.000000e+00> : vector<32xf32>
    %1 = vector.multi_reduction <add>, %0, %cst [1] : vector<32x64xf32> to vector<32xf32>
    %2 = vector.shape_cast %1 : vector<32xf32> to vector<32x1xf32>
    %cst_1 = arith.constant 6.400000e+01 : f32
    %3 = vector.broadcast %cst_1 : f32 to vector<32x1xf32>
    %4 = arith.divf %2, %3 : vector<32x1xf32>
    %5 = vector.broadcast %4 : vector<32x1xf32> to vector<32x64xf32>
    %6 = arith.subf %0, %5 : vector<32x64xf32>
    %7 = arith.mulf %6, %6 : vector<32x64xf32>
    %cst_2 = arith.constant dense<0.000000e+00> : vector<32xf32>
    %8 = vector.multi_reduction <add>, %7, %cst_2 [1] : vector<32x64xf32> to vector<32xf32>
    %9 = vector.shape_cast %8 : vector<32xf32> to vector<32x1xf32>
    %cst_3 = arith.constant 6.400000e+01 : f32
    %10 = vector.broadcast %cst_3 : f32 to vector<32x1xf32>
    %11 = arith.divf %9, %10 : vector<32x1xf32>
    %12 = vector.broadcast %4 : vector<32x1xf32> to vector<32x64xf32>
    %13 = arith.subf %0, %12 : vector<32x64xf32>
    %cst_4 = arith.constant 9.99999997E-7 : f32
    %14 = vector.broadcast %cst_4 : f32 to vector<32x1xf32>
    %15 = arith.addf %11, %14 : vector<32x1xf32>
    %16 = math.rsqrt %15 : vector<32x1xf32>
    %17 = vector.broadcast %16 : vector<32x1xf32> to vector<32x64xf32>
    %18 = arith.mulf %13, %17 : vector<32x64xf32>
    %c0_5 = arith.constant 0 : index
    %c0_6 = arith.constant 0 : index
    %19 = vector.load %arg3[%c0_5, %c0_6] : memref<1x64xf32, #tpu.memory_space<vmem>>, vector<1x64xf32>
    %20 = vector.broadcast %19 : vector<1x64xf32> to vector<32x64xf32>
    %21 = arith.mulf %18, %20 : vector<32x64xf32>
    %c0_7 = arith.constant 0 : index
    %c0_8 = arith.constant 0 : index
    %22 = vector.load %arg4[%c0_7, %c0_8] : memref<1x64xf32, #tpu.memory_space<vmem>>, vector<1x64xf32>
    %23 = vector.broadcast %22 : vector<1x64xf32> to vector<32x64xf32>
    %24 = arith.addf %21, %23 : vector<32x64xf32>
    %25 = arith.truncf %24 : vector<32x64xf32> to vector<32x64xbf16>
    %c0_9 = arith.constant 0 : index
    %c0_10 = arith.constant 0 : index
    %26 = vector.load %arg5[%c0_9, %c0_10] : memref<64x256xbf16, #tpu.memory_space<vmem>>, vector<64x256xbf16>
    %cst_11 = arith.constant dense<0.000000e+00> : vector<32x256xf32>
    %27 = tpu.matmul %25, %26, %cst_11 {dimension_numbers = #tpu.dot_dimension_numbers<[1], [0], [0], [1], [0, 0, 1, 1], [], []>} : vector<32x64xbf16>, vector<64x256xbf16>, vector<32x256xf32> -> vector<32x256xf32>
    %c0_12 = arith.constant 0 : index
    %c0_13 = arith.constant 0 : index
    %28 = vector.load %arg6[%c0_12, %c0_13] : memref<1x256xf32, #tpu.memory_space<vmem>>, vector<1x256xf32>
    %29 = vector.broadcast %28 : vector<1x256xf32> to vector<32x256xf32>
    %30 = arith.addf %27, %29 : vector<32x256xf32>
    %c0_14 = arith.constant 0 : index
    %c0_15 = arith.constant 0 : index
    %31 = vector.load %arg7[%c0_14, %c0_15] : memref<32x256xf32, #tpu.memory_space<vmem>>, vector<32x256xf32>
    tpu.vector_store %arg7[%c0_14, %c0_15], %30 {strides = array<i32>} : memref<32x256xf32, #tpu.memory_space<vmem>>, vector<32x256xf32>,
    return
  }
  func.func @transform_0(%arg0: i32, %arg1: i32) -> (i32, i32) {
    %c0_i32 = arith.constant 0 : i32
    %c0_i32_0 = arith.constant 0 : i32
    return %arg0, %c0_i32 : i32, i32
  }
  func.func @transform_1(%arg0: i32, %arg1: i32) -> (i32, i32) {
    %c0_i32 = arith.constant 0 : i32
    %c0_i32_0 = arith.constant 0 : i32
    %c0_i32_1 = arith.constant 0 : i32
    return %c0_i32, %c0_i32_0 : i32, i32
  }
  func.func @transform_2(%arg0: i32, %arg1: i32) -> (i32, i32) {
    %c0_i32 = arith.constant 0 : i32
    %c0_i32_0 = arith.constant 0 : i32
    %c0_i32_1 = arith.constant 0 : i32
    return %c0_i32, %c0_i32_0 : i32, i32
  }
  func.func @transform_3(%arg0: i32, %arg1: i32) -> (i32, i32) {
    %c0_i32 = arith.constant 0 : i32
    %c0_i32_0 = arith.constant 0 : i32
    return %c0_i32, %arg1 : i32, i32
  }
  func.func @transform_4(%arg0: i32, %arg1: i32) -> (i32, i32) {
    %c0_i32 = arith.constant 0 : i32
    %c0_i32_0 = arith.constant 0 : i32
    return %c0_i32, %arg1 : i32, i32
  }
  func.func @transform_5(%arg0: i32, %arg1: i32) -> (i32, i32) {
    %c0_i32 = arith.constant 0 : i32
    return %arg0, %arg1 : i32, i32
  }
}

module attributes {stable_mosaic.version = 11 : i64} {
  func.func @_matmul_res_kernel(%arg0: i32, %arg1: i32, %arg2: i32, %arg3: memref<32x256xbf16, #tpu.memory_space<vmem>>, %arg4: memref<256x64xbf16, #tpu.memory_space<vmem>>, %arg5: memref<1x64xf32, #tpu.memory_space<vmem>>, %arg6: memref<32x64xf32, #tpu.memory_space<vmem>>, %arg7: memref<32x64xf32, #tpu.memory_space<vmem>>, %arg8: memref<32x64xf32, #tpu.memory_space<vmem>>) attributes {dimension_semantics = [#tpu.dimension_semantics<parallel>, #tpu.dimension_semantics<parallel>, #tpu.dimension_semantics<arbitrary>], iteration_bounds = array<i64: 1, 1, 1>, scalar_prefetch = 0 : i64, scratch_operands = 1 : i64, tpu.core_type = #tpu.core_type<tc>, window_params = [{transform_indices = @transform_0, window_bounds = array<i64: 32, 256>}, {transform_indices = @transform_1, window_bounds = array<i64: 256, 64>}, {transform_indices = @transform_2, window_bounds = array<i64: 1, 64>}, {transform_indices = @transform_3, window_bounds = array<i64: 32, 64>}, {transform_indices = @transform_4, window_bounds = array<i64: 32, 64>}]} {
    %c0_i32 = arith.constant 0 : i32
    %0 = arith.cmpi eq, %arg2, %c0_i32 : i32
    %1 = arith.extui %0 : i1 to i32
    %c0_i32_0 = arith.constant 0 : i32
    %2 = arith.cmpi ne, %1, %c0_i32_0 : i32
    scf.if %2 {
      %cst_10 = arith.constant 0.000000e+00 : f32
      %12 = vector.broadcast %cst_10 : f32 to vector<32x64xf32>
      %c0_11 = arith.constant 0 : index
      %c0_12 = arith.constant 0 : index
      %13 = vector.load %arg8[%c0_11, %c0_12] : memref<32x64xf32, #tpu.memory_space<vmem>>, vector<32x64xf32>
      tpu.vector_store %arg8[%c0_11, %c0_12], %12 {strides = array<i32>} : memref<32x64xf32, #tpu.memory_space<vmem>>, vector<32x64xf32>,
    } else {
    }
    %c0 = arith.constant 0 : index
    %c0_1 = arith.constant 0 : index
    %3 = vector.load %arg8[%c0, %c0_1] : memref<32x64xf32, #tpu.memory_space<vmem>>, vector<32x64xf32>
    %c0_2 = arith.constant 0 : index
    %c0_3 = arith.constant 0 : index
    %4 = vector.load %arg3[%c0_2, %c0_3] : memref<32x256xbf16, #tpu.memory_space<vmem>>, vector<32x256xbf16>
    %c0_4 = arith.constant 0 : index
    %c0_5 = arith.constant 0 : index
    %5 = vector.load %arg4[%c0_4, %c0_5] : memref<256x64xbf16, #tpu.memory_space<vmem>>, vector<256x64xbf16>
    %cst = arith.constant dense<0.000000e+00> : vector<32x64xf32>
    %6 = tpu.matmul %4, %5, %cst {dimension_numbers = #tpu.dot_dimension_numbers<[1], [0], [0], [1], [0, 0, 1, 1], [], []>} : vector<32x256xbf16>, vector<256x64xbf16>, vector<32x64xf32> -> vector<32x64xf32>
    %7 = arith.addf %3, %6 : vector<32x64xf32>
    %c0_6 = arith.constant 0 : index
    %c0_7 = arith.constant 0 : index
    %8 = vector.load %arg8[%c0_6, %c0_7] : memref<32x64xf32, #tpu.memory_space<vmem>>, vector<32x64xf32>
    tpu.vector_store %arg8[%c0_6, %c0_7], %7 {strides = array<i32>} : memref<32x64xf32, #tpu.memory_space<vmem>>, vector<32x64xf32>,
    %c0_i32_8 = arith.constant 0 : i32
    %9 = arith.cmpi eq, %arg2, %c0_i32_8 : i32
    %10 = arith.extui %9 : i1 to i32
    %c0_i32_9 = arith.constant 0 : i32
    %11 = arith.cmpi ne, %10, %c0_i32_9 : i32
    scf.if %11 {
      %c0_10 = arith.constant 0 : index
      %c0_11 = arith.constant 0 : index
      %12 = vector.load %arg8[%c0_10, %c0_11] : memref<32x64xf32, #tpu.memory_space<vmem>>, vector<32x64xf32>
      %c0_12 = arith.constant 0 : index
      %c0_13 = arith.constant 0 : index
      %13 = vector.load %arg5[%c0_12, %c0_13] : memref<1x64xf32, #tpu.memory_space<vmem>>, vector<1x64xf32>
      %14 = vector.broadcast %13 : vector<1x64xf32> to vector<32x64xf32>
      %15 = arith.addf %12, %14 : vector<32x64xf32>
      %c0_14 = arith.constant 0 : index
      %c0_15 = arith.constant 0 : index
      %16 = vector.load %arg6[%c0_14, %c0_15] : memref<32x64xf32, #tpu.memory_space<vmem>>, vector<32x64xf32>
      %17 = arith.addf %15, %16 : vector<32x64xf32>
      %c0_16 = arith.constant 0 : index
      %c0_17 = arith.constant 0 : index
      %18 = vector.load %arg7[%c0_16, %c0_17] : memref<32x64xf32, #tpu.memory_space<vmem>>, vector<32x64xf32>
      tpu.vector_store %arg7[%c0_16, %c0_17], %17 {strides = array<i32>} : memref<32x64xf32, #tpu.memory_space<vmem>>, vector<32x64xf32>,
    } else {
    }
    return
  }
  func.func @transform_0(%arg0: i32, %arg1: i32, %arg2: i32) -> (i32, i32) {
    %c0_i32 = arith.constant 0 : i32
    return %arg0, %arg2 : i32, i32
  }
  func.func @transform_1(%arg0: i32, %arg1: i32, %arg2: i32) -> (i32, i32) {
    %c0_i32 = arith.constant 0 : i32
    return %arg2, %arg1 : i32, i32
  }
  func.func @transform_2(%arg0: i32, %arg1: i32, %arg2: i32) -> (i32, i32) {
    %c0_i32 = arith.constant 0 : i32
    %c0_i32_0 = arith.constant 0 : i32
    return %c0_i32, %arg1 : i32, i32
  }
  func.func @transform_3(%arg0: i32, %arg1: i32, %arg2: i32) -> (i32, i32) {
    %c0_i32 = arith.constant 0 : i32
    return %arg0, %arg1 : i32, i32
  }
  func.func @transform_4(%arg0: i32, %arg1: i32, %arg2: i32) -> (i32, i32) {
    %c0_i32 = arith.constant 0 : i32
    return %arg0, %arg1 : i32, i32
  }
}

module attributes {stable_mosaic.version = 11 : i64} {
  func.func @_attn_kernel(%arg0: i32, %arg1: i32, %arg2: memref<1x16x16xbf16, #tpu.memory_space<vmem>>, %arg3: memref<1x16x16xbf16, #tpu.memory_space<vmem>>, %arg4: memref<1x16x16xbf16, #tpu.memory_space<vmem>>, %arg5: memref<1x16x4xbf16, #tpu.memory_space<vmem>>, %arg6: memref<1x16x4xbf16, #tpu.memory_space<vmem>>, %arg7: memref<4x16xbf16, #tpu.memory_space<vmem>>, %arg8: memref<4x16xbf16, #tpu.memory_space<vmem>>, %arg9: memref<1x16x16xf32, #tpu.memory_space<vmem>>) attributes {dimension_semantics = [#tpu.dimension_semantics<parallel>, #tpu.dimension_semantics<parallel>], iteration_bounds = array<i64: 8, 1>, scalar_prefetch = 0 : i64, scratch_operands = 0 : i64, tpu.core_type = #tpu.core_type<tc>, window_params = [{transform_indices = @transform_0, window_bounds = array<i64: 1, 16, 16>}, {transform_indices = @transform_1, window_bounds = array<i64: 1, 16, 16>}, {transform_indices = @transform_2, window_bounds = array<i64: 1, 16, 16>}, {transform_indices = @transform_3, window_bounds = array<i64: 1, 16, 4>}, {transform_indices = @transform_4, window_bounds = array<i64: 1, 16, 4>}, {pipeline_mode = #tpu.pipeline_mode<synchronous>, transform_indices = @transform_5, window_bounds = array<i64: 4, 16>}, {pipeline_mode = #tpu.pipeline_mode<synchronous>, transform_indices = @transform_6, window_bounds = array<i64: 4, 16>}, {transform_indices = @transform_7, window_bounds = array<i64: 1, 16, 16>}]} {
    %c0 = arith.constant 0 : index
    %c0_0 = arith.constant 0 : index
    %c0_1 = arith.constant 0 : index
    %0 = vector.load %arg2[%c0, %c0_0, %c0_1] : memref<1x16x16xbf16, #tpu.memory_space<vmem>>, vector<1x16x16xbf16>
    %1 = vector.shape_cast %0 : vector<1x16x16xbf16> to vector<16x16xbf16>
    %c0_2 = arith.constant 0 : index
    %c0_3 = arith.constant 0 : index
    %c0_4 = arith.constant 0 : index
    %2 = vector.load %arg3[%c0_2, %c0_3, %c0_4] : memref<1x16x16xbf16, #tpu.memory_space<vmem>>, vector<1x16x16xbf16>
    %3 = vector.shape_cast %2 : vector<1x16x16xbf16> to vector<16x16xbf16>
    %c0_5 = arith.constant 0 : index
    %c0_6 = arith.constant 0 : index
    %c0_7 = arith.constant 0 : index
    %4 = vector.load %arg4[%c0_5, %c0_6, %c0_7] : memref<1x16x16xbf16, #tpu.memory_space<vmem>>, vector<1x16x16xbf16>
    %5 = vector.shape_cast %4 : vector<1x16x16xbf16> to vector<16x16xbf16>
    %cst = arith.constant dense<0.000000e+00> : vector<16x16xf32>
    %6 = tpu.matmul %1, %3, %cst {dimension_numbers = #tpu.dot_dimension_numbers<[1], [1], [0], [0], [0, 0, 1, 0], [], []>} : vector<16x16xbf16>, vector<16x16xbf16>, vector<16x16xf32> -> vector<16x16xf32>
    %cst_8 = arith.constant 2.500000e-01 : f32
    %7 = vector.broadcast %cst_8 : f32 to vector<16x16xf32>
    %8 = arith.mulf %6, %7 : vector<16x16xf32>
    %c0_9 = arith.constant 0 : index
    %c0_10 = arith.constant 0 : index
    %c0_11 = arith.constant 0 : index
    %9 = vector.load %arg5[%c0_9, %c0_10, %c0_11] : memref<1x16x4xbf16, #tpu.memory_space<vmem>>, vector<1x16x4xbf16>
    %10 = vector.shape_cast %9 : vector<1x16x4xbf16> to vector<16x4xbf16>
    %c0_12 = arith.constant 0 : index
    %c0_13 = arith.constant 0 : index
    %11 = vector.load %arg7[%c0_12, %c0_13] : memref<4x16xbf16, #tpu.memory_space<vmem>>, vector<4x16xbf16>
    %cst_14 = arith.constant dense<0.000000e+00> : vector<16x16xf32>
    %12 = tpu.matmul %10, %11, %cst_14 {dimension_numbers = #tpu.dot_dimension_numbers<[1], [0], [0], [1], [0, 0, 1, 1], [], []>} : vector<16x4xbf16>, vector<4x16xbf16>, vector<16x16xf32> -> vector<16x16xf32>
    %13 = arith.addf %8, %12 : vector<16x16xf32>
    %c0_15 = arith.constant 0 : index
    %c0_16 = arith.constant 0 : index
    %c0_17 = arith.constant 0 : index
    %14 = vector.load %arg6[%c0_15, %c0_16, %c0_17] : memref<1x16x4xbf16, #tpu.memory_space<vmem>>, vector<1x16x4xbf16>
    %15 = vector.shape_cast %14 : vector<1x16x4xbf16> to vector<16x4xbf16>
    %c0_18 = arith.constant 0 : index
    %c0_19 = arith.constant 0 : index
    %16 = vector.load %arg8[%c0_18, %c0_19] : memref<4x16xbf16, #tpu.memory_space<vmem>>, vector<4x16xbf16>
    %cst_20 = arith.constant dense<0.000000e+00> : vector<16x16xf32>
    %17 = tpu.matmul %15, %16, %cst_20 {dimension_numbers = #tpu.dot_dimension_numbers<[1], [0], [0], [1], [0, 0, 1, 1], [], []>} : vector<16x4xbf16>, vector<4x16xbf16>, vector<16x16xf32> -> vector<16x16xf32>
    %18 = arith.addf %13, %17 : vector<16x16xf32>
    %cst_21 = arith.constant dense<0xFF800000> : vector<16xf32>
    %19 = vector.multi_reduction <maximumf>, %18, %cst_21 [1] : vector<16x16xf32> to vector<16xf32>
    %20 = vector.shape_cast %19 : vector<16xf32> to vector<16x1xf32>
    %21 = vector.broadcast %20 : vector<16x1xf32> to vector<16x16xf32>
    %22 = arith.subf %18, %21 : vector<16x16xf32>
    %23 = math.exp %22 : vector<16x16xf32>
    %cst_22 = arith.constant dense<0.000000e+00> : vector<16xf32>
    %24 = vector.multi_reduction <add>, %23, %cst_22 [1] : vector<16x16xf32> to vector<16xf32>
    %25 = vector.shape_cast %24 : vector<16xf32> to vector<16x1xf32>
    %26 = tpu.reciprocal %25 {approx = true} : vector<16x1xf32> -> vector<16x1xf32>
    %27 = vector.broadcast %26 : vector<16x1xf32> to vector<16x16xf32>
    %28 = arith.mulf %23, %27 : vector<16x16xf32>
    %29 = arith.truncf %28 : vector<16x16xf32> to vector<16x16xbf16>
    %cst_23 = arith.constant dense<0.000000e+00> : vector<16x16xf32>
    %30 = tpu.matmul %29, %5, %cst_23 {dimension_numbers = #tpu.dot_dimension_numbers<[1], [0], [0], [1], [0, 0, 1, 1], [], []>} : vector<16x16xbf16>, vector<16x16xbf16>, vector<16x16xf32> -> vector<16x16xf32>
    %c0_24 = arith.constant 0 : index
    %c0_25 = arith.constant 0 : index
    %c0_26 = arith.constant 0 : index
    %31 = vector.load %arg9[%c0_24, %c0_25, %c0_26] : memref<1x16x16xf32, #tpu.memory_space<vmem>>, vector<1x16x16xf32>
    %32 = vector.shape_cast %31 : vector<1x16x16xf32> to vector<16x16xf32>
    %33 = vector.shape_cast %30 : vector<16x16xf32> to vector<1x16x16xf32>
    tpu.vector_store %arg9[%c0_24, %c0_25, %c0_26], %33 {strides = array<i32>} : memref<1x16x16xf32, #tpu.memory_space<vmem>>, vector<1x16x16xf32>,
    return
  }
  func.func @transform_0(%arg0: i32, %arg1: i32) -> (i32, i32, i32) {
    %c0_i32 = arith.constant 0 : i32
    %c0_i32_0 = arith.constant 0 : i32
    return %arg0, %arg1, %c0_i32 : i32, i32, i32
  }
  func.func @transform_1(%arg0: i32, %arg1: i32) -> (i32, i32, i32) {
    %c0_i32 = arith.constant 0 : i32
    %c0_i32_0 = arith.constant 0 : i32
    %c0_i32_1 = arith.constant 0 : i32
    return %arg0, %c0_i32, %c0_i32_0 : i32, i32, i32
  }
  func.func @transform_2(%arg0: i32, %arg1: i32) -> (i32, i32, i32) {
    %c0_i32 = arith.constant 0 : i32
    %c0_i32_0 = arith.constant 0 : i32
    %c0_i32_1 = arith.constant 0 : i32
    return %arg0, %c0_i32, %c0_i32_0 : i32, i32, i32
  }
  func.func @transform_3(%arg0: i32, %arg1: i32) -> (i32, i32, i32) {
    %c0_i32 = arith.constant 0 : i32
    %c0_i32_0 = arith.constant 0 : i32
    return %arg0, %arg1, %c0_i32 : i32, i32, i32
  }
  func.func @transform_4(%arg0: i32, %arg1: i32) -> (i32, i32, i32) {
    %c0_i32 = arith.constant 0 : i32
    %c0_i32_0 = arith.constant 0 : i32
    return %arg0, %arg1, %c0_i32 : i32, i32, i32
  }
  func.func @transform_5(%arg0: i32, %arg1: i32) -> (i32, i32) {
    %c0_i32 = arith.constant 0 : i32
    %c0_i32_0 = arith.constant 0 : i32
    %c0_i32_1 = arith.constant 0 : i32
    return %c0_i32, %c0_i32_0 : i32, i32
  }
  func.func @transform_6(%arg0: i32, %arg1: i32) -> (i32, i32) {
    %c0_i32 = arith.constant 0 : i32
    %c0_i32_0 = arith.constant 0 : i32
    %c0_i32_1 = arith.constant 0 : i32
    return %c0_i32, %c0_i32_0 : i32, i32
  }
  func.func @transform_7(%arg0: i32, %arg1: i32) -> (i32, i32, i32) {
    %c0_i32 = arith.constant 0 : i32
    %c0_i32_0 = arith.constant 0 : i32
    return %arg0, %arg1, %c0_i32 : i32, i32, i32
  }
}

module attributes {stable_mosaic.version = 11 : i64} {
  func.func @_matmul_res_kernel(%arg0: i32, %arg1: i32, %arg2: i32, %arg3: memref<32x64xbf16, #tpu.memory_space<vmem>>, %arg4: memref<64x64xbf16, #tpu.memory_space<vmem>>, %arg5: memref<1x64xf32, #tpu.memory_space<vmem>>, %arg6: memref<32x64xf32, #tpu.memory_space<vmem>>, %arg7: memref<32x64xf32, #tpu.memory_space<vmem>>, %arg8: memref<32x64xf32, #tpu.memory_space<vmem>>) attributes {dimension_semantics = [#tpu.dimension_semantics<parallel>, #tpu.dimension_semantics<parallel>, #tpu.dimension_semantics<arbitrary>], iteration_bounds = array<i64: 1, 1, 1>, scalar_prefetch = 0 : i64, scratch_operands = 1 : i64, tpu.core_type = #tpu.core_type<tc>, window_params = [{transform_indices = @transform_0, window_bounds = array<i64: 32, 64>}, {transform_indices = @transform_1, window_bounds = array<i64: 64, 64>}, {transform_indices = @transform_2, window_bounds = array<i64: 1, 64>}, {transform_indices = @transform_3, window_bounds = array<i64: 32, 64>}, {transform_indices = @transform_4, window_bounds = array<i64: 32, 64>}]} {
    %c0_i32 = arith.constant 0 : i32
    %0 = arith.cmpi eq, %arg2, %c0_i32 : i32
    %1 = arith.extui %0 : i1 to i32
    %c0_i32_0 = arith.constant 0 : i32
    %2 = arith.cmpi ne, %1, %c0_i32_0 : i32
    scf.if %2 {
      %cst_10 = arith.constant 0.000000e+00 : f32
      %12 = vector.broadcast %cst_10 : f32 to vector<32x64xf32>
      %c0_11 = arith.constant 0 : index
      %c0_12 = arith.constant 0 : index
      %13 = vector.load %arg8[%c0_11, %c0_12] : memref<32x64xf32, #tpu.memory_space<vmem>>, vector<32x64xf32>
      tpu.vector_store %arg8[%c0_11, %c0_12], %12 {strides = array<i32>} : memref<32x64xf32, #tpu.memory_space<vmem>>, vector<32x64xf32>,
    } else {
    }
    %c0 = arith.constant 0 : index
    %c0_1 = arith.constant 0 : index
    %3 = vector.load %arg8[%c0, %c0_1] : memref<32x64xf32, #tpu.memory_space<vmem>>, vector<32x64xf32>
    %c0_2 = arith.constant 0 : index
    %c0_3 = arith.constant 0 : index
    %4 = vector.load %arg3[%c0_2, %c0_3] : memref<32x64xbf16, #tpu.memory_space<vmem>>, vector<32x64xbf16>
    %c0_4 = arith.constant 0 : index
    %c0_5 = arith.constant 0 : index
    %5 = vector.load %arg4[%c0_4, %c0_5] : memref<64x64xbf16, #tpu.memory_space<vmem>>, vector<64x64xbf16>
    %cst = arith.constant dense<0.000000e+00> : vector<32x64xf32>
    %6 = tpu.matmul %4, %5, %cst {dimension_numbers = #tpu.dot_dimension_numbers<[1], [0], [0], [1], [0, 0, 1, 1], [], []>} : vector<32x64xbf16>, vector<64x64xbf16>, vector<32x64xf32> -> vector<32x64xf32>
    %7 = arith.addf %3, %6 : vector<32x64xf32>
    %c0_6 = arith.constant 0 : index
    %c0_7 = arith.constant 0 : index
    %8 = vector.load %arg8[%c0_6, %c0_7] : memref<32x64xf32, #tpu.memory_space<vmem>>, vector<32x64xf32>
    tpu.vector_store %arg8[%c0_6, %c0_7], %7 {strides = array<i32>} : memref<32x64xf32, #tpu.memory_space<vmem>>, vector<32x64xf32>,
    %c0_i32_8 = arith.constant 0 : i32
    %9 = arith.cmpi eq, %arg2, %c0_i32_8 : i32
    %10 = arith.extui %9 : i1 to i32
    %c0_i32_9 = arith.constant 0 : i32
    %11 = arith.cmpi ne, %10, %c0_i32_9 : i32
    scf.if %11 {
      %c0_10 = arith.constant 0 : index
      %c0_11 = arith.constant 0 : index
      %12 = vector.load %arg8[%c0_10, %c0_11] : memref<32x64xf32, #tpu.memory_space<vmem>>, vector<32x64xf32>
      %c0_12 = arith.constant 0 : index
      %c0_13 = arith.constant 0 : index
      %13 = vector.load %arg5[%c0_12, %c0_13] : memref<1x64xf32, #tpu.memory_space<vmem>>, vector<1x64xf32>
      %14 = vector.broadcast %13 : vector<1x64xf32> to vector<32x64xf32>
      %15 = arith.addf %12, %14 : vector<32x64xf32>
      %c0_14 = arith.constant 0 : index
      %c0_15 = arith.constant 0 : index
      %16 = vector.load %arg6[%c0_14, %c0_15] : memref<32x64xf32, #tpu.memory_space<vmem>>, vector<32x64xf32>
      %17 = arith.addf %15, %16 : vector<32x64xf32>
      %c0_16 = arith.constant 0 : index
      %c0_17 = arith.constant 0 : index
      %18 = vector.load %arg7[%c0_16, %c0_17] : memref<32x64xf32, #tpu.memory_space<vmem>>, vector<32x64xf32>
      tpu.vector_store %arg7[%c0_16, %c0_17], %17 {strides = array<i32>} : memref<32x64xf32, #tpu.memory_space<vmem>>, vector<32x64xf32>,
    } else {
    }
    return
  }
  func.func @transform_0(%arg0: i32, %arg1: i32, %arg2: i32) -> (i32, i32) {
    %c0_i32 = arith.constant 0 : i32
    return %arg0, %arg2 : i32, i32
  }
  func.func @transform_1(%arg0: i32, %arg1: i32, %arg2: i32) -> (i32, i32) {
    %c0_i32 = arith.constant 0 : i32
    return %arg2, %arg1 : i32, i32
  }
  func.func @transform_2(%arg0: i32, %arg1: i32, %arg2: i32) -> (i32, i32) {
    %c0_i32 = arith.constant 0 : i32
    %c0_i32_0 = arith.constant 0 : i32
    return %c0_i32, %arg1 : i32, i32
  }
  func.func @transform_3(%arg0: i32, %arg1: i32, %arg2: i32) -> (i32, i32) {
    %c0_i32 = arith.constant 0 : i32
    return %arg0, %arg1 : i32, i32
  }
  func.func @transform_4(%arg0: i32, %arg1: i32, %arg2: i32) -> (i32, i32) {
    %c0_i32 = arith.constant 0 : i32
    return %arg0, %arg1 : i32, i32
  }
}

module attributes {stable_mosaic.version = 11 : i64} {
  func.func @_matmul_kernel(%arg0: i32, %arg1: i32, %arg2: i32, %arg3: memref<32x64xbf16, #tpu.memory_space<vmem>>, %arg4: memref<64x32xbf16, #tpu.memory_space<vmem>>, %arg5: memref<1x32xf32, #tpu.memory_space<vmem>>, %arg6: memref<32x32xf32, #tpu.memory_space<vmem>>, %arg7: memref<32x32xf32, #tpu.memory_space<vmem>>) attributes {dimension_semantics = [#tpu.dimension_semantics<parallel>, #tpu.dimension_semantics<parallel>, #tpu.dimension_semantics<arbitrary>], iteration_bounds = array<i64: 1, 1, 1>, scalar_prefetch = 0 : i64, scratch_operands = 1 : i64, tpu.core_type = #tpu.core_type<tc>, window_params = [{transform_indices = @transform_0, window_bounds = array<i64: 32, 64>}, {transform_indices = @transform_1, window_bounds = array<i64: 64, 32>}, {transform_indices = @transform_2, window_bounds = array<i64: 1, 32>}, {transform_indices = @transform_3, window_bounds = array<i64: 32, 32>}]} {
    %c0_i32 = arith.constant 0 : i32
    %0 = arith.cmpi eq, %arg2, %c0_i32 : i32
    %1 = arith.extui %0 : i1 to i32
    %c0_i32_0 = arith.constant 0 : i32
    %2 = arith.cmpi ne, %1, %c0_i32_0 : i32
    scf.if %2 {
      %cst_10 = arith.constant 0.000000e+00 : f32
      %12 = vector.broadcast %cst_10 : f32 to vector<32x32xf32>
      %c0_11 = arith.constant 0 : index
      %c0_12 = arith.constant 0 : index
      %13 = vector.load %arg7[%c0_11, %c0_12] : memref<32x32xf32, #tpu.memory_space<vmem>>, vector<32x32xf32>
      tpu.vector_store %arg7[%c0_11, %c0_12], %12 {strides = array<i32>} : memref<32x32xf32, #tpu.memory_space<vmem>>, vector<32x32xf32>,
    } else {
    }
    %c0 = arith.constant 0 : index
    %c0_1 = arith.constant 0 : index
    %3 = vector.load %arg7[%c0, %c0_1] : memref<32x32xf32, #tpu.memory_space<vmem>>, vector<32x32xf32>
    %c0_2 = arith.constant 0 : index
    %c0_3 = arith.constant 0 : index
    %4 = vector.load %arg3[%c0_2, %c0_3] : memref<32x64xbf16, #tpu.memory_space<vmem>>, vector<32x64xbf16>
    %c0_4 = arith.constant 0 : index
    %c0_5 = arith.constant 0 : index
    %5 = vector.load %arg4[%c0_4, %c0_5] : memref<64x32xbf16, #tpu.memory_space<vmem>>, vector<64x32xbf16>
    %cst = arith.constant dense<0.000000e+00> : vector<32x32xf32>
    %6 = tpu.matmul %4, %5, %cst {dimension_numbers = #tpu.dot_dimension_numbers<[1], [0], [0], [1], [0, 0, 1, 1], [], []>} : vector<32x64xbf16>, vector<64x32xbf16>, vector<32x32xf32> -> vector<32x32xf32>
    %7 = arith.addf %3, %6 : vector<32x32xf32>
    %c0_6 = arith.constant 0 : index
    %c0_7 = arith.constant 0 : index
    %8 = vector.load %arg7[%c0_6, %c0_7] : memref<32x32xf32, #tpu.memory_space<vmem>>, vector<32x32xf32>
    tpu.vector_store %arg7[%c0_6, %c0_7], %7 {strides = array<i32>} : memref<32x32xf32, #tpu.memory_space<vmem>>, vector<32x32xf32>,
    %c0_i32_8 = arith.constant 0 : i32
    %9 = arith.cmpi eq, %arg2, %c0_i32_8 : i32
    %10 = arith.extui %9 : i1 to i32
    %c0_i32_9 = arith.constant 0 : i32
    %11 = arith.cmpi ne, %10, %c0_i32_9 : i32
    scf.if %11 {
      %c0_10 = arith.constant 0 : index
      %c0_11 = arith.constant 0 : index
      %12 = vector.load %arg7[%c0_10, %c0_11] : memref<32x32xf32, #tpu.memory_space<vmem>>, vector<32x32xf32>
      %c0_12 = arith.constant 0 : index
      %c0_13 = arith.constant 0 : index
      %13 = vector.load %arg5[%c0_12, %c0_13] : memref<1x32xf32, #tpu.memory_space<vmem>>, vector<1x32xf32>
      %14 = vector.broadcast %13 : vector<1x32xf32> to vector<32x32xf32>
      %15 = arith.addf %12, %14 : vector<32x32xf32>
      %c0_14 = arith.constant 0 : index
      %c0_15 = arith.constant 0 : index
      %16 = vector.load %arg6[%c0_14, %c0_15] : memref<32x32xf32, #tpu.memory_space<vmem>>, vector<32x32xf32>
      tpu.vector_store %arg6[%c0_14, %c0_15], %15 {strides = array<i32>} : memref<32x32xf32, #tpu.memory_space<vmem>>, vector<32x32xf32>,
    } else {
    }
    return
  }
  func.func @transform_0(%arg0: i32, %arg1: i32, %arg2: i32) -> (i32, i32) {
    %c0_i32 = arith.constant 0 : i32
    return %arg0, %arg2 : i32, i32
  }
  func.func @transform_1(%arg0: i32, %arg1: i32, %arg2: i32) -> (i32, i32) {
    %c0_i32 = arith.constant 0 : i32
    return %arg2, %arg1 : i32, i32
  }
  func.func @transform_2(%arg0: i32, %arg1: i32, %arg2: i32) -> (i32, i32) {
    %c0_i32 = arith.constant 0 : i32
    %c0_i32_0 = arith.constant 0 : i32
    return %c0_i32, %arg1 : i32, i32
  }
  func.func @transform_3(%arg0: i32, %arg1: i32, %arg2: i32) -> (i32, i32) {
    %c0_i32 = arith.constant 0 : i32
    return %arg0, %arg1 : i32, i32
  }
}

module attributes {stable_mosaic.version = 11 : i64} {
  func.func @_layernorm_kernel(%arg0: i32, %arg1: memref<32x32xf32, #tpu.memory_space<vmem>>, %arg2: memref<1x32xf32, #tpu.memory_space<vmem>>, %arg3: memref<1x32xf32, #tpu.memory_space<vmem>>, %arg4: memref<32x32xf32, #tpu.memory_space<vmem>>) attributes {dimension_semantics = [#tpu.dimension_semantics<parallel>], iteration_bounds = array<i64: 1>, scalar_prefetch = 0 : i64, scratch_operands = 0 : i64, tpu.core_type = #tpu.core_type<tc>, window_params = [{transform_indices = @transform_0, window_bounds = array<i64: 32, 32>}, {pipeline_mode = #tpu.pipeline_mode<synchronous>, transform_indices = @transform_1, window_bounds = array<i64: 1, 32>}, {pipeline_mode = #tpu.pipeline_mode<synchronous>, transform_indices = @transform_2, window_bounds = array<i64: 1, 32>}, {transform_indices = @transform_3, window_bounds = array<i64: 32, 32>}]} {
    %c0 = arith.constant 0 : index
    %c0_0 = arith.constant 0 : index
    %0 = vector.load %arg1[%c0, %c0_0] : memref<32x32xf32, #tpu.memory_space<vmem>>, vector<32x32xf32>
    %cst = arith.constant dense<0.000000e+00> : vector<32xf32>
    %1 = vector.multi_reduction <add>, %0, %cst [1] : vector<32x32xf32> to vector<32xf32>
    %2 = vector.shape_cast %1 : vector<32xf32> to vector<32x1xf32>
    %cst_1 = arith.constant 3.200000e+01 : f32
    %3 = vector.broadcast %cst_1 : f32 to vector<32x1xf32>
    %4 = arith.divf %2, %3 : vector<32x1xf32>
    %5 = vector.broadcast %4 : vector<32x1xf32> to vector<32x32xf32>
    %6 = arith.subf %0, %5 : vector<32x32xf32>
    %7 = arith.mulf %6, %6 : vector<32x32xf32>
    %cst_2 = arith.constant dense<0.000000e+00> : vector<32xf32>
    %8 = vector.multi_reduction <add>, %7, %cst_2 [1] : vector<32x32xf32> to vector<32xf32>
    %9 = vector.shape_cast %8 : vector<32xf32> to vector<32x1xf32>
    %cst_3 = arith.constant 3.200000e+01 : f32
    %10 = vector.broadcast %cst_3 : f32 to vector<32x1xf32>
    %11 = arith.divf %9, %10 : vector<32x1xf32>
    %12 = vector.broadcast %4 : vector<32x1xf32> to vector<32x32xf32>
    %13 = arith.subf %0, %12 : vector<32x32xf32>
    %cst_4 = arith.constant 9.99999997E-7 : f32
    %14 = vector.broadcast %cst_4 : f32 to vector<32x1xf32>
    %15 = arith.addf %11, %14 : vector<32x1xf32>
    %16 = math.rsqrt %15 : vector<32x1xf32>
    %17 = vector.broadcast %16 : vector<32x1xf32> to vector<32x32xf32>
    %18 = arith.mulf %13, %17 : vector<32x32xf32>
    %c0_5 = arith.constant 0 : index
    %c0_6 = arith.constant 0 : index
    %19 = vector.load %arg2[%c0_5, %c0_6] : memref<1x32xf32, #tpu.memory_space<vmem>>, vector<1x32xf32>
    %20 = vector.broadcast %19 : vector<1x32xf32> to vector<32x32xf32>
    %21 = arith.mulf %18, %20 : vector<32x32xf32>
    %c0_7 = arith.constant 0 : index
    %c0_8 = arith.constant 0 : index
    %22 = vector.load %arg3[%c0_7, %c0_8] : memref<1x32xf32, #tpu.memory_space<vmem>>, vector<1x32xf32>
    %23 = vector.broadcast %22 : vector<1x32xf32> to vector<32x32xf32>
    %24 = arith.addf %21, %23 : vector<32x32xf32>
    %c0_9 = arith.constant 0 : index
    %c0_10 = arith.constant 0 : index
    %25 = vector.load %arg4[%c0_9, %c0_10] : memref<32x32xf32, #tpu.memory_space<vmem>>, vector<32x32xf32>
    tpu.vector_store %arg4[%c0_9, %c0_10], %24 {strides = array<i32>} : memref<32x32xf32, #tpu.memory_space<vmem>>, vector<32x32xf32>,
    return
  }
  func.func @transform_0(%arg0: i32) -> (i32, i32) {
    %c0_i32 = arith.constant 0 : i32
    %c0_i32_0 = arith.constant 0 : i32
    return %arg0, %c0_i32 : i32, i32
  }
  func.func @transform_1(%arg0: i32) -> (i32, i32) {
    %c0_i32 = arith.constant 0 : i32
    %c0_i32_0 = arith.constant 0 : i32
    %c0_i32_1 = arith.constant 0 : i32
    return %c0_i32, %c0_i32_0 : i32, i32
  }
  func.func @transform_2(%arg0: i32) -> (i32, i32) {
    %c0_i32 = arith.constant 0 : i32
    %c0_i32_0 = arith.constant 0 : i32
    %c0_i32_1 = arith.constant 0 : i32
    return %c0_i32, %c0_i32_0 : i32, i32
  }
  func.func @transform_3(%arg0: i32) -> (i32, i32) {
    %c0_i32 = arith.constant 0 : i32
    %c0_i32_0 = arith.constant 0 : i32
    return %arg0, %c0_i32 : i32, i32
  }
}

module attributes {stable_mosaic.version = 11 : i64} {
  func.func @_conv3x3_kernel(%arg0: i32, %arg1: memref<1x6x6x32xbf16, #tpu.memory_space<vmem>>, %arg2: memref<9x32x32xbf16, #tpu.memory_space<vmem>>, %arg3: memref<1x4x4x32xf32, #tpu.memory_space<vmem>>) attributes {dimension_semantics = [#tpu.dimension_semantics<parallel>], iteration_bounds = array<i64: 2>, scalar_prefetch = 0 : i64, scratch_operands = 0 : i64, tpu.core_type = #tpu.core_type<tc>, window_params = [{transform_indices = @transform_0, window_bounds = array<i64: 1, 6, 6, 32>}, {pipeline_mode = #tpu.pipeline_mode<synchronous>, transform_indices = @transform_1, window_bounds = array<i64: 9, 32, 32>}, {transform_indices = @transform_2, window_bounds = array<i64: 1, 4, 4, 32>}]} {
    %c0 = arith.constant 0 : index
    %c0_0 = arith.constant 0 : index
    %c0_1 = arith.constant 0 : index
    %c0_2 = arith.constant 0 : index
    %0 = vector.load %arg1[%c0, %c0_0, %c0_1, %c0_2] : memref<1x6x6x32xbf16, #tpu.memory_space<vmem>>, vector<1x6x6x32xbf16>
    %1 = vector.shape_cast %0 : vector<1x6x6x32xbf16> to vector<6x6x32xbf16>
    %cst = arith.constant 0.000000e+00 : f32
    %2 = vector.broadcast %cst : f32 to vector<16x32xf32>
    %3 = vector.extract_strided_slice %1 {offsets = [0, 0, 0], sizes = [4, 4, 32], strides = [1, 1, 1]} : vector<6x6x32xbf16> to vector<4x4x32xbf16>
    %4 = vector.shape_cast %3 : vector<4x4x32xbf16> to vector<16x32xbf16>
    %c0_3 = arith.constant 0 : index
    %c0_4 = arith.constant 0 : index
    %c0_5 = arith.constant 0 : index
    %5 = vector.load %arg2[%c0_3, %c0_4, %c0_5] : memref<9x32x32xbf16, #tpu.memory_space<vmem>>, vector<1x32x32xbf16>
    %6 = vector.shape_cast %5 : vector<1x32x32xbf16> to vector<32x32xbf16>
    %cst_6 = arith.constant dense<0.000000e+00> : vector<16x32xf32>
    %7 = tpu.matmul %4, %6, %cst_6 {dimension_numbers = #tpu.dot_dimension_numbers<[1], [0], [0], [1], [0, 0, 1, 1], [], []>} : vector<16x32xbf16>, vector<32x32xbf16>, vector<16x32xf32> -> vector<16x32xf32>
    %8 = arith.addf %2, %7 : vector<16x32xf32>
    %9 = vector.extract_strided_slice %1 {offsets = [0, 1, 0], sizes = [4, 4, 32], strides = [1, 1, 1]} : vector<6x6x32xbf16> to vector<4x4x32xbf16>
    %10 = vector.shape_cast %9 : vector<4x4x32xbf16> to vector<16x32xbf16>
    %c1 = arith.constant 1 : index
    %c0_7 = arith.constant 0 : index
    %c0_8 = arith.constant 0 : index
    %11 = vector.load %arg2[%c1, %c0_7, %c0_8] : memref<9x32x32xbf16, #tpu.memory_space<vmem>>, vector<1x32x32xbf16>
    %12 = vector.shape_cast %11 : vector<1x32x32xbf16> to vector<32x32xbf16>
    %cst_9 = arith.constant dense<0.000000e+00> : vector<16x32xf32>
    %13 = tpu.matmul %10, %12, %cst_9 {dimension_numbers = #tpu.dot_dimension_numbers<[1], [0], [0], [1], [0, 0, 1, 1], [], []>} : vector<16x32xbf16>, vector<32x32xbf16>, vector<16x32xf32> -> vector<16x32xf32>
    %14 = arith.addf %8, %13 : vector<16x32xf32>
    %15 = vector.extract_strided_slice %1 {offsets = [0, 2, 0], sizes = [4, 4, 32], strides = [1, 1, 1]} : vector<6x6x32xbf16> to vector<4x4x32xbf16>
    %16 = vector.shape_cast %15 : vector<4x4x32xbf16> to vector<16x32xbf16>
    %c2 = arith.constant 2 : index
    %c0_10 = arith.constant 0 : index
    %c0_11 = arith.constant 0 : index
    %17 = vector.load %arg2[%c2, %c0_10, %c0_11] : memref<9x32x32xbf16, #tpu.memory_space<vmem>>, vector<1x32x32xbf16>
    %18 = vector.shape_cast %17 : vector<1x32x32xbf16> to vector<32x32xbf16>
    %cst_12 = arith.constant dense<0.000000e+00> : vector<16x32xf32>
    %19 = tpu.matmul %16, %18, %cst_12 {dimension_numbers = #tpu.dot_dimension_numbers<[1], [0], [0], [1], [0, 0, 1, 1], [], []>} : vector<16x32xbf16>, vector<32x32xbf16>, vector<16x32xf32> -> vector<16x32xf32>
    %20 = arith.addf %14, %19 : vector<16x32xf32>
    %21 = vector.extract_strided_slice %1 {offsets = [1, 0, 0], sizes = [4, 4, 32], strides = [1, 1, 1]} : vector<6x6x32xbf16> to vector<4x4x32xbf16>
    %22 = vector.shape_cast %21 : vector<4x4x32xbf16> to vector<16x32xbf16>
    %c3 = arith.constant 3 : index
    %c0_13 = arith.constant 0 : index
    %c0_14 = arith.constant 0 : index
    %23 = vector.load %arg2[%c3, %c0_13, %c0_14] : memref<9x32x32xbf16, #tpu.memory_space<vmem>>, vector<1x32x32xbf16>
    %24 = vector.shape_cast %23 : vector<1x32x32xbf16> to vector<32x32xbf16>
    %cst_15 = arith.constant dense<0.000000e+00> : vector<16x32xf32>
    %25 = tpu.matmul %22, %24, %cst_15 {dimension_numbers = #tpu.dot_dimension_numbers<[1], [0], [0], [1], [0, 0, 1, 1], [], []>} : vector<16x32xbf16>, vector<32x32xbf16>, vector<16x32xf32> -> vector<16x32xf32>
    %26 = arith.addf %20, %25 : vector<16x32xf32>
    %27 = vector.extract_strided_slice %1 {offsets = [1, 1, 0], sizes = [4, 4, 32], strides = [1, 1, 1]} : vector<6x6x32xbf16> to vector<4x4x32xbf16>
    %28 = vector.shape_cast %27 : vector<4x4x32xbf16> to vector<16x32xbf16>
    %c4 = arith.constant 4 : index
    %c0_16 = arith.constant 0 : index
    %c0_17 = arith.constant 0 : index
    %29 = vector.load %arg2[%c4, %c0_16, %c0_17] : memref<9x32x32xbf16, #tpu.memory_space<vmem>>, vector<1x32x32xbf16>
    %30 = vector.shape_cast %29 : vector<1x32x32xbf16> to vector<32x32xbf16>
    %cst_18 = arith.constant dense<0.000000e+00> : vector<16x32xf32>
    %31 = tpu.matmul %28, %30, %cst_18 {dimension_numbers = #tpu.dot_dimension_numbers<[1], [0], [0], [1], [0, 0, 1, 1], [], []>} : vector<16x32xbf16>, vector<32x32xbf16>, vector<16x32xf32> -> vector<16x32xf32>
    %32 = arith.addf %26, %31 : vector<16x32xf32>
    %33 = vector.extract_strided_slice %1 {offsets = [1, 2, 0], sizes = [4, 4, 32], strides = [1, 1, 1]} : vector<6x6x32xbf16> to vector<4x4x32xbf16>
    %34 = vector.shape_cast %33 : vector<4x4x32xbf16> to vector<16x32xbf16>
    %c5 = arith.constant 5 : index
    %c0_19 = arith.constant 0 : index
    %c0_20 = arith.constant 0 : index
    %35 = vector.load %arg2[%c5, %c0_19, %c0_20] : memref<9x32x32xbf16, #tpu.memory_space<vmem>>, vector<1x32x32xbf16>
    %36 = vector.shape_cast %35 : vector<1x32x32xbf16> to vector<32x32xbf16>
    %cst_21 = arith.constant dense<0.000000e+00> : vector<16x32xf32>
    %37 = tpu.matmul %34, %36, %cst_21 {dimension_numbers = #tpu.dot_dimension_numbers<[1], [0], [0], [1], [0, 0, 1, 1], [], []>} : vector<16x32xbf16>, vector<32x32xbf16>, vector<16x32xf32> -> vector<16x32xf32>
    %38 = arith.addf %32, %37 : vector<16x32xf32>
    %39 = vector.extract_strided_slice %1 {offsets = [2, 0, 0], sizes = [4, 4, 32], strides = [1, 1, 1]} : vector<6x6x32xbf16> to vector<4x4x32xbf16>
    %40 = vector.shape_cast %39 : vector<4x4x32xbf16> to vector<16x32xbf16>
    %c6 = arith.constant 6 : index
    %c0_22 = arith.constant 0 : index
    %c0_23 = arith.constant 0 : index
    %41 = vector.load %arg2[%c6, %c0_22, %c0_23] : memref<9x32x32xbf16, #tpu.memory_space<vmem>>, vector<1x32x32xbf16>
    %42 = vector.shape_cast %41 : vector<1x32x32xbf16> to vector<32x32xbf16>
    %cst_24 = arith.constant dense<0.000000e+00> : vector<16x32xf32>
    %43 = tpu.matmul %40, %42, %cst_24 {dimension_numbers = #tpu.dot_dimension_numbers<[1], [0], [0], [1], [0, 0, 1, 1], [], []>} : vector<16x32xbf16>, vector<32x32xbf16>, vector<16x32xf32> -> vector<16x32xf32>
    %44 = arith.addf %38, %43 : vector<16x32xf32>
    %45 = vector.extract_strided_slice %1 {offsets = [2, 1, 0], sizes = [4, 4, 32], strides = [1, 1, 1]} : vector<6x6x32xbf16> to vector<4x4x32xbf16>
    %46 = vector.shape_cast %45 : vector<4x4x32xbf16> to vector<16x32xbf16>
    %c7 = arith.constant 7 : index
    %c0_25 = arith.constant 0 : index
    %c0_26 = arith.constant 0 : index
    %47 = vector.load %arg2[%c7, %c0_25, %c0_26] : memref<9x32x32xbf16, #tpu.memory_space<vmem>>, vector<1x32x32xbf16>
    %48 = vector.shape_cast %47 : vector<1x32x32xbf16> to vector<32x32xbf16>
    %cst_27 = arith.constant dense<0.000000e+00> : vector<16x32xf32>
    %49 = tpu.matmul %46, %48, %cst_27 {dimension_numbers = #tpu.dot_dimension_numbers<[1], [0], [0], [1], [0, 0, 1, 1], [], []>} : vector<16x32xbf16>, vector<32x32xbf16>, vector<16x32xf32> -> vector<16x32xf32>
    %50 = arith.addf %44, %49 : vector<16x32xf32>
    %51 = vector.extract_strided_slice %1 {offsets = [2, 2, 0], sizes = [4, 4, 32], strides = [1, 1, 1]} : vector<6x6x32xbf16> to vector<4x4x32xbf16>
    %52 = vector.shape_cast %51 : vector<4x4x32xbf16> to vector<16x32xbf16>
    %c8 = arith.constant 8 : index
    %c0_28 = arith.constant 0 : index
    %c0_29 = arith.constant 0 : index
    %53 = vector.load %arg2[%c8, %c0_28, %c0_29] : memref<9x32x32xbf16, #tpu.memory_space<vmem>>, vector<1x32x32xbf16>
    %54 = vector.shape_cast %53 : vector<1x32x32xbf16> to vector<32x32xbf16>
    %cst_30 = arith.constant dense<0.000000e+00> : vector<16x32xf32>
    %55 = tpu.matmul %52, %54, %cst_30 {dimension_numbers = #tpu.dot_dimension_numbers<[1], [0], [0], [1], [0, 0, 1, 1], [], []>} : vector<16x32xbf16>, vector<32x32xbf16>, vector<16x32xf32> -> vector<16x32xf32>
    %56 = arith.addf %50, %55 : vector<16x32xf32>
    %57 = vector.shape_cast %56 : vector<16x32xf32> to vector<4x4x32xf32>
    %c0_31 = arith.constant 0 : index
    %c0_32 = arith.constant 0 : index
    %c0_33 = arith.constant 0 : index
    %c0_34 = arith.constant 0 : index
    %58 = vector.load %arg3[%c0_31, %c0_32, %c0_33, %c0_34] : memref<1x4x4x32xf32, #tpu.memory_space<vmem>>, vector<1x4x4x32xf32>
    %59 = vector.shape_cast %58 : vector<1x4x4x32xf32> to vector<4x4x32xf32>
    %60 = vector.shape_cast %57 : vector<4x4x32xf32> to vector<1x4x4x32xf32>
    tpu.vector_store %arg3[%c0_31, %c0_32, %c0_33, %c0_34], %60 {strides = array<i32>} : memref<1x4x4x32xf32, #tpu.memory_space<vmem>>, vector<1x4x4x32xf32>,
    return
  }
  func.func @transform_0(%arg0: i32) -> (i32, i32, i32, i32) {
    %c0_i32 = arith.constant 0 : i32
    %c0_i32_0 = arith.constant 0 : i32
    %c0_i32_1 = arith.constant 0 : i32
    %c0_i32_2 = arith.constant 0 : i32
    return %arg0, %c0_i32, %c0_i32_0, %c0_i32_1 : i32, i32, i32, i32
  }
  func.func @transform_1(%arg0: i32) -> (i32, i32, i32) {
    %c0_i32 = arith.constant 0 : i32
    %c0_i32_0 = arith.constant 0 : i32
    %c0_i32_1 = arith.constant 0 : i32
    %c0_i32_2 = arith.constant 0 : i32
    return %c0_i32, %c0_i32_0, %c0_i32_1 : i32, i32, i32
  }
  func.func @transform_2(%arg0: i32) -> (i32, i32, i32, i32) {
    %c0_i32 = arith.constant 0 : i32
    %c0_i32_0 = arith.constant 0 : i32
    %c0_i32_1 = arith.constant 0 : i32
    %c0_i32_2 = arith.constant 0 : i32
    return %arg0, %c0_i32, %c0_i32_0, %c0_i32_1 : i32, i32, i32, i32
  }
}

module attributes {stable_mosaic.version = 11 : i64} {
  func.func @_matmul_kernel(%arg0: i32, %arg1: i32, %arg2: i32, %arg3: memref<32x32xbf16, #tpu.memory_space<vmem>>, %arg4: memref<32x128xbf16, #tpu.memory_space<vmem>>, %arg5: memref<1x128xf32, #tpu.memory_space<vmem>>, %arg6: memref<32x128xf32, #tpu.memory_space<vmem>>, %arg7: memref<32x128xf32, #tpu.memory_space<vmem>>) attributes {dimension_semantics = [#tpu.dimension_semantics<parallel>, #tpu.dimension_semantics<parallel>, #tpu.dimension_semantics<arbitrary>], iteration_bounds = array<i64: 1, 1, 1>, scalar_prefetch = 0 : i64, scratch_operands = 1 : i64, tpu.core_type = #tpu.core_type<tc>, window_params = [{transform_indices = @transform_0, window_bounds = array<i64: 32, 32>}, {transform_indices = @transform_1, window_bounds = array<i64: 32, 128>}, {transform_indices = @transform_2, window_bounds = array<i64: 1, 128>}, {transform_indices = @transform_3, window_bounds = array<i64: 32, 128>}]} {
    %c0_i32 = arith.constant 0 : i32
    %0 = arith.cmpi eq, %arg2, %c0_i32 : i32
    %1 = arith.extui %0 : i1 to i32
    %c0_i32_0 = arith.constant 0 : i32
    %2 = arith.cmpi ne, %1, %c0_i32_0 : i32
    scf.if %2 {
      %cst_10 = arith.constant 0.000000e+00 : f32
      %12 = vector.broadcast %cst_10 : f32 to vector<32x128xf32>
      %c0_11 = arith.constant 0 : index
      %c0_12 = arith.constant 0 : index
      %13 = vector.load %arg7[%c0_11, %c0_12] : memref<32x128xf32, #tpu.memory_space<vmem>>, vector<32x128xf32>
      tpu.vector_store %arg7[%c0_11, %c0_12], %12 {strides = array<i32>} : memref<32x128xf32, #tpu.memory_space<vmem>>, vector<32x128xf32>,
    } else {
    }
    %c0 = arith.constant 0 : index
    %c0_1 = arith.constant 0 : index
    %3 = vector.load %arg7[%c0, %c0_1] : memref<32x128xf32, #tpu.memory_space<vmem>>, vector<32x128xf32>
    %c0_2 = arith.constant 0 : index
    %c0_3 = arith.constant 0 : index
    %4 = vector.load %arg3[%c0_2, %c0_3] : memref<32x32xbf16, #tpu.memory_space<vmem>>, vector<32x32xbf16>
    %c0_4 = arith.constant 0 : index
    %c0_5 = arith.constant 0 : index
    %5 = vector.load %arg4[%c0_4, %c0_5] : memref<32x128xbf16, #tpu.memory_space<vmem>>, vector<32x128xbf16>
    %cst = arith.constant dense<0.000000e+00> : vector<32x128xf32>
    %6 = tpu.matmul %4, %5, %cst {dimension_numbers = #tpu.dot_dimension_numbers<[1], [0], [0], [1], [0, 0, 1, 1], [], []>} : vector<32x32xbf16>, vector<32x128xbf16>, vector<32x128xf32> -> vector<32x128xf32>
    %7 = arith.addf %3, %6 : vector<32x128xf32>
    %c0_6 = arith.constant 0 : index
    %c0_7 = arith.constant 0 : index
    %8 = vector.load %arg7[%c0_6, %c0_7] : memref<32x128xf32, #tpu.memory_space<vmem>>, vector<32x128xf32>
    tpu.vector_store %arg7[%c0_6, %c0_7], %7 {strides = array<i32>} : memref<32x128xf32, #tpu.memory_space<vmem>>, vector<32x128xf32>,
    %c0_i32_8 = arith.constant 0 : i32
    %9 = arith.cmpi eq, %arg2, %c0_i32_8 : i32
    %10 = arith.extui %9 : i1 to i32
    %c0_i32_9 = arith.constant 0 : i32
    %11 = arith.cmpi ne, %10, %c0_i32_9 : i32
    scf.if %11 {
      %c0_10 = arith.constant 0 : index
      %c0_11 = arith.constant 0 : index
      %12 = vector.load %arg7[%c0_10, %c0_11] : memref<32x128xf32, #tpu.memory_space<vmem>>, vector<32x128xf32>
      %c0_12 = arith.constant 0 : index
      %c0_13 = arith.constant 0 : index
      %13 = vector.load %arg5[%c0_12, %c0_13] : memref<1x128xf32, #tpu.memory_space<vmem>>, vector<1x128xf32>
      %14 = vector.broadcast %13 : vector<1x128xf32> to vector<32x128xf32>
      %15 = arith.addf %12, %14 : vector<32x128xf32>
      %c0_14 = arith.constant 0 : index
      %c0_15 = arith.constant 0 : index
      %16 = vector.load %arg6[%c0_14, %c0_15] : memref<32x128xf32, #tpu.memory_space<vmem>>, vector<32x128xf32>
      tpu.vector_store %arg6[%c0_14, %c0_15], %15 {strides = array<i32>} : memref<32x128xf32, #tpu.memory_space<vmem>>, vector<32x128xf32>,
    } else {
    }
    return
  }
  func.func @transform_0(%arg0: i32, %arg1: i32, %arg2: i32) -> (i32, i32) {
    %c0_i32 = arith.constant 0 : i32
    return %arg0, %arg2 : i32, i32
  }
  func.func @transform_1(%arg0: i32, %arg1: i32, %arg2: i32) -> (i32, i32) {
    %c0_i32 = arith.constant 0 : i32
    return %arg2, %arg1 : i32, i32
  }
  func.func @transform_2(%arg0: i32, %arg1: i32, %arg2: i32) -> (i32, i32) {
    %c0_i32 = arith.constant 0 : i32
    %c0_i32_0 = arith.constant 0 : i32
    return %c0_i32, %arg1 : i32, i32
  }
  func.func @transform_3(%arg0: i32, %arg1: i32, %arg2: i32) -> (i32, i32) {
    %c0_i32 = arith.constant 0 : i32
    return %arg0, %arg1 : i32, i32
  }
}

module attributes {stable_mosaic.version = 11 : i64} {
  func.func @_layernorm_kernel(%arg0: i32, %arg1: memref<128x32xf32, #tpu.memory_space<vmem>>, %arg2: memref<1x32xf32, #tpu.memory_space<vmem>>, %arg3: memref<1x32xf32, #tpu.memory_space<vmem>>, %arg4: memref<128x32xf32, #tpu.memory_space<vmem>>) attributes {dimension_semantics = [#tpu.dimension_semantics<parallel>], iteration_bounds = array<i64: 1>, scalar_prefetch = 0 : i64, scratch_operands = 0 : i64, tpu.core_type = #tpu.core_type<tc>, window_params = [{transform_indices = @transform_0, window_bounds = array<i64: 128, 32>}, {pipeline_mode = #tpu.pipeline_mode<synchronous>, transform_indices = @transform_1, window_bounds = array<i64: 1, 32>}, {pipeline_mode = #tpu.pipeline_mode<synchronous>, transform_indices = @transform_2, window_bounds = array<i64: 1, 32>}, {transform_indices = @transform_3, window_bounds = array<i64: 128, 32>}]} {
    %c0 = arith.constant 0 : index
    %c0_0 = arith.constant 0 : index
    %0 = vector.load %arg1[%c0, %c0_0] : memref<128x32xf32, #tpu.memory_space<vmem>>, vector<128x32xf32>
    %cst = arith.constant dense<0.000000e+00> : vector<128xf32>
    %1 = vector.multi_reduction <add>, %0, %cst [1] : vector<128x32xf32> to vector<128xf32>
    %2 = vector.shape_cast %1 : vector<128xf32> to vector<128x1xf32>
    %cst_1 = arith.constant 3.200000e+01 : f32
    %3 = vector.broadcast %cst_1 : f32 to vector<128x1xf32>
    %4 = arith.divf %2, %3 : vector<128x1xf32>
    %5 = vector.broadcast %4 : vector<128x1xf32> to vector<128x32xf32>
    %6 = arith.subf %0, %5 : vector<128x32xf32>
    %7 = arith.mulf %6, %6 : vector<128x32xf32>
    %cst_2 = arith.constant dense<0.000000e+00> : vector<128xf32>
    %8 = vector.multi_reduction <add>, %7, %cst_2 [1] : vector<128x32xf32> to vector<128xf32>
    %9 = vector.shape_cast %8 : vector<128xf32> to vector<128x1xf32>
    %cst_3 = arith.constant 3.200000e+01 : f32
    %10 = vector.broadcast %cst_3 : f32 to vector<128x1xf32>
    %11 = arith.divf %9, %10 : vector<128x1xf32>
    %12 = vector.broadcast %4 : vector<128x1xf32> to vector<128x32xf32>
    %13 = arith.subf %0, %12 : vector<128x32xf32>
    %cst_4 = arith.constant 9.99999997E-7 : f32
    %14 = vector.broadcast %cst_4 : f32 to vector<128x1xf32>
    %15 = arith.addf %11, %14 : vector<128x1xf32>
    %16 = math.rsqrt %15 : vector<128x1xf32>
    %17 = vector.broadcast %16 : vector<128x1xf32> to vector<128x32xf32>
    %18 = arith.mulf %13, %17 : vector<128x32xf32>
    %c0_5 = arith.constant 0 : index
    %c0_6 = arith.constant 0 : index
    %19 = vector.load %arg2[%c0_5, %c0_6] : memref<1x32xf32, #tpu.memory_space<vmem>>, vector<1x32xf32>
    %20 = vector.broadcast %19 : vector<1x32xf32> to vector<128x32xf32>
    %21 = arith.mulf %18, %20 : vector<128x32xf32>
    %c0_7 = arith.constant 0 : index
    %c0_8 = arith.constant 0 : index
    %22 = vector.load %arg3[%c0_7, %c0_8] : memref<1x32xf32, #tpu.memory_space<vmem>>, vector<1x32xf32>
    %23 = vector.broadcast %22 : vector<1x32xf32> to vector<128x32xf32>
    %24 = arith.addf %21, %23 : vector<128x32xf32>
    %c0_9 = arith.constant 0 : index
    %c0_10 = arith.constant 0 : index
    %25 = vector.load %arg4[%c0_9, %c0_10] : memref<128x32xf32, #tpu.memory_space<vmem>>, vector<128x32xf32>
    tpu.vector_store %arg4[%c0_9, %c0_10], %24 {strides = array<i32>} : memref<128x32xf32, #tpu.memory_space<vmem>>, vector<128x32xf32>,
    return
  }
  func.func @transform_0(%arg0: i32) -> (i32, i32) {
    %c0_i32 = arith.constant 0 : i32
    %c0_i32_0 = arith.constant 0 : i32
    return %arg0, %c0_i32 : i32, i32
  }
  func.func @transform_1(%arg0: i32) -> (i32, i32) {
    %c0_i32 = arith.constant 0 : i32
    %c0_i32_0 = arith.constant 0 : i32
    %c0_i32_1 = arith.constant 0 : i32
    return %c0_i32, %c0_i32_0 : i32, i32
  }
  func.func @transform_2(%arg0: i32) -> (i32, i32) {
    %c0_i32 = arith.constant 0 : i32
    %c0_i32_0 = arith.constant 0 : i32
    %c0_i32_1 = arith.constant 0 : i32
    return %c0_i32, %c0_i32_0 : i32, i32
  }
  func.func @transform_3(%arg0: i32) -> (i32, i32) {
    %c0_i32 = arith.constant 0 : i32
    %c0_i32_0 = arith.constant 0 : i32
    return %arg0, %c0_i32 : i32, i32
  }
}

module attributes {stable_mosaic.version = 11 : i64} {
  func.func @_matmul_kernel(%arg0: i32, %arg1: i32, %arg2: i32, %arg3: memref<128x32xbf16, #tpu.memory_space<vmem>>, %arg4: memref<32x128xbf16, #tpu.memory_space<vmem>>, %arg5: memref<1x128xf32, #tpu.memory_space<vmem>>, %arg6: memref<128x128xf32, #tpu.memory_space<vmem>>, %arg7: memref<128x128xf32, #tpu.memory_space<vmem>>) attributes {dimension_semantics = [#tpu.dimension_semantics<parallel>, #tpu.dimension_semantics<parallel>, #tpu.dimension_semantics<arbitrary>], iteration_bounds = array<i64: 1, 1, 1>, scalar_prefetch = 0 : i64, scratch_operands = 1 : i64, tpu.core_type = #tpu.core_type<tc>, window_params = [{transform_indices = @transform_0, window_bounds = array<i64: 128, 32>}, {transform_indices = @transform_1, window_bounds = array<i64: 32, 128>}, {transform_indices = @transform_2, window_bounds = array<i64: 1, 128>}, {transform_indices = @transform_3, window_bounds = array<i64: 128, 128>}]} {
    %c0_i32 = arith.constant 0 : i32
    %0 = arith.cmpi eq, %arg2, %c0_i32 : i32
    %1 = arith.extui %0 : i1 to i32
    %c0_i32_0 = arith.constant 0 : i32
    %2 = arith.cmpi ne, %1, %c0_i32_0 : i32
    scf.if %2 {
      %cst_10 = arith.constant 0.000000e+00 : f32
      %12 = vector.broadcast %cst_10 : f32 to vector<128x128xf32>
      %c0_11 = arith.constant 0 : index
      %c0_12 = arith.constant 0 : index
      %13 = vector.load %arg7[%c0_11, %c0_12] : memref<128x128xf32, #tpu.memory_space<vmem>>, vector<128x128xf32>
      tpu.vector_store %arg7[%c0_11, %c0_12], %12 {strides = array<i32>} : memref<128x128xf32, #tpu.memory_space<vmem>>, vector<128x128xf32>,
    } else {
    }
    %c0 = arith.constant 0 : index
    %c0_1 = arith.constant 0 : index
    %3 = vector.load %arg7[%c0, %c0_1] : memref<128x128xf32, #tpu.memory_space<vmem>>, vector<128x128xf32>
    %c0_2 = arith.constant 0 : index
    %c0_3 = arith.constant 0 : index
    %4 = vector.load %arg3[%c0_2, %c0_3] : memref<128x32xbf16, #tpu.memory_space<vmem>>, vector<128x32xbf16>
    %c0_4 = arith.constant 0 : index
    %c0_5 = arith.constant 0 : index
    %5 = vector.load %arg4[%c0_4, %c0_5] : memref<32x128xbf16, #tpu.memory_space<vmem>>, vector<32x128xbf16>
    %cst = arith.constant dense<0.000000e+00> : vector<128x128xf32>
    %6 = tpu.matmul %4, %5, %cst {dimension_numbers = #tpu.dot_dimension_numbers<[1], [0], [0], [1], [0, 0, 1, 1], [], []>} : vector<128x32xbf16>, vector<32x128xbf16>, vector<128x128xf32> -> vector<128x128xf32>
    %7 = arith.addf %3, %6 : vector<128x128xf32>
    %c0_6 = arith.constant 0 : index
    %c0_7 = arith.constant 0 : index
    %8 = vector.load %arg7[%c0_6, %c0_7] : memref<128x128xf32, #tpu.memory_space<vmem>>, vector<128x128xf32>
    tpu.vector_store %arg7[%c0_6, %c0_7], %7 {strides = array<i32>} : memref<128x128xf32, #tpu.memory_space<vmem>>, vector<128x128xf32>,
    %c0_i32_8 = arith.constant 0 : i32
    %9 = arith.cmpi eq, %arg2, %c0_i32_8 : i32
    %10 = arith.extui %9 : i1 to i32
    %c0_i32_9 = arith.constant 0 : i32
    %11 = arith.cmpi ne, %10, %c0_i32_9 : i32
    scf.if %11 {
      %c0_10 = arith.constant 0 : index
      %c0_11 = arith.constant 0 : index
      %12 = vector.load %arg7[%c0_10, %c0_11] : memref<128x128xf32, #tpu.memory_space<vmem>>, vector<128x128xf32>
      %c0_12 = arith.constant 0 : index
      %c0_13 = arith.constant 0 : index
      %13 = vector.load %arg5[%c0_12, %c0_13] : memref<1x128xf32, #tpu.memory_space<vmem>>, vector<1x128xf32>
      %14 = vector.broadcast %13 : vector<1x128xf32> to vector<128x128xf32>
      %15 = arith.addf %12, %14 : vector<128x128xf32>
      %c0_14 = arith.constant 0 : index
      %c0_15 = arith.constant 0 : index
      %16 = vector.load %arg6[%c0_14, %c0_15] : memref<128x128xf32, #tpu.memory_space<vmem>>, vector<128x128xf32>
      tpu.vector_store %arg6[%c0_14, %c0_15], %15 {strides = array<i32>} : memref<128x128xf32, #tpu.memory_space<vmem>>, vector<128x128xf32>,
    } else {
    }
    return
  }
  func.func @transform_0(%arg0: i32, %arg1: i32, %arg2: i32) -> (i32, i32) {
    %c0_i32 = arith.constant 0 : i32
    return %arg0, %arg2 : i32, i32
  }
  func.func @transform_1(%arg0: i32, %arg1: i32, %arg2: i32) -> (i32, i32) {
    %c0_i32 = arith.constant 0 : i32
    return %arg2, %arg1 : i32, i32
  }
  func.func @transform_2(%arg0: i32, %arg1: i32, %arg2: i32) -> (i32, i32) {
    %c0_i32 = arith.constant 0 : i32
    %c0_i32_0 = arith.constant 0 : i32
    return %c0_i32, %arg1 : i32, i32
  }
  func.func @transform_3(%arg0: i32, %arg1: i32, %arg2: i32) -> (i32, i32) {
    %c0_i32 = arith.constant 0 : i32
    return %arg0, %arg1 : i32, i32
  }
}

</mosaic_0001>

<bundles_post_ra>
// kernel: vit_forward.29
= control target key start
LH: loop header
LB: loop body
LE: loop exit
PB: predicated region body
PF: predicated region fallthrough
CT: control target
= control target key end

     0   :  { %vm19_vm0 = vcmask 523264   ;;  %v299_v0 = vmov 0   ;;  %v300_v2 = vmov 0.0   ;;  %s422_s1 = inlined_call_operand.vmem [shape: bf16[192,64], index: 1, kind: input, shape index: {}]   ;;  %s423_s0 = inlined_call_operand.vmem [shape: bf16[32,192], index: 0, kind: input, shape index: {}]   ;;  %s424_s2 = inlined_call_operand.vmem [shape: f32[1,64], index: 2, kind: input, shape index: {}]   ;;  %s425_s3 = inlined_call_operand.vmem [shape: f32[32,64], index: 3, kind: output, shape index: {}]  }
   0x1   :  { %153 = vmatprep.subr.bf16.mxu0 %v299_v0  ;;  %255 = vmatprep.subr.bf16.mxu1 %v299_v0  ;;  %v281_v1 = vld [vmem:[%s422_s1 + $0x38] sm:$0xff]   ;;  %20 = vst.msk [vmem:[#allocation2] sm:$0xff] %vm19_vm0, %v300_v2  ;;  %21 = vst.msk [vmem:[#allocation2 + $0x8] sm:$0xff] %vm19_vm0, %v300_v2  ;;  %v282_v3 = vld [vmem:[%s422_s1 + $0x30] sm:$0xff]  }
   0x2   :  { %22 = vst.msk [vmem:[#allocation2 + $0x10] sm:$0xff] %vm19_vm0, %v300_v2  ;;  %23 = vst.msk [vmem:[#allocation2 + $0x18] sm:$0xff] %vm19_vm0, %v300_v2  ;;  %154 = vmatpush1.bf16.msra.mxu0 %v281_v1  ;;  %267 = vmatpush1.bf16.msra.mxu1 %v281_v1  ;;  %v283_v4 = vld [vmem:[%s422_s1 + $0x28] sm:$0xff]   ;;  %v284_v5 = vld [vmem:[%s422_s1 + $0x20] sm:$0xff]  }
   0x3   :  { %155 = vmatprep.subr.bf16.mxu0 %v299_v0  ;;  %256 = vmatprep.subr.bf16.mxu1 %v299_v0  ;;  %v295_v6 = vld [vmem:[%s423_s0 + $0x4] ss:$8 sps:$4 sm:$0xff]   ;;  %v285_v7 = vld [vmem:[%s422_s1 + $0x18] sm:$0xff]   ;;  %v286_v9 = vld [vmem:[%s422_s1 + $0x10] sm:$0xff]  }
   0x4   :  { %v298_v8 = vld [vmem:[%s423_s0 + $0x14] ss:$8 sps:$4 sm:$0xff]   ;;  %252 = vmatprep.mubr.msk.bf16.mxu0 %vm19_vm0, %v295_v6  ;;  %v287_v10 = vld [vmem:[%s422_s1 + $0x8] sm:$0xff]   ;;  %v288_v11 = vld [vmem:[%s422_s1] sm:$0xff]  }
   0x5   :  { %253 = vmatprep.mubr.msk.bf16.mxu1 %vm19_vm0, %v298_v8  ;;  %v289_v12 = vld [vmem:[%s422_s1 + $0x58] sm:$0xff]   ;;  %v290_v13 = vld [vmem:[%s422_s1 + $0x50] sm:$0xff]   ;;  %v291_v14 = vld [vmem:[%s422_s1 + $0x48] sm:$0xff]  }
   0x6   :  { %156 = vmatpush1.bf16.msra.mxu0 %v282_v3  ;;  %268 = vmatpush1.bf16.msra.mxu1 %v282_v3  ;;  %v292_v15 = vld [vmem:[%s422_s1 + $0x40] sm:$0xff]   ;;  %v296_v17 = vld [vmem:[%s423_s0 + $0x10] ss:$8 sps:$4 sm:$0xff]  }
   0x7   :  { %157 = vmatprep.subr.bf16.mxu0 %v299_v0  ;;  %257 = vmatprep.subr.bf16.mxu1 %v299_v0  ;;  %v293_v16 = vld [vmem:[%s423_s0] ss:$8 sps:$4 sm:$0xff]  }
   0x8   :  { %v24_v18 = vld [vmem:[#allocation2] sm:$0xff]  ;;  %v25_v26 = vld [vmem:[#allocation2 + $0x8] sm:$0xff] }
   0x9   :  { %v26_v19 = vld [vmem:[#allocation2 + $0x10] sm:$0xff]  ;;  %v27_v27 = vld [vmem:[#allocation2 + $0x18] sm:$0xff]  ;;  %v254_v34 = vld [vmem:[%s424_s2] ss:$0 sm:$0xff] }
   0xa   :  { %158 = vmatpush1.bf16.msra.mxu0 %v283_v4  ;;  %269 = vmatpush1.bf16.msra.mxu1 %v283_v4 }
   0xb   :  { %159 = vmatprep.subr.bf16.mxu0 %v299_v0  ;;  %258 = vmatprep.subr.bf16.mxu1 %v299_v0 }
   0xe   :  { %160 = vmatpush1.bf16.msra.mxu0 %v284_v5  ;;  %270 = vmatpush1.bf16.msra.mxu1 %v284_v5 }
   0xf   :  { %161 = vmatprep.subr.bf16.mxu0 %v299_v0  ;;  %259 = vmatprep.subr.bf16.mxu1 %v299_v0 }
  0x12   :  { %162 = vmatpush1.bf16.msra.mxu0 %v285_v7  ;;  %271 = vmatpush1.bf16.msra.mxu1 %v285_v7 }
  0x13   :  { %163 = vmatprep.subr.bf16.mxu0 %v299_v0  ;;  %260 = vmatprep.subr.bf16.mxu1 %v299_v0 }
  0x16   :  { %164 = vmatpush1.bf16.msra.mxu0 %v286_v9  ;;  %272 = vmatpush1.bf16.msra.mxu1 %v286_v9 }
  0x17   :  { %165 = vmatprep.subr.bf16.mxu0 %v299_v0  ;;  %261 = vmatprep.subr.bf16.mxu1 %v299_v0 }
  0x1a   :  { %166 = vmatpush1.bf16.msra.mxu0 %v287_v10  ;;  %273 = vmatpush1.bf16.msra.mxu1 %v287_v10 }
  0x1b   :  { %167 = vmatprep.subr.bf16.mxu0 %v299_v0  ;;  %262 = vmatprep.subr.bf16.mxu1 %v299_v0 }
  0x1e   :  { %168 = vmatpush1.bf16.msra.mxu0 %v288_v11  ;;  %274 = vmatpush1.bf16.msra.mxu1 %v288_v11 }
  0x1f   :  { %177 = vmatprep.subr.bf16.mxu0 %v299_v0  ;;  %263 = vmatprep.subr.bf16.mxu1 %v299_v0 }
  0x22   :  { %178 = vmatpush2.bf16.msra.mxu0 %v289_v12  ;;  %275 = vmatpush2.bf16.msra.mxu1 %v289_v12 }
  0x23   :  { %179 = vmatprep.subr.bf16.mxu0 %v299_v0  ;;  %264 = vmatprep.subr.bf16.mxu1 %v299_v0 }
  0x26   :  { %180 = vmatpush2.bf16.msra.mxu0 %v290_v13  ;;  %276 = vmatpush2.bf16.msra.mxu1 %v290_v13 }
  0x27   :  { %181 = vmatprep.subr.bf16.mxu0 %v299_v0  ;;  %265 = vmatprep.subr.bf16.mxu1 %v299_v0 }
  0x2a   :  { %182 = vmatpush2.bf16.msra.mxu0 %v291_v14  ;;  %277 = vmatpush2.bf16.msra.mxu1 %v291_v14 }
  0x2b   :  { %183 = vmatprep.subr.bf16.mxu0 %v299_v0  ;;  %266 = vmatprep.subr.bf16.mxu1 %v299_v0 }
  0x2e   :  { %184 = vmatpush2.bf16.msra.mxu0 %v292_v15  ;;  %278 = vmatpush2.bf16.msra.mxu1 %v292_v15 }
  0x31   :  { %186 = vmatmul.mubr.bf16.vlgmr.msra.gmra.mxu0 %v293_v16  ;;  %194 = vmatmul.mubr.bf16.vlgmr.msra.gmra.mxu1 %v296_v17 }
  0xf1   :  { %v187_v20 = vpop.f32.mrf.mxu0  ;;  %v195_v21 = vpop.f32.mrf.mxu1 }
  0xf2   :  { %v202_v22 = vadd.f32 %v187_v20, %v24_v18  ;;  %v204_v23 = vadd.f32 %v195_v21, %v26_v19 }
  0xf3   :  { %v189_v24 = vpop.f32.mrf.mxu0  ;;  %v197_v25 = vpop.f32.mrf.mxu1 }
  0xf4   :  { %206 = vst.msk [vmem:[#allocation2] sm:$0xff] %vm19_vm0, %v202_v22  ;;  %208 = vst.msk [vmem:[#allocation2 + $0x10] sm:$0xff] %vm19_vm0, %v204_v23 }
  0xf5   :  { %v190_v28 = vpop.f32.mrf.mxu0  ;;  %v198_v29 = vpop.f32.mrf.mxu1 }
  0xf6   :  { %v203_v30 = vadd.f32 %v190_v28, %v25_v26  ;;  %v205_v31 = vadd.f32 %v198_v29, %v27_v27 }
  0xf7   :  { %v192_v32 = vpop.f32.mrf.mxu0  ;;  %v200_v33 = vpop.f32.mrf.mxu1 }
  0xf8   :  { %207 = vst.msk [vmem:[#allocation2 + $0x8] sm:$0xff] %vm19_vm0, %v203_v30  ;;  %209 = vst.msk [vmem:[#allocation2 + $0x18] sm:$0xff] %vm19_vm0, %v205_v31 }
  0xfb   :  { %v213_v35 = vld [vmem:[#allocation2] sm:$0xff]  ;;  %v215_v36 = vld [vmem:[#allocation2 + $0x10] sm:$0xff] }
  0xfc   :  { %v224_v37 = vadd.f32 %v254_v34, %v213_v35  ;;  %v226_v38 = vadd.f32 %v254_v34, %v215_v36 }
  0xfe   :  { %228 = vst.msk [vmem:[%s425_s3] sm:$0xff] %vm19_vm0, %v224_v37  ;;  %230 = vst.msk [vmem:[%s425_s3 + $0x10] sm:$0xff] %vm19_vm0, %v226_v38 }
  0xff   :  { %v214_v39 = vld [vmem:[#allocation2 + $0x8] sm:$0xff]  ;;  %v216_v40 = vld [vmem:[#allocation2 + $0x18] sm:$0xff] }
 0x100   :  { %v225_v41 = vadd.f32 %v254_v34, %v214_v39  ;;  %v227_v42 = vadd.f32 %v254_v34, %v216_v40 }
 0x102   :  { %229 = vst.msk [vmem:[%s425_s3 + $0x8] sm:$0xff] %vm19_vm0, %v225_v41  ;;  %231 = vst.msk [vmem:[%s425_s3 + $0x18] sm:$0xff] %vm19_vm0, %v227_v42 }

// kernel: vit_forward.30
= control target key start
LH: loop header
LB: loop body
LE: loop exit
PB: predicated region body
PF: predicated region fallthrough
CT: control target
= control target key end

     0   :  { %vm25_vm0 = vcmask 523264   ;;  %v275_v29 = vmov 0   ;;  %s409_s0 = inlined_call_operand.vmem [shape: f32[32,64], index: 0, kind: input, shape index: {}]   ;;  %s410_s3 = inlined_call_operand.vmem [shape: bf16[64,192], index: 3, kind: input, shape index: {}]   ;;  %s411_s1 = inlined_call_operand.vmem [shape: f32[1,64], index: 1, kind: input, shape index: {}]   ;;  %s412_s2 = inlined_call_operand.vmem [shape: f32[1,64], index: 2, kind: input, shape index: {}]   ;;  %s413_s4 = inlined_call_operand.vmem [shape: f32[1,192], index: 4, kind: input, shape index: {}]   ;;  %s414_s5 = inlined_call_operand.vmem [shape: f32[32,192], index: 5, kind: output, shape index: {}]  }
   0x1   :  { %v21_v0 = vld [vmem:[%s409_s0] sm:$0xff]  ;;  %v23_v1 = vld [vmem:[%s409_s0 + $0x10] sm:$0xff]  ;;  %v22_v2 = vld [vmem:[%s409_s0 + $0x8] sm:$0xff]  ;;  %201 = vmatprep.mubr.bf16.mxu0 %v275_v29  ;;  %211 = vmatprep.mubr.bf16.mxu1 %v275_v29 }
   0x2   :  { %v26_v3 = vsel %vm25_vm0, %v21_v0, 0.0  ;;  %v32_v4 = vsel %vm25_vm0, %v23_v1, 0.0  ;;  %v24_v5 = vld [vmem:[%s409_s0 + $0x18] sm:$0xff]  ;;  %v29_v6 = vsel %vm25_vm0, %v22_v2, 0.0  ;;  %v258_v31 = vld [vmem:[%s410_s3 + $0x24] ss:$8 sps:$4 sm:$0xff]  }
   0x3   :  { %27 = vadd.xlane.f32.xlu0 %v26_v3  ;;  %33 = vadd.xlane.f32.xlu1 %v32_v4  ;;  %v35_v7 = vsel %vm25_vm0, %v24_v5, 0.0  ;;  %v255_v28 = vld [vmem:[%s410_s3 + $0x34] ss:$8 sps:$4 sm:$0xff]   ;;  %v257_v30 = vld [vmem:[%s410_s3 + $0x30] ss:$8 sps:$4 sm:$0xff]  }
   0x4   :  { %177 = vmatprep.subr.bf16.mxu0 %v255_v28  ;;  %246 = vmatprep.subr.bf16.mxu1 %v255_v28  ;;  %v260_v32 = vld [vmem:[%s410_s3 + $0x20] ss:$8 sps:$4 sm:$0xff]   ;;  %v261_v33 = vld [vmem:[%s410_s3 + $0x14] ss:$8 sps:$4 sm:$0xff]   ;;  %v263_v34 = vld [vmem:[%s410_s3 + $0x10] ss:$8 sps:$4 sm:$0xff]  }
   0x5   :  { %178 = vmatpush1.bf16.msra.mxu0 %v257_v30  ;;  %250 = vmatpush1.bf16.msra.mxu1 %v257_v30  ;;  %v264_v35 = vld [vmem:[%s410_s3 + $0x4] ss:$8 sps:$4 sm:$0xff]   ;;  %v266_v36 = vld [vmem:[%s410_s3] ss:$8 sps:$4 sm:$0xff]  }
   0x6   :  { %179 = vmatprep.subr.bf16.mxu0 %v258_v31  ;;  %247 = vmatprep.subr.bf16.mxu1 %v258_v31  ;;  %v234_v51 = vld [vmem:[%s411_s1] ss:$0 sm:$0xff] }
   0x7   :  { %30 = vadd.xlane.f32.xlu0 %v29_v6  ;;  %36 = vadd.xlane.f32.xlu1 %v35_v7  ;;  %v235_v56 = vld [vmem:[%s412_s2] ss:$0 sm:$0xff] }
   0x9   :  { %180 = vmatpush1.bf16.msra.mxu0 %v260_v32  ;;  %251 = vmatpush1.bf16.msra.mxu1 %v260_v32 }
   0xa   :  { %181 = vmatprep.subr.bf16.mxu0 %v261_v33  ;;  %248 = vmatprep.subr.bf16.mxu1 %v261_v33 }
   0xd   :  { %182 = vmatpush1.bf16.msra.mxu0 %v263_v34  ;;  %252 = vmatpush1.bf16.msra.mxu1 %v263_v34 }
   0xe   :  { %183 = vmatprep.subr.bf16.mxu0 %v264_v35  ;;  %249 = vmatprep.subr.bf16.mxu1 %v264_v35 }
  0x11   :  { %184 = vmatpush1.bf16.msra.mxu0 %v266_v36  ;;  %253 = vmatpush1.bf16.msra.mxu1 %v266_v36 }
  0x8c   :  { %v28_v8 = vpop.xlane.xlu0 %27  ;;  %v34_v9 = vpop.xlane.xlu1 %33 }
  0x8d   :  { %v39_v10 = vmul.f32 0.015625, %v28_v8  ;;  %v41_v11 = vmul.f32 0.015625, %v34_v9  ;;  %v111_v8 = vld [vmem:[%s413_s4] sm:$0x3] }
  0x8f   :  { %v322_v12 = vsub.f32 %v21_v0, %v39_v10  ;;  %v324_v13 = vsub.f32 %v23_v1, %v41_v11 }
  0x90   :  { %v31_v14 = vpop.xlane.xlu0 %30  ;;  %v37_v15 = vpop.xlane.xlu1 %36 }
  0x91   :  { %v40_v16 = vmul.f32 0.015625, %v31_v14  ;;  %v42_v17 = vmul.f32 0.015625, %v37_v15  ;;  %v47_v18 = vmul.f32 %v322_v12, %v322_v12  ;;  %v49_v19 = vmul.f32 %v324_v13, %v324_v13 }
  0x93   :  { %v330_v20 = vsub.f32 %v22_v2, %v40_v16  ;;  %v332_v21 = vsub.f32 %v24_v5, %v42_v17  ;;  %v51_v22 = vsel %vm25_vm0, %v47_v18, 0.0  ;;  %v57_v23 = vsel %vm25_vm0, %v49_v19, 0.0 }
  0x94   :  { %52 = vadd.xlane.f32.xlu0 %v51_v22  ;;  %v113_v5 = vlaneseq }
  0x95   :  { %v48_v24 = vmul.f32 %v330_v20, %v330_v20  ;;  %v50_v25 = vmul.f32 %v332_v21, %v332_v21 }
  0x96   :  { %v114_v6 = vshrl.u32 %v113_v5, 7 }
  0x97   :  { %v54_v26 = vsel %vm25_vm0, %v48_v24, 0.0  ;;  %v60_v27 = vsel %vm25_vm0, %v50_v25, 0.0 }
  0x98   :  { %58 = vadd.xlane.f32.xlu0 %v57_v23  ;;  %55 = vadd.xlane.f32.xlu1 %v54_v26  ;;  %v115_v7 = vsub.s32 0, %v114_v6  ;;  %v119_v9 = vsub.s32 1, %v114_v6 }
  0x9a   :  { %v116_v10 = vrot.slane %v111_v8, %v115_v7  ;;  %v120_v11 = vrot.slane %v111_v8, %v119_v9 }
  0x9c   :  { %61 = vadd.xlane.f32.xlu1 %v60_v27 }
 0x11d   :  { %v53_v37 = vpop.xlane.xlu0 %52 }
 0x11e   :  { %v63_v38 = vmul.f32 0.015625, %v53_v37 }
 0x120   :  { %v67_v39 = vadd.f32 1e-06, %v63_v38 }
 0x121   :  { %v56_v40 = vpop.xlane.xlu1 %55  ;;  %v59_v41 = vpop.xlane.xlu0 %58 }
 0x122   :  { %267 = vrsqrt.f32 %v67_v39  ;;  %v64_v42 = vmul.f32 0.015625, %v56_v40  ;;  %v65_v43 = vmul.f32 0.015625, %v59_v41 }
 0x124   :  { %v68_v44 = vadd.f32 1e-06, %v64_v42  ;;  %v69_v45 = vadd.f32 1e-06, %v65_v43 }
 0x125   :  { %v62_v46 = vpop.xlane.xlu1 %61 }
 0x126   :  { %269 = vrsqrt.f32 %v68_v44  ;;  %v66_v47 = vmul.f32 0.015625, %v62_v46 }
 0x127   :  { %271 = vrsqrt.f32 %v69_v45 }
 0x128   :  { %v70_v48 = vadd.f32 1e-06, %v66_v47 }
 0x12a   :  { %273 = vrsqrt.f32 %v70_v48 }
 0x12f   :  { %v268_v49 = vpop.eup %267 }
 0x130   :  { %v75_v50 = vmul.f32 %v268_v49, %v322_v12 }
 0x132   :  { %v86_v55 = vmul.f32 %v234_v51, %v75_v50 }
 0x133   :  { %v270_v52 = vpop.eup %269 }
 0x134   :  { %v272_v53 = vpop.eup %271  ;;  %v76_v54 = vmul.f32 %v270_v52, %v330_v20  ;;  %v97_v60 = vadd.f32 %v235_v56, %v86_v55 }
 0x135   :  { %v77_v57 = vmul.f32 %v272_v53, %v324_v13 }
 0x136   :  { %v87_v58 = vmul.f32 %v234_v51, %v76_v54 }
 0x137   :  { %v274_v59 = vpop.eup %273  ;;  %v88_v63 = vmul.f32 %v234_v51, %v77_v57 }
 0x138   :  { %v98_v61 = vadd.f32 %v235_v56, %v87_v58  ;;  %v78_v62 = vmul.f32 %v274_v59, %v332_v21 }
 0x139   :  { %v99_v2 = vadd.f32 %v235_v56, %v88_v63 }
 0x13a   :  { %v101_v0 = vpack.c.bf16 %v98_v61, %v97_v60  ;;  %v89_v1 = vmul.f32 %v234_v51, %v78_v62 }
 0x13c   :  { %244 = vmatmul.mubr.msk.bf16.vlgmr.msra.gmra.mxu0 %vm25_vm0, %v101_v0  ;;  %v100_v3 = vadd.f32 %v235_v56, %v89_v1 }
 0x13e   :  { %v102_v4 = vpack.c.bf16 %v100_v3, %v99_v2 }
 0x140   :  { %245 = vmatmul.mubr.msk.bf16.vlgmr.msra.gmra.mxu1 %vm25_vm0, %v102_v4 }
 0x1fc   :  { %v203_v12 = vpop.f32.mrf.mxu0 }
 0x1fd   :  { %v204_v13 = vadd.f32 %v203_v12, %v116_v10 }
 0x1fe   :  { %v205_v14 = vpop.f32.mrf.mxu0 }
 0x1ff   :  { %222 = vst [vmem:[%s414_s5] sm:$0xff] %v204_v13  ;;  %v206_v15 = vadd.f32 %v205_v14, %v120_v11 }
 0x200   :  { %v207_v16 = vpop.f32.mrf.mxu0  ;;  %v213_v17 = vpop.f32.mrf.mxu1 }
 0x201   :  { %223 = vst.msk [vmem:[%s414_s5 + $0x8] sm:$0xff] %vm25_vm0, %v206_v15  ;;  %v208_v18 = vadd.f32 %v207_v16, %v116_v10  ;;  %v214_v19 = vadd.f32 %v213_v17, %v116_v10 }
 0x202   :  { %v209_v20 = vpop.f32.mrf.mxu0  ;;  %v215_v21 = vpop.f32.mrf.mxu1 }
 0x203   :  { %224 = vst [vmem:[%s414_s5 + $0x10] sm:$0xff] %v208_v18  ;;  %226 = vst [vmem:[%s414_s5 + $0x20] sm:$0xff] %v214_v19  ;;  %v210_v22 = vadd.f32 %v209_v20, %v120_v11  ;;  %v216_v23 = vadd.f32 %v215_v21, %v120_v11 }
 0x204   :  { %v217_v24 = vpop.f32.mrf.mxu1 }
 0x205   :  { %225 = vst.msk [vmem:[%s414_s5 + $0x18] sm:$0xff] %vm25_vm0, %v210_v22  ;;  %227 = vst.msk [vmem:[%s414_s5 + $0x28] sm:$0xff] %vm25_vm0, %v216_v23  ;;  %v218_v25 = vadd.f32 %v217_v24, %v116_v10 }
 0x206   :  { %v219_v26 = vpop.f32.mrf.mxu1 }
 0x207   :  { %228 = vst [vmem:[%s414_s5 + $0x30] sm:$0xff] %v218_v25  ;;  %v220_v27 = vadd.f32 %v219_v26, %v120_v11 }
 0x209   :  { %229 = vst.msk [vmem:[%s414_s5 + $0x38] sm:$0xff] %vm25_vm0, %v220_v27 }

// kernel: vit_forward.31
= control target key start
LH: loop header
LB: loop body
LE: loop exit
PB: predicated region body
PF: predicated region fallthrough
CT: control target
= control target key end

     0   :  { %s883_s24 = smov 0   ;;  %s885_s25 = smov 0   ;;  %s955_s0 = inlined_call_operand.vmem [shape: bf16[32,4,16], index: 0, kind: input, shape index: {}]   ;;  %s956_s1 = inlined_call_operand.vmem [shape: bf16[32,4,16], index: 1, kind: input, shape index: {}]   ;;  %s957_s2 = inlined_call_operand.vmem [shape: bf16[32,4,16], index: 2, kind: input, shape index: {}]   ;;  %s958_s3 = inlined_call_operand.vmem [shape: bf16[32,4,2], index: 3, kind: input, shape index: {}]   ;;  %s959_s4 = inlined_call_operand.vmem [shape: bf16[32,4,2], index: 4, kind: input, shape index: {}]   ;;  %s960_s5 = inlined_call_operand.vmem [shape: bf16[2,4], index: 5, kind: input, shape index: {}]   ;;  %s961_s6 = inlined_call_operand.vmem [shape: bf16[2,4], index: 6, kind: input, shape index: {}]   ;;  %s962_s7 = inlined_call_operand.vmem [shape: f32[32,4,16], index: 7, kind: output, shape index: {}]  }
   0x1   :  { %s887_s26 = smov 0  }
   0x2 LB: > { %s29_s27 = sadd.s32 1, %s835_s25  ;;  %p742_p0 = scmp.ge.s32.totalorder %s839_s26, 1  ;;  %s839_s26 = sphi %s887_s26, %s17_s26   ;;  %s835_s25 = sphi %s885_s25, %s964_s25   ;;  %s831_s24 = sphi %s883_s24, %s963_s24  }
   0x3   : > { %p31_p1 = scmp.ge.s32.totalorder %s29_s27, 32  ;;  %p301_p2 = scmp.lt.s32.totalorder %s839_s26, 33 }
   0x5   : > { %s966_s27 = smov (%p31_p1, %s29_s27), 0  ;;  %p302_p3 = pnand %p742_p0, %p301_p2 }
   0x6   : > { %p359_p4 = scmp.lt.s32.totalorder (!%p302_p3), %s831_s24, 31 }
   0x7   : > { %305 = sbr.rel (%p302_p3) target bundleno = 737 (0x2e1), region = 48 }
   0xc   : > { %v448_v0 = vld [vmem:[%s960_s5] sm:$0x1]  ;;  %vm453_vm0 = vcmask 1040384   ;;  %v841_v1 = vmov 0.0   ;;  %vm842_vm1 = vmmov 0   ;;  %s968_s24 = smov (!%p359_p4, %s831_s24), 31 }
   0xd   : > { %769 = vmatprep.subr.bf16.mxu1 %v841_v1  ;;  %v455_v2 = vsel %vm453_vm0, %v448_v0, 0  ;;  %763 = vmatprep.subr.bf16.mxu0 %v841_v1  ;;  %v499_v3 = vld [vmem:[%s961_s6] sm:$0x1]  ;;  %s913_s9 = sshll.u32 %s968_s24, 1  ;;  %vm449_vm2 = vcmask 15360   ;;  %vm399_vm3 = vcmask 130048  }
   0xe   : > { %770 = vmatpush3.bf16.msra.mxu1 %v455_v2  ;;  %771 = vmatprep.mubr.msk.bf16.mxu1 %vm842_vm1, %v841_v1  ;;  %v504_v4 = vsel %vm453_vm0, %v499_v3, 0  ;;  %s380_s12 = scalar_lea.vmem %s958_s3, %s913_s9  ;;  %s369_s15 = scalar_lea.vmem %s956_s1, %s913_s9  ;;  %vm547_vm4 = vcmask 27648   ;;  %vm564_vm5 = vcmask 1041408   ;;  %vm560_vm6 = vcmask 31744  }
   0xf   : > { %775 = vmatprep.subr.bf16.mxu1 %v841_v1  ;;  %765 = vmatprep.mubr.msk.bf16.mxu0 %vm842_vm1, %v841_v1  ;;  %v447_v5 = vld [vmem:[%s380_s12] sm:$0x3]  ;;  %s365_s18 = scalar_lea.vmem %s955_s0, %s913_s9  ;;  %s387_s21 = scalar_lea.vmem %s959_s4, %s913_s9  ;;  %vm608_vm7 = vcmask 125952  }
  0x10   : > { %v397_v6 = vld [vmem:[%s369_s15] sm:$0x3]  ;;  %s373_s28 = scalar_lea.vmem %s957_s2, %s913_s9  ;;  %s748_s29 = sshll.u32 %s968_s24, 2 }
  0x11   : > { %772 = vmatmul.mubr.msk.bf16.vlgmr.msra.gmra.mxu1 %vm449_vm2, %v447_v5  ;;  %v404_v7 = vsel %vm399_vm3, %v397_v6, 0  ;;  %v396_v8 = vld [vmem:[%s365_s18] sm:$0x3]  ;;  %s394_s10 = scalar_lea.vmem %s962_s7, %s748_s29 }
  0x12   : > { %764 = vmatpush3.bf16.xpose.msra.mxu0 %v404_v7  ;;  %776 = vmatpush3.bf16.msra.mxu1 %v504_v4  ;;  %v498_v9 = vld [vmem:[%s387_s21] sm:$0x3] }
  0x13   : > { %777 = vmatprep.mubr.msk.bf16.mxu1 %vm842_vm1, %v841_v1  ;;  %781 = vmatprep.subr.bf16.mxu0 %v841_v1  ;;  %v398_v31 = vld [vmem:[%s373_s28] sm:$0x3] }
  0x14   : > { %v566_v32 = vsel %vm564_vm5, %v398_v31, 0 }
  0x19   : > { %766 = vmatmul.mubr.msk.bf16.vlgmr.msra.gmra.mxu0 %vm399_vm3, %v396_v8  ;;  %778 = vmatmul.mubr.msk.bf16.vlgmr.msra.gmra.mxu1 %vm449_vm2, %v498_v9 }
  0x1a   : > { %783 = vmatprep.mubr.msk.bf16.mxu0 %vm842_vm1, %v841_v1  ;;  %782 = vmatpush3.bf16.msra.mxu0 %v566_v32 }
  0xd1   : > { %v491_v10 = vpop.f32.mrf.mxu1 }
  0xd3   : > { %v773_v11 = vpop.f32.mrf.mxu1 }
  0xd5   : > { %v494_v12 = vpop.f32.mrf.mxu1 }
  0xd7   : > { %v774_v13 = vpop.f32.mrf.mxu1 }
  0xd9   : > { %v440_v14 = vpop.f32.mrf.mxu0  ;;  %v540_v15 = vpop.f32.mrf.mxu1 }
  0xda   : > { %v446_v16 = vmul.f32 0.25, %v440_v14 }
  0xdb   : > { %v767_v17 = vpop.f32.mrf.mxu0  ;;  %v779_v18 = vpop.f32.mrf.mxu1 }
  0xdc   : > { %v497_v19 = vadd.f32 %v491_v10, %v446_v16 }
  0xdd   : > { %v443_v20 = vpop.f32.mrf.mxu0  ;;  %v543_v21 = vpop.f32.mrf.mxu1 }
  0xde   : > { %v546_v22 = vadd.f32 %v540_v15, %v497_v19 }
  0xdf   : > { %v768_v23 = vpop.f32.mrf.mxu0  ;;  %v780_v24 = vpop.f32.mrf.mxu1 }
  0xe0   : > { %v548_v25 = vsel %vm547_vm4, %v546_v22, -inf }
  0xe1   : > { %549 = vmax.xlane.f32.xlu0 %v548_v25 }
 0x16a   : > { %v550_v26 = vpop.xlane.xlu0 %549 }
 0x16b   : > { %v551_v27 = vsub.f32 %v546_v22, %v550_v26 }
 0x16d   : > { %v552_v28 = vmul.f32 1.442695, %v551_v27 }
 0x16f   : > { %813 = vpow2.f32 %v552_v28 }
 0x17c   : > { %v814_v29 = vpop.eup %813 }
 0x17d   : > { %v554_v30 = vsel %vm547_vm4, %v814_v29, 0.0 }
 0x17e   : > { %555 = vadd.xlane.f32.xlu0 %v554_v30 }
 0x207   : > { %v556_v33 = vpop.xlane.xlu0 %555 }
 0x208   : > { %815 = vrcp.f32 %v556_v33 }
 0x215   : > { %v816_v34 = vpop.eup %815 }
 0x216   : > { %v558_v35 = vmul.f32 %v816_v34, %v814_v29 }
 0x218   : > { %v559_v36 = vpack.c.bf16 %v558_v35, %v558_v35 }
 0x21a   : > { %784 = vmatmul.mubr.msk.bf16.vlgmr.msra.gmra.mxu0 %vm560_vm6, %v559_v36 }
 0x2da   : > { %v602_v37 = vpop.f32.mrf.mxu0 }
 0x2db   : > { %609 = vst.msk [vmem:[%s394_s10] sm:$0xf] %vm608_vm7, %v602_v37 }
 0x2dc   : > { %v785_v38 = vpop.f32.mrf.mxu0 }
 0x2de   : > { %v605_v39 = vpop.f32.mrf.mxu0 }
 0x2e0   : > { %v786_v40 = vpop.f32.mrf.mxu0 }
 0x2e1 PF: > { %s17_s26 = sadd.s32 1, %s839_s26   ;;  %s963_s24 = smov %s835_s25 }
 0x2e2   : > { %p14_p5 = scmp.ge.s32.totalorder %s17_s26, 34   ;;  %s964_s25 = smov %s966_s27 }
 0x2e4   :  { %16 = sbr.rel (!%p14_p5) target bundleno = 2 (0x2), region = 90 }

// kernel: vit_forward.33
= control target key start
LH: loop header
LB: loop body
LE: loop exit
PB: predicated region body
PF: predicated region fallthrough
CT: control target
= control target key end

     0   :  { %vm25_vm0 = vcmask 523264   ;;  %v275_v29 = vmov 0   ;;  %s405_s0 = inlined_call_operand.vmem [shape: f32[32,64], index: 0, kind: input, shape index: {}]   ;;  %s406_s3 = inlined_call_operand.vmem [shape: bf16[64,256], index: 3, kind: input, shape index: {}]   ;;  %s407_s1 = inlined_call_operand.vmem [shape: f32[1,64], index: 1, kind: input, shape index: {}]   ;;  %s408_s2 = inlined_call_operand.vmem [shape: f32[1,64], index: 2, kind: input, shape index: {}]   ;;  %s409_s4 = inlined_call_operand.vmem [shape: f32[1,256], index: 4, kind: input, shape index: {}]   ;;  %s410_s5 = inlined_call_operand.vmem [shape: f32[32,256], index: 5, kind: output, shape index: {}]  }
   0x1   :  { %v21_v0 = vld [vmem:[%s405_s0] sm:$0xff]  ;;  %v23_v1 = vld [vmem:[%s405_s0 + $0x10] sm:$0xff]  ;;  %v22_v2 = vld [vmem:[%s405_s0 + $0x8] sm:$0xff]  ;;  %201 = vmatprep.mubr.bf16.mxu0 %v275_v29  ;;  %211 = vmatprep.mubr.bf16.mxu1 %v275_v29 }
   0x2   :  { %v26_v3 = vsel %vm25_vm0, %v21_v0, 0.0  ;;  %v32_v4 = vsel %vm25_vm0, %v23_v1, 0.0  ;;  %v24_v5 = vld [vmem:[%s405_s0 + $0x18] sm:$0xff]  ;;  %v29_v6 = vsel %vm25_vm0, %v22_v2, 0.0  ;;  %v258_v31 = vld [vmem:[%s406_s3 + $0x24] ss:$8 sps:$4 sm:$0xff]  }
   0x3   :  { %27 = vadd.xlane.f32.xlu0 %v26_v3  ;;  %33 = vadd.xlane.f32.xlu1 %v32_v4  ;;  %v35_v7 = vsel %vm25_vm0, %v24_v5, 0.0  ;;  %v255_v28 = vld [vmem:[%s406_s3 + $0x34] ss:$8 sps:$4 sm:$0xff]   ;;  %v257_v30 = vld [vmem:[%s406_s3 + $0x30] ss:$8 sps:$4 sm:$0xff]  }
   0x4   :  { %177 = vmatprep.subr.bf16.mxu0 %v255_v28  ;;  %246 = vmatprep.subr.bf16.mxu1 %v255_v28  ;;  %v260_v32 = vld [vmem:[%s406_s3 + $0x20] ss:$8 sps:$4 sm:$0xff]   ;;  %v261_v33 = vld [vmem:[%s406_s3 + $0x14] ss:$8 sps:$4 sm:$0xff]   ;;  %v263_v34 = vld [vmem:[%s406_s3 + $0x10] ss:$8 sps:$4 sm:$0xff]  }
   0x5   :  { %178 = vmatpush1.bf16.msra.mxu0 %v257_v30  ;;  %250 = vmatpush1.bf16.msra.mxu1 %v257_v30  ;;  %v264_v35 = vld [vmem:[%s406_s3 + $0x4] ss:$8 sps:$4 sm:$0xff]   ;;  %v266_v36 = vld [vmem:[%s406_s3] ss:$8 sps:$4 sm:$0xff]  }
   0x6   :  { %179 = vmatprep.subr.bf16.mxu0 %v258_v31  ;;  %247 = vmatprep.subr.bf16.mxu1 %v258_v31  ;;  %v234_v51 = vld [vmem:[%s407_s1] ss:$0 sm:$0xff] }
   0x7   :  { %30 = vadd.xlane.f32.xlu0 %v29_v6  ;;  %36 = vadd.xlane.f32.xlu1 %v35_v7  ;;  %v235_v56 = vld [vmem:[%s408_s2] ss:$0 sm:$0xff] }
   0x9   :  { %180 = vmatpush1.bf16.msra.mxu0 %v260_v32  ;;  %251 = vmatpush1.bf16.msra.mxu1 %v260_v32 }
   0xa   :  { %181 = vmatprep.subr.bf16.mxu0 %v261_v33  ;;  %248 = vmatprep.subr.bf16.mxu1 %v261_v33 }
   0xd   :  { %182 = vmatpush1.bf16.msra.mxu0 %v263_v34  ;;  %252 = vmatpush1.bf16.msra.mxu1 %v263_v34 }
   0xe   :  { %183 = vmatprep.subr.bf16.mxu0 %v264_v35  ;;  %249 = vmatprep.subr.bf16.mxu1 %v264_v35 }
  0x11   :  { %184 = vmatpush1.bf16.msra.mxu0 %v266_v36  ;;  %253 = vmatpush1.bf16.msra.mxu1 %v266_v36 }
  0x8c   :  { %v28_v8 = vpop.xlane.xlu0 %27  ;;  %v34_v9 = vpop.xlane.xlu1 %33 }
  0x8d   :  { %v39_v10 = vmul.f32 0.015625, %v28_v8  ;;  %v41_v11 = vmul.f32 0.015625, %v34_v9  ;;  %v111_v8 = vld [vmem:[%s409_s4] sm:$0x3] }
  0x8f   :  { %v322_v12 = vsub.f32 %v21_v0, %v39_v10  ;;  %v324_v13 = vsub.f32 %v23_v1, %v41_v11 }
  0x90   :  { %v31_v14 = vpop.xlane.xlu0 %30  ;;  %v37_v15 = vpop.xlane.xlu1 %36 }
  0x91   :  { %v40_v16 = vmul.f32 0.015625, %v31_v14  ;;  %v42_v17 = vmul.f32 0.015625, %v37_v15  ;;  %v47_v18 = vmul.f32 %v322_v12, %v322_v12  ;;  %v49_v19 = vmul.f32 %v324_v13, %v324_v13 }
  0x93   :  { %v330_v20 = vsub.f32 %v22_v2, %v40_v16  ;;  %v332_v21 = vsub.f32 %v24_v5, %v42_v17  ;;  %v51_v22 = vsel %vm25_vm0, %v47_v18, 0.0  ;;  %v57_v23 = vsel %vm25_vm0, %v49_v19, 0.0 }
  0x94   :  { %52 = vadd.xlane.f32.xlu0 %v51_v22  ;;  %v113_v5 = vlaneseq }
  0x95   :  { %v48_v24 = vmul.f32 %v330_v20, %v330_v20  ;;  %v50_v25 = vmul.f32 %v332_v21, %v332_v21 }
  0x96   :  { %v114_v6 = vshrl.u32 %v113_v5, 7 }
  0x97   :  { %v54_v26 = vsel %vm25_vm0, %v48_v24, 0.0  ;;  %v60_v27 = vsel %vm25_vm0, %v50_v25, 0.0 }
  0x98   :  { %58 = vadd.xlane.f32.xlu0 %v57_v23  ;;  %55 = vadd.xlane.f32.xlu1 %v54_v26  ;;  %v115_v7 = vsub.s32 0, %v114_v6  ;;  %v119_v9 = vsub.s32 1, %v114_v6 }
  0x9a   :  { %v116_v10 = vrot.slane %v111_v8, %v115_v7  ;;  %v120_v11 = vrot.slane %v111_v8, %v119_v9 }
  0x9c   :  { %61 = vadd.xlane.f32.xlu1 %v60_v27 }
 0x11d   :  { %v53_v37 = vpop.xlane.xlu0 %52 }
 0x11e   :  { %v63_v38 = vmul.f32 0.015625, %v53_v37 }
 0x120   :  { %v67_v39 = vadd.f32 1e-06, %v63_v38 }
 0x121   :  { %v56_v40 = vpop.xlane.xlu1 %55  ;;  %v59_v41 = vpop.xlane.xlu0 %58 }
 0x122   :  { %267 = vrsqrt.f32 %v67_v39  ;;  %v64_v42 = vmul.f32 0.015625, %v56_v40  ;;  %v65_v43 = vmul.f32 0.015625, %v59_v41 }
 0x124   :  { %v68_v44 = vadd.f32 1e-06, %v64_v42  ;;  %v69_v45 = vadd.f32 1e-06, %v65_v43 }
 0x125   :  { %v62_v46 = vpop.xlane.xlu1 %61 }
 0x126   :  { %269 = vrsqrt.f32 %v68_v44  ;;  %v66_v47 = vmul.f32 0.015625, %v62_v46 }
 0x127   :  { %271 = vrsqrt.f32 %v69_v45 }
 0x128   :  { %v70_v48 = vadd.f32 1e-06, %v66_v47 }
 0x12a   :  { %273 = vrsqrt.f32 %v70_v48 }
 0x12f   :  { %v268_v49 = vpop.eup %267 }
 0x130   :  { %v75_v50 = vmul.f32 %v268_v49, %v322_v12 }
 0x132   :  { %v86_v55 = vmul.f32 %v234_v51, %v75_v50 }
 0x133   :  { %v270_v52 = vpop.eup %269 }
 0x134   :  { %v272_v53 = vpop.eup %271  ;;  %v76_v54 = vmul.f32 %v270_v52, %v330_v20  ;;  %v97_v60 = vadd.f32 %v235_v56, %v86_v55 }
 0x135   :  { %v77_v57 = vmul.f32 %v272_v53, %v324_v13 }
 0x136   :  { %v87_v58 = vmul.f32 %v234_v51, %v76_v54 }
 0x137   :  { %v274_v59 = vpop.eup %273  ;;  %v88_v63 = vmul.f32 %v234_v51, %v77_v57 }
 0x138   :  { %v98_v61 = vadd.f32 %v235_v56, %v87_v58  ;;  %v78_v62 = vmul.f32 %v274_v59, %v332_v21 }
 0x139   :  { %v99_v2 = vadd.f32 %v235_v56, %v88_v63 }
 0x13a   :  { %v101_v0 = vpack.c.bf16 %v98_v61, %v97_v60  ;;  %v89_v1 = vmul.f32 %v234_v51, %v78_v62 }
 0x13c   :  { %244 = vmatmul.mubr.msk.bf16.vlgmr.msra.gmra.mxu0 %vm25_vm0, %v101_v0  ;;  %v100_v3 = vadd.f32 %v235_v56, %v89_v1 }
 0x13e   :  { %v102_v4 = vpack.c.bf16 %v100_v3, %v99_v2 }
 0x140   :  { %245 = vmatmul.mubr.msk.bf16.vlgmr.msra.gmra.mxu1 %vm25_vm0, %v102_v4 }
 0x1fc   :  { %v203_v12 = vpop.f32.mrf.mxu0 }
 0x1fd   :  { %v204_v13 = vadd.f32 %v203_v12, %v116_v10 }
 0x1fe   :  { %v205_v14 = vpop.f32.mrf.mxu0 }
 0x1ff   :  { %222 = vst [vmem:[%s410_s5] sm:$0xff] %v204_v13  ;;  %v206_v15 = vadd.f32 %v205_v14, %v120_v11 }
 0x200   :  { %v207_v16 = vpop.f32.mrf.mxu0  ;;  %v213_v17 = vpop.f32.mrf.mxu1 }
 0x201   :  { %223 = vst [vmem:[%s410_s5 + $0x8] sm:$0xff] %v206_v15  ;;  %v208_v18 = vadd.f32 %v207_v16, %v116_v10  ;;  %v214_v19 = vadd.f32 %v213_v17, %v116_v10 }
 0x202   :  { %v209_v20 = vpop.f32.mrf.mxu0  ;;  %v215_v21 = vpop.f32.mrf.mxu1 }
 0x203   :  { %224 = vst [vmem:[%s410_s5 + $0x10] sm:$0xff] %v208_v18  ;;  %226 = vst [vmem:[%s410_s5 + $0x20] sm:$0xff] %v214_v19  ;;  %v210_v22 = vadd.f32 %v209_v20, %v120_v11  ;;  %v216_v23 = vadd.f32 %v215_v21, %v120_v11 }
 0x204   :  { %v217_v24 = vpop.f32.mrf.mxu1 }
 0x205   :  { %225 = vst [vmem:[%s410_s5 + $0x18] sm:$0xff] %v210_v22  ;;  %227 = vst [vmem:[%s410_s5 + $0x28] sm:$0xff] %v216_v23  ;;  %v218_v25 = vadd.f32 %v217_v24, %v116_v10 }
 0x206   :  { %v219_v26 = vpop.f32.mrf.mxu1 }
 0x207   :  { %228 = vst [vmem:[%s410_s5 + $0x30] sm:$0xff] %v218_v25  ;;  %v220_v27 = vadd.f32 %v219_v26, %v120_v11 }
 0x209   :  { %229 = vst [vmem:[%s410_s5 + $0x38] sm:$0xff] %v220_v27 }

// kernel: vit_forward.32
= control target key start
LH: loop header
LB: loop body
LE: loop exit
PB: predicated region body
PF: predicated region fallthrough
CT: control target
= control target key end

     0   :  { %vm19_vm0 = vcmask 523264   ;;  %v198_v1 = vmov 0.0   ;;  %s266_s1 = inlined_call_operand.vmem [shape: bf16[64,64], index: 1, kind: input, shape index: {}]   ;;  %s267_s0 = inlined_call_operand.vmem [shape: bf16[32,64], index: 0, kind: input, shape index: {}]   ;;  %s268_s2 = inlined_call_operand.vmem [shape: f32[1,64], index: 2, kind: input, shape index: {}]   ;;  %s269_s3 = inlined_call_operand.vmem [shape: f32[32,64], index: 3, kind: output, shape index: {}]  }
   0x1   :  { %v192_v0 = vld [vmem:[%s266_s1 + $0x18] sm:$0xff]   ;;  %22 = vst.msk [vmem:[#allocation2 + $0x10] sm:$0xff] %vm19_vm0, %v198_v1  ;;  %20 = vst.msk [vmem:[#allocation2] sm:$0xff] %vm19_vm0, %v198_v1  ;;  %v193_v2 = vld [vmem:[%s266_s1 + $0x10] sm:$0xff]  }
   0x2   :  { %21 = vst.msk [vmem:[#allocation2 + $0x8] sm:$0xff] %vm19_vm0, %v198_v1  ;;  %23 = vst.msk [vmem:[#allocation2 + $0x18] sm:$0xff] %vm19_vm0, %v198_v1  ;;  %179 = vmatprep.subr.bf16.mxu0 %v192_v0  ;;  %v194_v3 = vld [vmem:[%s266_s1 + $0x8] sm:$0xff]   ;;  %v196_v4 = vld [vmem:[%s267_s0] sm:$0xff]  }
   0x3   :  { %180 = vmatpush3.bf16.msra.mxu0 %v192_v0  ;;  %187 = vmatprep.mubr.msk.bf16.mxu0 %vm19_vm0, %v196_v4  ;;  %v195_v5 = vld [vmem:[%s266_s1] sm:$0xff]   ;;  %v197_v6 = vld [vmem:[%s267_s0 + $0x8] sm:$0xff]  }
   0x4   :  { %181 = vmatprep.subr.bf16.mxu0 %v193_v2  ;;  %v172_v19 = vld [vmem:[%s268_s2] ss:$0 sm:$0xff] }
   0x7   :  { %182 = vmatpush3.bf16.msra.mxu0 %v193_v2 }
   0x8   :  { %183 = vmatprep.subr.bf16.mxu0 %v194_v3  ;;  %v26_v7 = vld [vmem:[#allocation2 + $0x10] sm:$0xff]  ;;  %v24_v9 = vld [vmem:[#allocation2] sm:$0xff] }
   0x9   :  { %v27_v12 = vld [vmem:[#allocation2 + $0x18] sm:$0xff]  ;;  %v25_v15 = vld [vmem:[#allocation2 + $0x8] sm:$0xff] }
   0xb   :  { %184 = vmatpush3.bf16.msra.mxu0 %v194_v3 }
   0xc   :  { %185 = vmatprep.subr.bf16.mxu0 %v195_v5 }
   0xf   :  { %186 = vmatpush3.bf16.msra.mxu0 %v195_v5 }
  0x12   :  { %188 = vmatmul.mubr.msk.bf16.vlgmr.msra.gmra.mxu0 %vm19_vm0, %v197_v6 }
  0xd2   :  { %v189_v8 = vpop.f32.mrf.mxu0 }
  0xd3   :  { %v132_v10 = vadd.f32 %v189_v8, %v26_v7 }
  0xd4   :  { %v115_v11 = vpop.f32.mrf.mxu0 }
  0xd5   :  { %136 = vst.msk [vmem:[#allocation2 + $0x10] sm:$0xff] %vm19_vm0, %v132_v10  ;;  %v130_v13 = vadd.f32 %v115_v11, %v24_v9 }
  0xd6   :  { %v190_v14 = vpop.f32.mrf.mxu0 }
  0xd7   :  { %134 = vst.msk [vmem:[#allocation2] sm:$0xff] %vm19_vm0, %v130_v13  ;;  %v133_v16 = vadd.f32 %v190_v14, %v27_v12 }
  0xd8   :  { %v118_v17 = vpop.f32.mrf.mxu0 }
  0xd9   :  { %137 = vst.msk [vmem:[#allocation2 + $0x18] sm:$0xff] %vm19_vm0, %v133_v16  ;;  %v131_v18 = vadd.f32 %v118_v17, %v25_v15 }
  0xdb   :  { %135 = vst.msk [vmem:[#allocation2 + $0x8] sm:$0xff] %vm19_vm0, %v131_v18 }
  0xdc   :  { %v143_v20 = vld [vmem:[#allocation2 + $0x10] sm:$0xff] }
  0xdd   :  { %v154_v21 = vadd.f32 %v172_v19, %v143_v20 }
  0xde   :  { %v141_v22 = vld [vmem:[#allocation2] sm:$0xff] }
  0xdf   :  { %158 = vst.msk [vmem:[%s269_s3 + $0x10] sm:$0xff] %vm19_vm0, %v154_v21  ;;  %v152_v23 = vadd.f32 %v172_v19, %v141_v22 }
  0xe0   :  { %v144_v24 = vld [vmem:[#allocation2 + $0x18] sm:$0xff] }
  0xe1   :  { %156 = vst.msk [vmem:[%s269_s3] sm:$0xff] %vm19_vm0, %v152_v23  ;;  %v155_v25 = vadd.f32 %v172_v19, %v144_v24 }
  0xe2   :  { %v142_v26 = vld [vmem:[#allocation2 + $0x8] sm:$0xff] }
  0xe3   :  { %159 = vst.msk [vmem:[%s269_s3 + $0x18] sm:$0xff] %vm19_vm0, %v155_v25  ;;  %v153_v27 = vadd.f32 %v172_v19, %v142_v26 }
  0xe5   :  { %157 = vst.msk [vmem:[%s269_s3 + $0x8] sm:$0xff] %vm19_vm0, %v153_v27 }

// kernel: vit_forward.34
= control target key start
LH: loop header
LB: loop body
LE: loop exit
PB: predicated region body
PF: predicated region fallthrough
CT: control target
= control target key end

     0   :  { %vm22_vm0 = vcmask 523264   ;;  %v363_v20 = vmov 0.0   ;;  %s488_s1 = inlined_call_operand.vmem [shape: bf16[256,64], index: 1, kind: input, shape index: {}]   ;;  %s489_s0 = inlined_call_operand.vmem [shape: bf16[32,256], index: 0, kind: input, shape index: {}]   ;;  %s490_s2 = inlined_call_operand.vmem [shape: f32[1,64], index: 2, kind: input, shape index: {}]   ;;  %s491_s3 = inlined_call_operand.vmem [shape: f32[32,64], index: 3, kind: input, shape index: {}]   ;;  %s492_s4 = inlined_call_operand.vmem [shape: f32[32,64], index: 4, kind: output, shape index: {}]  }
   0x1   :  { %v341_v0 = vld [vmem:[%s488_s1 + $0x78] sm:$0xff]   ;;  %v343_v2 = vld [vmem:[%s488_s1 + $0x70] sm:$0xff]   ;;  %v345_v4 = vld [vmem:[%s488_s1 + $0x68] sm:$0xff]   ;;  %23 = vst.msk [vmem:[#allocation2] sm:$0xff] %vm22_vm0, %v363_v20 }
   0x2   :  { %v342_v1 = vld [vmem:[%s488_s1 + $0x38] sm:$0xff]   ;;  %296 = vmatprep.subr.bf16.mxu0 %v341_v0  ;;  %324 = vmatprep.subr.bf16.mxu1 %v341_v0  ;;  %v344_v3 = vld [vmem:[%s488_s1 + $0x30] sm:$0xff]   ;;  %v346_v5 = vld [vmem:[%s488_s1 + $0x28] sm:$0xff]   ;;  %24 = vst.msk [vmem:[#allocation2 + $0x8] sm:$0xff] %vm22_vm0, %v363_v20 }
   0x3   :  { %297 = vmatpush3.bf16.msra.mxu0 %v342_v1  ;;  %332 = vmatpush3.bf16.msra.mxu1 %v342_v1  ;;  %v347_v6 = vld [vmem:[%s488_s1 + $0x60] sm:$0xff]   ;;  %v349_v8 = vld [vmem:[%s488_s1 + $0x58] sm:$0xff]   ;;  %v351_v10 = vld [vmem:[%s488_s1 + $0x50] sm:$0xff]   ;;  %25 = vst.msk [vmem:[#allocation2 + $0x10] sm:$0xff] %vm22_vm0, %v363_v20 }
   0x4   :  { %298 = vmatprep.subr.bf16.mxu0 %v343_v2  ;;  %325 = vmatprep.subr.bf16.mxu1 %v343_v2  ;;  %v348_v7 = vld [vmem:[%s488_s1 + $0x20] sm:$0xff]   ;;  %v350_v9 = vld [vmem:[%s488_s1 + $0x18] sm:$0xff]   ;;  %v352_v13 = vld [vmem:[%s488_s1 + $0x10] sm:$0xff]   ;;  %26 = vst.msk [vmem:[#allocation2 + $0x18] sm:$0xff] %vm22_vm0, %v363_v20 }
   0x5   :  { %v359_v11 = vld [vmem:[%s489_s0 + $0x4] ss:$8 sps:$4 sm:$0xff]   ;;  %v362_v12 = vld [vmem:[%s489_s0 + $0x14] ss:$8 sps:$4 sm:$0xff]   ;;  %v357_v18 = vld [vmem:[%s489_s0] ss:$8 sps:$4 sm:$0xff]  }
   0x6   :  { %v353_v14 = vld [vmem:[%s488_s1 + $0x48] sm:$0xff]   ;;  %215 = vmatprep.mubr.bf16.mxu0 %v359_v11  ;;  %223 = vmatprep.mubr.bf16.mxu1 %v362_v12  ;;  %v355_v16 = vld [vmem:[%s488_s1 + $0x40] sm:$0xff]   ;;  %v360_v19 = vld [vmem:[%s489_s0 + $0x10] ss:$8 sps:$4 sm:$0xff]  }
   0x7   :  { %299 = vmatpush3.bf16.msra.mxu0 %v344_v3  ;;  %333 = vmatpush3.bf16.msra.mxu1 %v344_v3  ;;  %v354_v15 = vld [vmem:[%s488_s1 + $0x8] sm:$0xff]   ;;  %v356_v17 = vld [vmem:[%s488_s1] sm:$0xff]   ;;  %v261_v45 = vld [vmem:[%s491_s3 + $0x10] sm:$0xff] }
   0x8   :  { %300 = vmatprep.subr.bf16.mxu0 %v345_v4  ;;  %326 = vmatprep.subr.bf16.mxu1 %v345_v4  ;;  %v27_v23 = vld [vmem:[#allocation2] sm:$0xff]  ;;  %v260_v50 = vld [vmem:[%s491_s3 + $0x8] sm:$0xff]  ;;  %v262_v53 = vld [vmem:[%s491_s3 + $0x18] sm:$0xff] }
   0x9   :  { %v28_v33 = vld [vmem:[#allocation2 + $0x8] sm:$0xff]  ;;  %v295_v41 = vld [vmem:[%s490_s2] ss:$0 sm:$0xff] }
   0xa   :  { %v29_v25 = vld [vmem:[#allocation2 + $0x10] sm:$0xff]  ;;  %v259_v42 = vld [vmem:[%s491_s3] sm:$0xff] }
   0xb   :  { %301 = vmatpush3.bf16.msra.mxu0 %v346_v5  ;;  %334 = vmatpush3.bf16.msra.mxu1 %v346_v5  ;;  %v30_v35 = vld [vmem:[#allocation2 + $0x18] sm:$0xff] }
   0xc   :  { %302 = vmatprep.subr.bf16.mxu0 %v347_v6  ;;  %327 = vmatprep.subr.bf16.mxu1 %v347_v6 }
   0xf   :  { %303 = vmatpush3.bf16.msra.mxu0 %v348_v7  ;;  %335 = vmatpush3.bf16.msra.mxu1 %v348_v7 }
  0x10   :  { %304 = vmatprep.subr.bf16.mxu0 %v349_v8  ;;  %328 = vmatprep.subr.bf16.mxu1 %v349_v8 }
  0x13   :  { %305 = vmatpush3.bf16.msra.mxu0 %v350_v9  ;;  %336 = vmatpush3.bf16.msra.mxu1 %v350_v9 }
  0x14   :  { %306 = vmatprep.subr.bf16.mxu0 %v351_v10  ;;  %329 = vmatprep.subr.bf16.mxu1 %v351_v10 }
  0x17   :  { %307 = vmatpush3.bf16.msra.mxu0 %v352_v13  ;;  %337 = vmatpush3.bf16.msra.mxu1 %v352_v13 }
  0x18   :  { %308 = vmatprep.subr.bf16.mxu0 %v353_v14  ;;  %330 = vmatprep.subr.bf16.mxu1 %v353_v14 }
  0x1b   :  { %309 = vmatpush3.bf16.msra.mxu0 %v354_v15  ;;  %338 = vmatpush3.bf16.msra.mxu1 %v354_v15 }
  0x1c   :  { %310 = vmatprep.subr.bf16.mxu0 %v355_v16  ;;  %331 = vmatprep.subr.bf16.mxu1 %v355_v16 }
  0x1f   :  { %311 = vmatpush3.bf16.msra.mxu0 %v356_v17  ;;  %339 = vmatpush3.bf16.msra.mxu1 %v356_v17 }
  0x22   :  { %216 = vmatmul.mubr.bf16.vlgmr.msra.gmra.mxu0 %v357_v18  ;;  %224 = vmatmul.mubr.bf16.vlgmr.msra.gmra.mxu1 %v360_v19 }
  0xe2   :  { %v312_v21 = vpop.f32.mrf.mxu0  ;;  %v318_v22 = vpop.f32.mrf.mxu1 }
  0xe4   :  { %v313_v24 = vpop.f32.mrf.mxu0  ;;  %v319_v26 = vpop.f32.mrf.mxu1 }
  0xe5   :  { %v314_v27 = vadd.f32 %v313_v24, %v312_v21  ;;  %v320_v28 = vadd.f32 %v319_v26, %v318_v22 }
  0xe6   :  { %v315_v29 = vpop.f32.mrf.mxu0  ;;  %v321_v30 = vpop.f32.mrf.mxu1 }
  0xe7   :  { %v232_v31 = vadd.f32 %v314_v27, %v27_v23  ;;  %v234_v32 = vadd.f32 %v320_v28, %v29_v25 }
  0xe8   :  { %v316_v34 = vpop.f32.mrf.mxu0  ;;  %v322_v36 = vpop.f32.mrf.mxu1 }
  0xe9   :  { %237 = vst.msk [vmem:[#allocation2] sm:$0xff] %vm22_vm0, %v232_v31  ;;  %239 = vst.msk [vmem:[#allocation2 + $0x10] sm:$0xff] %vm22_vm0, %v234_v32  ;;  %v317_v37 = vadd.f32 %v316_v34, %v315_v29  ;;  %v323_v38 = vadd.f32 %v322_v36, %v321_v30 }
  0xeb   :  { %v233_v39 = vadd.f32 %v317_v37, %v28_v33  ;;  %v235_v40 = vadd.f32 %v323_v38, %v30_v35 }
  0xed   :  { %238 = vst.msk [vmem:[#allocation2 + $0x8] sm:$0xff] %vm22_vm0, %v233_v39  ;;  %240 = vst.msk [vmem:[#allocation2 + $0x18] sm:$0xff] %vm22_vm0, %v235_v40 }
  0xf0   :  { %v244_v43 = vld [vmem:[#allocation2] sm:$0xff]  ;;  %v246_v44 = vld [vmem:[#allocation2 + $0x10] sm:$0xff] }
  0xf1   :  { %v255_v46 = vadd.f32 %v295_v41, %v244_v43  ;;  %v257_v47 = vadd.f32 %v295_v41, %v246_v44 }
  0xf3   :  { %v263_v48 = vadd.f32 %v259_v42, %v255_v46  ;;  %v265_v49 = vadd.f32 %v261_v45, %v257_v47 }
  0xf4   :  { %v245_v51 = vld [vmem:[#allocation2 + $0x8] sm:$0xff]  ;;  %v247_v52 = vld [vmem:[#allocation2 + $0x18] sm:$0xff] }
  0xf5   :  { %267 = vst.msk [vmem:[%s492_s4] sm:$0xff] %vm22_vm0, %v263_v48  ;;  %269 = vst.msk [vmem:[%s492_s4 + $0x10] sm:$0xff] %vm22_vm0, %v265_v49  ;;  %v256_v54 = vadd.f32 %v295_v41, %v245_v51  ;;  %v258_v55 = vadd.f32 %v295_v41, %v247_v52 }
  0xf7   :  { %v264_v56 = vadd.f32 %v260_v50, %v256_v54  ;;  %v266_v57 = vadd.f32 %v262_v53, %v258_v55 }
  0xf9   :  { %268 = vst.msk [vmem:[%s492_s4 + $0x8] sm:$0xff] %vm22_vm0, %v264_v56  ;;  %270 = vst.msk [vmem:[%s492_s4 + $0x18] sm:$0xff] %vm22_vm0, %v266_v57 }

// kernel: vit_forward.36
= control target key start
LH: loop header
LB: loop body
LE: loop exit
PB: predicated region body
PF: predicated region fallthrough
CT: control target
= control target key end

     0   :  { %s1006_s24 = smov 0   ;;  %s1008_s25 = smov 0   ;;  %s1081_s0 = inlined_call_operand.vmem [shape: bf16[8,16,16], index: 0, kind: input, shape index: {}]   ;;  %s1082_s1 = inlined_call_operand.vmem [shape: bf16[8,16,16], index: 1, kind: input, shape index: {}]   ;;  %s1083_s2 = inlined_call_operand.vmem [shape: bf16[8,16,16], index: 2, kind: input, shape index: {}]   ;;  %s1084_s3 = inlined_call_operand.vmem [shape: bf16[8,16,4], index: 3, kind: input, shape index: {}]   ;;  %s1085_s4 = inlined_call_operand.vmem [shape: bf16[8,16,4], index: 4, kind: input, shape index: {}]   ;;  %s1086_s5 = inlined_call_operand.vmem [shape: bf16[4,16], index: 5, kind: input, shape index: {}]   ;;  %s1087_s6 = inlined_call_operand.vmem [shape: bf16[4,16], index: 6, kind: input, shape index: {}]   ;;  %s1088_s7 = inlined_call_operand.vmem [shape: f32[8,16,16], index: 7, kind: output, shape index: {}]  }
   0x1   :  { %s1010_s26 = smov 0  }
   0x2 LB: > { %s29_s27 = sadd.s32 1, %s958_s25  ;;  %p839_p0 = scmp.ge.s32.totalorder %s962_s26, 1  ;;  %s962_s26 = sphi %s1010_s26, %s17_s26   ;;  %s958_s25 = sphi %s1008_s25, %s1090_s25   ;;  %s954_s24 = sphi %s1006_s24, %s1089_s24  }
   0x3   : > { %p31_p1 = scmp.ge.s32.totalorder %s29_s27, 8  ;;  %p312_p2 = scmp.lt.s32.totalorder %s962_s26, 9 }
   0x5   : > { %s1092_s27 = smov (%p31_p1, %s29_s27), 0  ;;  %p313_p3 = pnand %p839_p0, %p312_p2 }
   0x6   : > { %p381_p4 = scmp.lt.s32.totalorder (!%p313_p3), %s954_s24, 7 }
   0x7   : > { %316 = sbr.rel (%p313_p3) target bundleno = 742 (0x2e6), region = 48 }
   0xc   : > { %v499_v0 = vld [vmem:[%s1086_s5] sm:$0x3]  ;;  %vm509_vm0 = vcmask 1041408   ;;  %v964_v1 = vmov 0.0   ;;  %vm965_vm1 = vmmov 0   ;;  %s1094_s24 = smov (!%p381_p4, %s954_s24), 7 }
   0xd   : > { %883 = vmatprep.subr.bf16.mxu1 %v964_v1  ;;  %v511_v2 = vsel %vm509_vm0, %v499_v0, 0  ;;  %877 = vmatprep.subr.bf16.mxu0 %v964_v1  ;;  %v558_v3 = vld [vmem:[%s1087_s6] sm:$0x3]  ;;  %s1035_s9 = sshll.u32 %s1094_s24, 3  ;;  %vm505_vm2 = vcmask 31744   ;;  %vm447_vm3 = vcmask 130048  }
   0xe   : > { %884 = vmatpush3.bf16.msra.mxu1 %v511_v2  ;;  %885 = vmatprep.mubr.msk.bf16.mxu1 %vm965_vm1, %v964_v1  ;;  %v568_v4 = vsel %vm509_vm0, %v558_v3, 0  ;;  %s408_s12 = scalar_lea.vmem %s1084_s3, %s1035_s9  ;;  %s394_s15 = scalar_lea.vmem %s1082_s1, %s1035_s9 }
   0xf   : > { %889 = vmatprep.subr.bf16.mxu1 %v964_v1  ;;  %879 = vmatprep.mubr.msk.bf16.mxu0 %vm965_vm1, %v964_v1  ;;  %v927_v5 = vld [vmem:[%s408_s12] sm:$0xff]   ;;  %s388_s18 = scalar_lea.vmem %s1081_s0, %s1035_s9  ;;  %s418_s21 = scalar_lea.vmem %s1085_s4, %s1035_s9 }
  0x10   : > { %v928_v6 = vld [vmem:[%s394_s15] sm:$0xff]   ;;  %s399_s28 = scalar_lea.vmem %s1083_s2, %s1035_s9  ;;  %s868_s29 = sshll.u32 %s1094_s24, 4 }
  0x11   : > { %886 = vmatmul.mubr.msk.bf16.vlgmr.msra.gmra.mxu1 %vm505_vm2, %v927_v5  ;;  %v452_v7 = vsel %vm447_vm3, %v928_v6, 0  ;;  %v930_v8 = vld [vmem:[%s418_s21] sm:$0xff]   ;;  %s428_s10 = scalar_lea.vmem %s1088_s7, %s868_s29 }
  0x12   : > { %890 = vmatpush3.bf16.msra.mxu1 %v568_v4  ;;  %891 = vmatprep.mubr.msk.bf16.mxu1 %vm965_vm1, %v964_v1  ;;  %v929_v9 = vld [vmem:[%s388_s18] sm:$0xff]  }
  0x13   : > { %878 = vmatpush3.bf16.xpose.msra.mxu0 %v452_v7  ;;  %v931_v40 = vld [vmem:[%s399_s28] sm:$0xff]  }
  0x14   : > { %895 = vmatprep.subr.bf16.mxu0 %v964_v1 }
  0x19   : > { %892 = vmatmul.mubr.msk.bf16.vlgmr.msra.gmra.mxu1 %vm505_vm2, %v930_v8 }
  0x1a   : > { %880 = vmatmul.mubr.msk.bf16.vlgmr.msra.gmra.mxu0 %vm447_vm3, %v929_v9 }
  0x1b   : > { %897 = vmatprep.mubr.msk.bf16.mxu0 %vm965_vm1, %v964_v1  ;;  %896 = vmatpush3.bf16.msra.mxu0 %v931_v40 }
  0xd1   : > { %v547_v10 = vpop.f32.mrf.mxu1 }
  0xd3   : > { %v887_v11 = vpop.f32.mrf.mxu1 }
  0xd5   : > { %v550_v12 = vpop.f32.mrf.mxu1 }
  0xd7   : > { %v888_v13 = vpop.f32.mrf.mxu1 }
  0xd9   : > { %v604_v14 = vpop.f32.mrf.mxu1 }
  0xda   : > { %v488_v15 = vpop.f32.mrf.mxu0 }
  0xdb   : > { %v495_v16 = vmul.f32 0.25, %v488_v15  ;;  %v893_v17 = vpop.f32.mrf.mxu1 }
  0xdc   : > { %v881_v18 = vpop.f32.mrf.mxu0 }
  0xdd   : > { %v554_v19 = vadd.f32 %v547_v10, %v495_v16  ;;  %v607_v20 = vpop.f32.mrf.mxu1 }
  0xde   : > { %v491_v21 = vpop.f32.mrf.mxu0 }
  0xdf   : > { %v611_v22 = vadd.f32 %v604_v14, %v554_v19  ;;  %v496_v23 = vmul.f32 0.25, %v491_v21  ;;  %v894_v24 = vpop.f32.mrf.mxu1 }
  0xe0   : > { %v882_v25 = vpop.f32.mrf.mxu0 }
  0xe1   : > { %v555_v26 = vadd.f32 %v550_v12, %v496_v23  ;;  %v613_v27 = vsel %vm447_vm3, %v611_v22, -inf }
  0xe2   : > { %614 = vmax.xlane.f32.xlu0 %v613_v27 }
  0xe3   : > { %v612_v28 = vadd.f32 %v607_v20, %v555_v26 }
  0xe5   : > { %v616_v29 = vsel %vm447_vm3, %v612_v28, -inf }
  0xe6   : > { %617 = vmax.xlane.f32.xlu0 %v616_v29 }
 0x16b   : > { %v615_v30 = vpop.xlane.xlu0 %614 }
 0x16c   : > { %v619_v31 = vsub.f32 %v611_v22, %v615_v30 }
 0x16e   : > { %v621_v32 = vmul.f32 1.442695, %v619_v31 }
 0x16f   : > { %v618_v33 = vpop.xlane.xlu0 %617 }
 0x170   : > { %932 = vpow2.f32 %v621_v32  ;;  %v620_v34 = vsub.f32 %v612_v28, %v618_v33 }
 0x172   : > { %v623_v35 = vmul.f32 1.442695, %v620_v34 }
 0x174   : > { %934 = vpow2.f32 %v623_v35 }
 0x17d   : > { %v933_v36 = vpop.eup %932 }
 0x17e   : > { %v625_v37 = vsel %vm447_vm3, %v933_v36, 0.0 }
 0x17f   : > { %626 = vadd.xlane.f32.xlu1 %v625_v37 }
 0x181   : > { %v935_v38 = vpop.eup %934 }
 0x182   : > { %v628_v39 = vsel %vm447_vm3, %v935_v38, 0.0 }
 0x183   : > { %629 = vadd.xlane.f32.xlu1 %v628_v39 }
 0x208   : > { %v627_v41 = vpop.xlane.xlu1 %626 }
 0x209   : > { %936 = vrcp.f32 %v627_v41 }
 0x20c   : > { %v630_v42 = vpop.xlane.xlu1 %629 }
 0x20d   : > { %938 = vrcp.f32 %v630_v42 }
 0x216   : > { %v937_v43 = vpop.eup %936 }
 0x217   : > { %v633_v46 = vmul.f32 %v937_v43, %v933_v36 }
 0x21a   : > { %v939_v44 = vpop.eup %938 }
 0x21b   : > { %v634_v45 = vmul.f32 %v939_v44, %v935_v38 }
 0x21d   : > { %v635_v47 = vpack.c.bf16 %v634_v45, %v633_v46 }
 0x21f   : > { %898 = vmatmul.mubr.msk.bf16.vlgmr.msra.gmra.mxu0 %vm447_vm3, %v635_v47 }
 0x2df   : > { %v679_v48 = vpop.f32.mrf.mxu0 }
 0x2e0   : > { %686 = vst.msk [vmem:[%s428_s10] sm:$0xff] %vm447_vm3, %v679_v48 }
 0x2e1   : > { %v899_v49 = vpop.f32.mrf.mxu0 }
 0x2e3   : > { %v682_v50 = vpop.f32.mrf.mxu0 }
 0x2e4   : > { %687 = vst.msk [vmem:[%s428_s10 + $0x8] sm:$0xff] %vm447_vm3, %v682_v50 }
 0x2e5   : > { %v900_v51 = vpop.f32.mrf.mxu0 }
 0x2e6 PF: > { %s17_s26 = sadd.s32 1, %s962_s26   ;;  %s1089_s24 = smov %s958_s25 }
 0x2e7   : > { %p14_p5 = scmp.ge.s32.totalorder %s17_s26, 10   ;;  %s1090_s25 = smov %s1092_s27 }
 0x2e9   :  { %16 = sbr.rel (!%p14_p5) target bundleno = 2 (0x2), region = 90 }

// kernel: vit_forward.37
= control target key start
LH: loop header
LB: loop body
LE: loop exit
PB: predicated region body
PF: predicated region fallthrough
CT: control target
= control target key end

     0   :  { %vm22_vm0 = vcmask 523264   ;;  %v209_v1 = vmov 0.0   ;;  %s294_s1 = inlined_call_operand.vmem [shape: bf16[64,64], index: 1, kind: input, shape index: {}]   ;;  %s295_s0 = inlined_call_operand.vmem [shape: bf16[32,64], index: 0, kind: input, shape index: {}]   ;;  %s296_s2 = inlined_call_operand.vmem [shape: f32[1,64], index: 2, kind: input, shape index: {}]   ;;  %s297_s3 = inlined_call_operand.vmem [shape: f32[32,64], index: 3, kind: input, shape index: {}]   ;;  %s298_s4 = inlined_call_operand.vmem [shape: f32[32,64], index: 4, kind: output, shape index: {}]  }
   0x1   :  { %v203_v0 = vld [vmem:[%s294_s1 + $0x18] sm:$0xff]   ;;  %25 = vst.msk [vmem:[#allocation2 + $0x10] sm:$0xff] %vm22_vm0, %v209_v1  ;;  %23 = vst.msk [vmem:[#allocation2] sm:$0xff] %vm22_vm0, %v209_v1  ;;  %v204_v2 = vld [vmem:[%s294_s1 + $0x10] sm:$0xff]  }
   0x2   :  { %24 = vst.msk [vmem:[#allocation2 + $0x8] sm:$0xff] %vm22_vm0, %v209_v1  ;;  %26 = vst.msk [vmem:[#allocation2 + $0x18] sm:$0xff] %vm22_vm0, %v209_v1  ;;  %190 = vmatprep.subr.bf16.mxu0 %v203_v0  ;;  %v205_v3 = vld [vmem:[%s294_s1 + $0x8] sm:$0xff]   ;;  %v207_v4 = vld [vmem:[%s295_s0] sm:$0xff]  }
   0x3   :  { %191 = vmatpush3.bf16.msra.mxu0 %v203_v0  ;;  %198 = vmatprep.mubr.msk.bf16.mxu0 %vm22_vm0, %v207_v4  ;;  %v206_v5 = vld [vmem:[%s294_s1] sm:$0xff]   ;;  %v208_v6 = vld [vmem:[%s295_s0 + $0x8] sm:$0xff]   ;;  %v161_v21 = vld [vmem:[%s297_s3 + $0x10] sm:$0xff] }
   0x4   :  { %192 = vmatprep.subr.bf16.mxu0 %v204_v2  ;;  %v183_v19 = vld [vmem:[%s296_s2] ss:$0 sm:$0xff]  ;;  %v162_v28 = vld [vmem:[%s297_s3 + $0x18] sm:$0xff]  ;;  %v160_v32 = vld [vmem:[%s297_s3 + $0x8] sm:$0xff] }
   0x5   :  { %v159_v24 = vld [vmem:[%s297_s3] sm:$0xff] }
   0x7   :  { %193 = vmatpush3.bf16.msra.mxu0 %v204_v2 }
   0x8   :  { %194 = vmatprep.subr.bf16.mxu0 %v205_v3  ;;  %v29_v7 = vld [vmem:[#allocation2 + $0x10] sm:$0xff]  ;;  %v27_v9 = vld [vmem:[#allocation2] sm:$0xff] }
   0x9   :  { %v30_v12 = vld [vmem:[#allocation2 + $0x18] sm:$0xff]  ;;  %v28_v15 = vld [vmem:[#allocation2 + $0x8] sm:$0xff] }
   0xb   :  { %195 = vmatpush3.bf16.msra.mxu0 %v205_v3 }
   0xc   :  { %196 = vmatprep.subr.bf16.mxu0 %v206_v5 }
   0xf   :  { %197 = vmatpush3.bf16.msra.mxu0 %v206_v5 }
  0x12   :  { %199 = vmatmul.mubr.msk.bf16.vlgmr.msra.gmra.mxu0 %vm22_vm0, %v208_v6 }
  0xd2   :  { %v200_v8 = vpop.f32.mrf.mxu0 }
  0xd3   :  { %v135_v10 = vadd.f32 %v200_v8, %v29_v7 }
  0xd4   :  { %v118_v11 = vpop.f32.mrf.mxu0 }
  0xd5   :  { %139 = vst.msk [vmem:[#allocation2 + $0x10] sm:$0xff] %vm22_vm0, %v135_v10  ;;  %v133_v13 = vadd.f32 %v118_v11, %v27_v9 }
  0xd6   :  { %v201_v14 = vpop.f32.mrf.mxu0 }
  0xd7   :  { %137 = vst.msk [vmem:[#allocation2] sm:$0xff] %vm22_vm0, %v133_v13  ;;  %v136_v16 = vadd.f32 %v201_v14, %v30_v12 }
  0xd8   :  { %v121_v17 = vpop.f32.mrf.mxu0 }
  0xd9   :  { %140 = vst.msk [vmem:[#allocation2 + $0x18] sm:$0xff] %vm22_vm0, %v136_v16  ;;  %v134_v18 = vadd.f32 %v121_v17, %v28_v15 }
  0xdb   :  { %138 = vst.msk [vmem:[#allocation2 + $0x8] sm:$0xff] %vm22_vm0, %v134_v18 }
  0xdc   :  { %v146_v20 = vld [vmem:[#allocation2 + $0x10] sm:$0xff] }
  0xdd   :  { %v157_v22 = vadd.f32 %v183_v19, %v146_v20 }
  0xde   :  { %v144_v23 = vld [vmem:[#allocation2] sm:$0xff] }
  0xdf   :  { %v165_v25 = vadd.f32 %v161_v21, %v157_v22  ;;  %v155_v26 = vadd.f32 %v183_v19, %v144_v23 }
  0xe0   :  { %v147_v27 = vld [vmem:[#allocation2 + $0x18] sm:$0xff] }
  0xe1   :  { %169 = vst.msk [vmem:[%s298_s4 + $0x10] sm:$0xff] %vm22_vm0, %v165_v25  ;;  %v163_v29 = vadd.f32 %v159_v24, %v155_v26  ;;  %v158_v30 = vadd.f32 %v183_v19, %v147_v27 }
  0xe2   :  { %v145_v31 = vld [vmem:[#allocation2 + $0x8] sm:$0xff] }
  0xe3   :  { %167 = vst.msk [vmem:[%s298_s4] sm:$0xff] %vm22_vm0, %v163_v29  ;;  %v166_v33 = vadd.f32 %v162_v28, %v158_v30  ;;  %v156_v34 = vadd.f32 %v183_v19, %v145_v31 }
  0xe5   :  { %170 = vst.msk [vmem:[%s298_s4 + $0x18] sm:$0xff] %vm22_vm0, %v166_v33  ;;  %v164_v35 = vadd.f32 %v160_v32, %v156_v34 }
  0xe7   :  { %168 = vst.msk [vmem:[%s298_s4 + $0x8] sm:$0xff] %vm22_vm0, %v164_v35 }

// kernel: vit_forward.50
= control target key start
LH: loop header
LB: loop body
LE: loop exit
PB: predicated region body
PF: predicated region fallthrough
CT: control target
= control target key end

     0   :  { %vm19_vm0 = vcmask 261120   ;;  %v199_v1 = vmov 0.0   ;;  %vm74_vm1 = vcmask 523264   ;;  %s265_s1 = inlined_call_operand.vmem [shape: bf16[64,32], index: 1, kind: input, shape index: {}]   ;;  %s266_s0 = inlined_call_operand.vmem [shape: bf16[32,64], index: 0, kind: input, shape index: {}]   ;;  %s267_s2 = inlined_call_operand.vmem [shape: f32[1,32], index: 2, kind: input, shape index: {}]   ;;  %s268_s3 = inlined_call_operand.vmem [shape: f32[32,32], index: 3, kind: output, shape index: {}]  }
   0x1   :  { %v193_v0 = vld [vmem:[%s265_s1 + $0x18] sm:$0xff]   ;;  %22 = vst.msk [vmem:[#allocation2 + $0x10] sm:$0xff] %vm19_vm0, %v199_v1  ;;  %20 = vst.msk [vmem:[#allocation2] sm:$0xff] %vm19_vm0, %v199_v1  ;;  %v194_v2 = vld [vmem:[%s265_s1 + $0x10] sm:$0xff]  }
   0x2   :  { %21 = vst.msk [vmem:[#allocation2 + $0x8] sm:$0xff] %vm19_vm0, %v199_v1  ;;  %23 = vst.msk [vmem:[#allocation2 + $0x18] sm:$0xff] %vm19_vm0, %v199_v1  ;;  %180 = vmatprep.subr.bf16.mxu0 %v193_v0  ;;  %v195_v3 = vld [vmem:[%s265_s1 + $0x8] sm:$0xff]   ;;  %v197_v4 = vld [vmem:[%s266_s0] sm:$0xff]  }
   0x3   :  { %181 = vmatpush3.bf16.msra.mxu0 %v193_v0  ;;  %188 = vmatprep.mubr.msk.bf16.mxu0 %vm74_vm1, %v197_v4  ;;  %v196_v5 = vld [vmem:[%s265_s1] sm:$0xff]   ;;  %v198_v6 = vld [vmem:[%s266_s0 + $0x8] sm:$0xff]  }
   0x4   :  { %182 = vmatprep.subr.bf16.mxu0 %v194_v2  ;;  %v173_v19 = vld [vmem:[%s267_s2] ss:$0 sm:$0xff] }
   0x7   :  { %183 = vmatpush3.bf16.msra.mxu0 %v194_v2 }
   0x8   :  { %184 = vmatprep.subr.bf16.mxu0 %v195_v3  ;;  %v26_v7 = vld [vmem:[#allocation2 + $0x10] sm:$0xff]  ;;  %v24_v9 = vld [vmem:[#allocation2] sm:$0xff] }
   0x9   :  { %v27_v12 = vld [vmem:[#allocation2 + $0x18] sm:$0xff]  ;;  %v25_v15 = vld [vmem:[#allocation2 + $0x8] sm:$0xff] }
   0xb   :  { %185 = vmatpush3.bf16.msra.mxu0 %v195_v3 }
   0xc   :  { %186 = vmatprep.subr.bf16.mxu0 %v196_v5 }
   0xf   :  { %187 = vmatpush3.bf16.msra.mxu0 %v196_v5 }
  0x12   :  { %189 = vmatmul.mubr.msk.bf16.vlgmr.msra.gmra.mxu0 %vm74_vm1, %v198_v6 }
  0xd2   :  { %v190_v8 = vpop.f32.mrf.mxu0 }
  0xd3   :  { %v132_v10 = vadd.f32 %v190_v8, %v26_v7 }
  0xd4   :  { %v115_v11 = vpop.f32.mrf.mxu0 }
  0xd5   :  { %137 = vst.msk [vmem:[#allocation2 + $0x10] sm:$0xff] %vm19_vm0, %v132_v10  ;;  %v130_v13 = vadd.f32 %v115_v11, %v24_v9 }
  0xd6   :  { %v191_v14 = vpop.f32.mrf.mxu0 }
  0xd7   :  { %135 = vst.msk [vmem:[#allocation2] sm:$0xff] %vm19_vm0, %v130_v13  ;;  %v133_v16 = vadd.f32 %v191_v14, %v27_v12 }
  0xd8   :  { %v118_v17 = vpop.f32.mrf.mxu0 }
  0xd9   :  { %138 = vst.msk [vmem:[#allocation2 + $0x18] sm:$0xff] %vm19_vm0, %v133_v16  ;;  %v131_v18 = vadd.f32 %v118_v17, %v25_v15 }
  0xdb   :  { %136 = vst.msk [vmem:[#allocation2 + $0x8] sm:$0xff] %vm19_vm0, %v131_v18 }
  0xdc   :  { %v144_v20 = vld [vmem:[#allocation2 + $0x10] sm:$0xff] }
  0xdd   :  { %v155_v21 = vadd.f32 %v173_v19, %v144_v20 }
  0xde   :  { %v142_v22 = vld [vmem:[#allocation2] sm:$0xff] }
  0xdf   :  { %159 = vst.msk [vmem:[%s268_s3 + $0x10] sm:$0xff] %vm19_vm0, %v155_v21  ;;  %v153_v23 = vadd.f32 %v173_v19, %v142_v22 }
  0xe0   :  { %v145_v24 = vld [vmem:[#allocation2 + $0x18] sm:$0xff] }
  0xe1   :  { %157 = vst.msk [vmem:[%s268_s3] sm:$0xff] %vm19_vm0, %v153_v23  ;;  %v156_v25 = vadd.f32 %v173_v19, %v145_v24 }
  0xe2   :  { %v143_v26 = vld [vmem:[#allocation2 + $0x8] sm:$0xff] }
  0xe3   :  { %160 = vst.msk [vmem:[%s268_s3 + $0x18] sm:$0xff] %vm19_vm0, %v156_v25  ;;  %v154_v27 = vadd.f32 %v173_v19, %v143_v26 }
  0xe5   :  { %158 = vst.msk [vmem:[%s268_s3 + $0x8] sm:$0xff] %vm19_vm0, %v154_v27 }

// kernel: vit_forward.51
= control target key start
LH: loop header
LB: loop body
LE: loop exit
PB: predicated region body
PF: predicated region fallthrough
CT: control target
= control target key end

     0   :  { %vm18_vm0 = vcmask 261120   ;;  %s174_s0 = inlined_call_operand.vmem [shape: f32[32,32], index: 0, kind: input, shape index: {}]   ;;  %s175_s1 = inlined_call_operand.vmem [shape: f32[1,32], index: 1, kind: input, shape index: {}]   ;;  %s176_s2 = inlined_call_operand.vmem [shape: f32[1,32], index: 2, kind: input, shape index: {}]   ;;  %s177_s3 = inlined_call_operand.vmem [shape: f32[32,32], index: 3, kind: output, shape index: {}]  }
   0x1   :  { %v14_v0 = vld [vmem:[%s174_s0] sm:$0xff]  ;;  %v16_v1 = vld [vmem:[%s174_s0 + $0x10] sm:$0xff]  ;;  %v15_v2 = vld [vmem:[%s174_s0 + $0x8] sm:$0xff] }
   0x2   :  { %v19_v3 = vsel %vm18_vm0, %v14_v0, 0.0  ;;  %v25_v4 = vsel %vm18_vm0, %v16_v1, 0.0  ;;  %v17_v5 = vld [vmem:[%s174_s0 + $0x18] sm:$0xff]  ;;  %v22_v6 = vsel %vm18_vm0, %v15_v2, 0.0  ;;  %v102_v41 = vld [vmem:[%s175_s1] ss:$0 sm:$0xff] }
   0x3   :  { %20 = vadd.xlane.f32.xlu0 %v19_v3  ;;  %26 = vadd.xlane.f32.xlu1 %v25_v4  ;;  %v28_v7 = vsel %vm18_vm0, %v17_v5, 0.0  ;;  %v103_v43 = vld [vmem:[%s176_s2] ss:$0 sm:$0xff] }
   0x7   :  { %23 = vadd.xlane.f32.xlu0 %v22_v6  ;;  %29 = vadd.xlane.f32.xlu1 %v28_v7 }
  0x8c   :  { %v21_v8 = vpop.xlane.xlu0 %20  ;;  %v27_v9 = vpop.xlane.xlu1 %26 }
  0x8d   :  { %v32_v10 = vmul.f32 0.03125, %v21_v8  ;;  %v34_v11 = vmul.f32 0.03125, %v27_v9 }
  0x8f   :  { %v36_v12 = vsub.f32 %v14_v0, %v32_v10  ;;  %v38_v13 = vsub.f32 %v16_v1, %v34_v11 }
  0x90   :  { %v24_v14 = vpop.xlane.xlu0 %23  ;;  %v30_v15 = vpop.xlane.xlu1 %29 }
  0x91   :  { %v33_v16 = vmul.f32 0.03125, %v24_v14  ;;  %v35_v17 = vmul.f32 0.03125, %v30_v15  ;;  %v40_v18 = vmul.f32 %v36_v12, %v36_v12  ;;  %v42_v19 = vmul.f32 %v38_v13, %v38_v13 }
  0x93   :  { %v37_v20 = vsub.f32 %v15_v2, %v33_v16  ;;  %v39_v21 = vsub.f32 %v17_v5, %v35_v17  ;;  %v44_v22 = vsel %vm18_vm0, %v40_v18, 0.0  ;;  %v50_v23 = vsel %vm18_vm0, %v42_v19, 0.0 }
  0x94   :  { %45 = vadd.xlane.f32.xlu0 %v44_v22 }
  0x95   :  { %v41_v24 = vmul.f32 %v37_v20, %v37_v20  ;;  %v43_v25 = vmul.f32 %v39_v21, %v39_v21 }
  0x97   :  { %v47_v26 = vsel %vm18_vm0, %v41_v24, 0.0  ;;  %v53_v27 = vsel %vm18_vm0, %v43_v25, 0.0 }
  0x98   :  { %51 = vadd.xlane.f32.xlu0 %v50_v23  ;;  %48 = vadd.xlane.f32.xlu1 %v47_v26 }
  0x9c   :  { %54 = vadd.xlane.f32.xlu1 %v53_v27 }
 0x11d   :  { %v46_v28 = vpop.xlane.xlu0 %45 }
 0x11e   :  { %v56_v29 = vmul.f32 0.03125, %v46_v28 }
 0x120   :  { %v60_v30 = vadd.f32 1e-06, %v56_v29 }
 0x121   :  { %v49_v31 = vpop.xlane.xlu1 %48  ;;  %v52_v32 = vpop.xlane.xlu0 %51 }
 0x122   :  { %104 = vrsqrt.f32 %v60_v30  ;;  %v57_v33 = vmul.f32 0.03125, %v49_v31  ;;  %v58_v34 = vmul.f32 0.03125, %v52_v32 }
 0x124   :  { %v61_v35 = vadd.f32 1e-06, %v57_v33  ;;  %v62_v36 = vadd.f32 1e-06, %v58_v34 }
 0x125   :  { %v55_v37 = vpop.xlane.xlu1 %54 }
 0x126   :  { %106 = vrsqrt.f32 %v61_v35  ;;  %v59_v38 = vmul.f32 0.03125, %v55_v37 }
 0x127   :  { %108 = vrsqrt.f32 %v62_v36 }
 0x128   :  { %v63_v39 = vadd.f32 1e-06, %v59_v38 }
 0x12a   :  { %110 = vrsqrt.f32 %v63_v39 }
 0x12f   :  { %v105_v40 = vpop.eup %104 }
 0x130   :  { %v68_v42 = vmul.f32 %v105_v40, %v36_v12 }
 0x132   :  { %v79_v44 = vmul.f32 %v102_v41, %v68_v42 }
 0x133   :  { %v107_v45 = vpop.eup %106 }
 0x134   :  { %v109_v46 = vpop.eup %108  ;;  %v90_v47 = vadd.f32 %v103_v43, %v79_v44  ;;  %v69_v48 = vmul.f32 %v107_v45, %v37_v20 }
 0x135   :  { %v70_v49 = vmul.f32 %v109_v46, %v38_v13 }
 0x136   :  { %94 = vst.msk [vmem:[%s177_s3] sm:$0xff] %vm18_vm0, %v90_v47  ;;  %v80_v50 = vmul.f32 %v102_v41, %v69_v48 }
 0x137   :  { %v111_v51 = vpop.eup %110  ;;  %v81_v52 = vmul.f32 %v102_v41, %v70_v49 }
 0x138   :  { %v91_v53 = vadd.f32 %v103_v43, %v80_v50  ;;  %v71_v54 = vmul.f32 %v111_v51, %v39_v21 }
 0x139   :  { %v92_v55 = vadd.f32 %v103_v43, %v81_v52 }
 0x13a   :  { %95 = vst.msk [vmem:[%s177_s3 + $0x8] sm:$0xff] %vm18_vm0, %v91_v53  ;;  %v82_v56 = vmul.f32 %v102_v41, %v71_v54 }
 0x13b   :  { %96 = vst.msk [vmem:[%s177_s3 + $0x10] sm:$0xff] %vm18_vm0, %v92_v55 }
 0x13c   :  { %v93_v57 = vadd.f32 %v103_v43, %v82_v56 }
 0x13e   :  { %97 = vst.msk [vmem:[%s177_s3 + $0x18] sm:$0xff] %vm18_vm0, %v93_v57 }

// kernel: vit_forward.52
= control target key start
LH: loop header
LB: loop body
LE: loop exit
PB: predicated region body
PF: predicated region fallthrough
CT: control target
= control target key end

     0   :  { %s1321_s9 = smov 0   ;;  %s1622_s0 = inlined_call_operand.vmem [shape: bf16[2,6,6,32], index: 0, kind: input, shape index: {}]   ;;  %s1623_s1 = inlined_call_operand.vmem [shape: bf16[9,32,32], index: 1, kind: input, shape index: {}]   ;;  %s1624_s2 = inlined_call_operand.vmem [shape: f32[2,4,4,32], index: 2, kind: output, shape index: {}]  }
   0x1 LB: > { %s1085_s10 = sadd.s32 4294967295, %s1301_s9   ;;  %p1089_p0 = scmp.ge.s32.totalorder %s1301_s9, 1  ;;  %s1301_s9 = sphi %s1321_s9, %s12_s9  }
   0x2   : > { %p112_p1 = scmp.lt.s32.totalorder %s1301_s9, 3 }
   0x4   : > { %p113_p2 = pnand %p1089_p0, %p112_p1 }
   0x5   : > { %p134_p3 = scmp.lt.s32.totalorder (!%p113_p2), %s1085_s10, 1 }
   0x6   : > { %116 = sbr.rel (%p113_p2) target bundleno = 276 (0x114), region = 28 }
   0xb   : > { %v1272_v0 = vld [vmem:[%s1623_s1 + $0x18] sm:$0xff]   ;;  %v1303_v1 = vmov 0.0   ;;  %v1273_v2 = vld [vmem:[%s1623_s1 + $0x8] sm:$0xff]   ;;  %v162_v3 = vlaneseq  ;;  %v1274_v4 = vld [vmem:[%s1623_s1 + $0x10] sm:$0xff]   ;;  %vm1304_vm0 = vmmov 0   ;;  %s1630_s10 = smov (!%p134_p3, %s1085_s10), 1 }
   0xc   : > { %1188 = vmatprep.subr.bf16.mxu0 %v1303_v1  ;;  %1196 = vmatprep.subr.bf16.mxu1 %v1303_v1  ;;  %v1275_v5 = vld [vmem:[%s1623_s1] sm:$0xff]   ;;  %v1305_v6 = vmov 1983009808   ;;  %s1260_s19 = smul.u32 24, %s1630_s10  ;;  %vm191_vm1 = vsmask.f32 1280 }
   0xd   : > { %1189 = vmatpush3.bf16.msra.mxu0 %v1272_v0  ;;  %1192 = vmatprep.mubr.msk.bf16.mxu0 %vm1304_vm0, %v1303_v1  ;;  %v160_v7 = vunpack.c.l.s4 %v1305_v6  ;;  %v163_v8 = vshrl.u32 %v162_v3, 7  ;;  %vm192_vm2 = vsmask.f32 3336  ;;  %vm194_vm3 = vsmask.f32 5392  ;;  %s1160_s25 = sshll.u32 %s1630_s10, 4 }
   0xe   : > { %1197 = vmatpush3.bf16.msra.mxu1 %v1273_v2  ;;  %1190 = vmatprep.subr.bf16.mxu0 %v1303_v1  ;;  %s138_s22 = scalar_lea.vmem %s1622_s0, %s1260_s19  ;;  %vm196_vm4 = vsmask.f32 7448  ;;  %vm406_vm5 = vcmask 1040384   ;;  %vm407_vm6 = vcmask 1042434   ;;  %vm193_vm7 = vmor %vm191_vm1, %vm192_vm2  ;;  %vm409_vm8 = vcmask 1044484   ;;  %s143_s28 = scalar_lea.vmem %s1624_s2, %s1160_s25 }
   0xf   : > { %1198 = vmatprep.subr.bf16.mxu1 %v1303_v1  ;;  %1200 = vmatprep.mubr.msk.bf16.mxu1 %vm1304_vm0, %v1303_v1  ;;  %v161_v9 = vunpack.c.0.s8 %v160_v7  ;;  %v1357_v10 = vld [vmem:[%s138_s22] sm:$0x7]  ;;  %v1359_v11 = vld [vmem:[%s138_s22 + $0x4] sm:$0x7]  ;;  %v1361_v12 = vld [vmem:[%s138_s22 + $0x8] sm:$0x7] }
  0x10   : > { %v1365_v14 = vld [vmem:[%s138_s22 + $0xc] sm:$0x7]  ;;  %v1367_v15 = vld [vmem:[%s138_s22 + $0x10] sm:$0x7]  ;;  %v333_v21 = vcombine.low %v1357_v10, %v1359_v11  ;;  %v1409_v26 = vld [vmem:[%s138_s22 + $0x14] sm:$0x7] }
  0x11   : > { %1191 = vmatpush3.bf16.msra.mxu0 %v1274_v4  ;;  %v1363_v13 = vsub.s32 %v161_v9, %v163_v8  ;;  %vm195_vm9 = vmor %vm193_vm7, %vm194_vm3  ;;  %vm288_vm11 = vcmask 261120   ;;  %v334_v55 = vcombine.low %v1361_v12, %v1365_v14  ;;  %vm411_vm13 = vcmask 1046534  }
  0x12   : > { %1199 = vmatpush3.bf16.msra.mxu1 %v1275_v5  ;;  %1204 = vmatprep.subr.bf16.mxu0 %v1303_v1  ;;  %vm1423_vm10 = vmor %vm195_vm9, %vm196_vm4 }
  0x13   : > { %1212 = vmatprep.subr.bf16.mxu1 %v1303_v1  ;;  %v1371_v16 = vrot.slane %v1357_v10, %v1363_v13  ;;  %v1375_v17 = vrot.slane %v1359_v11, %v1363_v13  ;;  %v1379_v18 = vrot.slane %v1361_v12, %v1363_v13  ;;  %v1383_v19 = vrot.slane %v1365_v14, %v1363_v13  ;;  %vm408_vm12 = vmor %vm406_vm5, %vm407_vm6 }
  0x14   : > { %v1387_v20 = vrot.slane %v1367_v15, %v1363_v13  ;;  %v1431_v51 = vrot.slane %v1409_v26, %v1363_v13  ;;  %v341_v6 = vrot.slane %v333_v21, %v1363_v13  ;;  %vm410_vm14 = vmor %vm408_vm12, %vm409_vm8  ;;  %v1464_v21 = vrot.slane %v334_v55, %v1363_v13 }
  0x15   : > { %v1393_v22 = vcombine.high %v1371_v16, %v1371_v16  ;;  %v1397_v23 = vcombine.high %v1375_v17, %v1375_v17  ;;  %v1401_v24 = vcombine.high %v1379_v18, %v1379_v18  ;;  %v1405_v25 = vcombine.high %v1383_v19, %v1383_v19  ;;  %vm1479_vm15 = vmor %vm410_vm14, %vm411_vm13 }
  0x16   : > { %v199_v27 = vshrl.u32 %v1371_v16, 16  ;;  %v202_v28 = vshll.u32 %v1371_v16, 16  ;;  %v213_v29 = vshrl.u32 %v1375_v17, 16  ;;  %v216_v30 = vshll.u32 %v1375_v17, 16 }
  0x17   : > { %v208_v31 = vshll.u32 %v1393_v22, 16  ;;  %v222_v32 = vshll.u32 %v1397_v23, 16  ;;  %v227_v33 = vshrl.u32 %v1379_v18, 16  ;;  %v230_v34 = vshll.u32 %v1379_v18, 16 }
  0x18   : > { %v201_v35 = vrot.slane %v199_v27, 6  ;;  %v204_v36 = vrot.slane %v202_v28, 7  ;;  %v215_v37 = vrot.slane %v213_v29, 6  ;;  %v218_v38 = vrot.slane %v216_v30, 7 }
  0x19   : > { %v210_v39 = vrot.slane %v208_v31, 7  ;;  %v224_v40 = vrot.slane %v222_v32, 7  ;;  %v229_v41 = vrot.slane %v227_v33, 6  ;;  %v232_v42 = vrot.slane %v230_v34, 7  ;;  %v1280_v33 = vld [vmem:[%s1623_s1 + $0x38] sm:$0xff]  }
  0x1a   : > { %v205_v43 = vor.u32 %v204_v36, %v201_v35  ;;  %v219_v44 = vor.u32 %v218_v38, %v215_v37  ;;  %v236_v45 = vshll.u32 %v1401_v24, 16  ;;  %v241_v46 = vshrl.u32 %v1383_v19, 16 }
  0x1b   : > { %v233_v48 = vor.u32 %v232_v42, %v229_v41  ;;  %v244_v49 = vshll.u32 %v1383_v19, 16  ;;  %v250_v50 = vshll.u32 %v1405_v25, 16  ;;  %v599_v59 = vshrl.u32 %v1387_v20, 16 }
  0x1c   : > { %v206_v52 = vrot.slane %v205_v43, 2  ;;  %v220_v53 = vrot.slane %v219_v44, 2  ;;  %v243_v54 = vrot.slane %v241_v46, 6  ;;  %v238_v57 = vrot.slane %v236_v45, 7 }
  0x1d   : > { %v234_v56 = vrot.slane %v233_v48, 2  ;;  %v246_v58 = vrot.slane %v244_v49, 7  ;;  %v1444_v62 = vcombine.high %v1387_v20, %v1387_v20  ;;  %v602_v63 = vshll.u32 %v1387_v20, 16 }
  0x1e   : > { %v211_v60 = vsel %vm1423_vm10, %v206_v52, %v210_v39  ;;  %v1440_v61 = vsel %vm1423_vm10, %v220_v53, %v224_v40  ;;  %v252_v2 = vrot.slane %v250_v50, 7  ;;  %v601_v3 = vrot.slane %v599_v59, 6 }
  0x1f   : > { %v247_v0 = vor.u32 %v246_v58, %v243_v54  ;;  %v259_v4 = vcombine.low %v211_v60, %v1440_v61  ;;  %v604_v5 = vrot.slane %v602_v63, 7  ;;  %v1453_v7 = vsel %vm1423_vm10, %v234_v56, %v238_v57  ;;  %v1286_v63 = vld [vmem:[%s1623_s1 + $0x58] sm:$0xff]  }
  0x20   : > { %v858_v9 = vshrl.u32 %v1431_v51, 16  ;;  %v861_v10 = vshll.u32 %v1431_v51, 16  ;;  %v608_v28 = vshll.u32 %v1444_v62, 16  ;;  %v1461_v29 = vcombine.high %v1431_v51, %v1431_v51 }
  0x21   : > { %v248_v8 = vrot.slane %v247_v0, 2  ;;  %v605_v27 = vor.u32 %v604_v5, %v601_v3  ;;  %v1103_v34 = vrot.slane %v1371_v16, 9  ;;  %v267_v36 = vrot.slane %v259_v4, %v1363_v13 }
  0x22   : > { %v860_v31 = vrot.slane %v858_v9, 6  ;;  %v863_v32 = vrot.slane %v861_v10, 7  ;;  %v349_v37 = vcombine.low %v341_v6, %v1464_v21  ;;  %v415_v39 = vrot.slane %v1393_v22, 7  ;;  %v1288_v10 = vld [vmem:[%s1623_s1 + $0x50] sm:$0xff]  }
  0x23   : > { %v1468_v30 = vsel %vm1423_vm10, %v248_v8, %v252_v2  ;;  %v1104_v40 = vrot.slane %v1375_v17, 9  ;;  %v515_v41 = vcombine.low %v1359_v11, %v1361_v12  ;;  %v867_v42 = vshll.u32 %v1461_v29, 16  ;;  %v1279_v17 = vld [vmem:[%s1623_s1 + $0x28] sm:$0xff]   ;;  %v1282_v11 = vld [vmem:[%s1623_s1 + $0x30] sm:$0xff]  }
  0x24   : > { %v260_v35 = vcombine.low %v1453_v7, %v1468_v30  ;;  %1201 = vmatmul.mubr.msk.bf16.vlgmr.msra.gmra.mxu1 %vm288_vm11, %v349_v37  ;;  %v419_v43 = vrot.slane %v1397_v23, 7  ;;  %v1105_v44 = vrot.slane %v1379_v18, 9  ;;  %v606_v45 = vrot.slane %v605_v27, 2  ;;  %v1289_v37 = vld [vmem:[%s1623_s1 + $0x68] sm:$0xff]  }
  0x25   : > { %v610_v46 = vrot.slane %v608_v28, 7  ;;  %v864_v48 = vor.u32 %v863_v32, %v860_v31  ;;  %1213 = vmatpush3.bf16.msra.mxu1 %v1280_v33  ;;  %1216 = vmatprep.mubr.msk.bf16.mxu1 %vm1304_vm0, %v1303_v1  ;;  %v416_v12 = vsel %vm1479_vm15, %v1103_v34, %v415_v39  ;;  %v423_v23 = vrot.slane %v1401_v24, 7  ;;  %v1287_v31 = vld [vmem:[%s1623_s1 + $0x40] sm:$0xff]   ;;  %v1290_v33 = vld [vmem:[%s1623_s1 + $0x78] sm:$0xff]  }
  0x26   : > { %v1488_v16 = vrot.slane %v260_v35, %v1363_v13  ;;  %1214 = vmatprep.subr.bf16.mxu1 %v1303_v1  ;;  %v420_v22 = vsel %vm1479_vm15, %v1104_v40, %v419_v43  ;;  %v1106_v49 = vrot.slane %v1383_v19, 9  ;;  %v427_v50 = vrot.slane %v1405_v25, 7  ;;  %v1281_v19 = vld [vmem:[%s1623_s1 + $0x20] sm:$0xff]  }
  0x27   : > { %v434_v52 = vcombine.low %v416_v12, %v420_v22  ;;  %v516_v53 = vcombine.low %v1365_v14, %v1367_v15  ;;  %v869_v54 = vrot.slane %v867_v42, 7  ;;  %v424_v55 = vsel %vm1479_vm15, %v1105_v44, %v423_v23  ;;  %v1294_v44 = vld [vmem:[%s1623_s1 + $0x80] sm:$0xff]  }
  0x28   : > { %v275_v18 = vcombine.low %v267_v36, %v1488_v16  ;;  %v523_v56 = vrot.slane %v515_v41, %v1363_v13  ;;  %v611_v57 = vsel %vm1423_vm10, %v606_v45, %v610_v46  ;;  %v428_v14 = vsel %vm1479_vm15, %v1106_v49, %v427_v50 }
  0x29   : > { %1215 = vmatpush3.bf16.msra.mxu1 %v1282_v11  ;;  %v530_v24 = vrot.slane %v516_v53, %v1363_v13  ;;  %v1128_v25 = vrot.slane %v1387_v20, 9  ;;  %v865_v58 = vrot.slane %v864_v48, 2  ;;  %v435_v59 = vcombine.low %v424_v55, %v428_v14 }
  0x2a   : > { %1193 = vmatmul.mubr.msk.bf16.vlgmr.msra.gmra.mxu0 %vm288_vm11, %v275_v18  ;;  %v442_v60 = vrot.slane %v434_v52, %v1363_v13  ;;  %v694_v0 = vrot.slane %v1444_v62, 7  ;;  %1228 = vmatprep.subr.bf16.mxu1 %v1303_v1  ;;  %v701_v3 = vcombine.low %v420_v22, %v424_v55  ;;  %v617_v20 = vcombine.low %v1440_v61, %v1453_v7  ;;  %v1285_v62 = vld [vmem:[%s1623_s1 + $0x48] sm:$0xff]  }
  0x2b   : > { %1205 = vmatpush3.bf16.msra.mxu0 %v1279_v17  ;;  %1208 = vmatprep.mubr.msk.bf16.mxu0 %vm1304_vm0, %v1303_v1  ;;  %v531_v2 = vcombine.low %v523_v56, %v530_v24  ;;  %v618_v4 = vcombine.low %v1468_v30, %v611_v57  ;;  %v1539_v5 = vrot.slane %v435_v59, %v1363_v13  ;;  %v1150_v39 = vrot.slane %v1431_v51, 9 }
  0x2c   : > { %1206 = vmatprep.subr.bf16.mxu0 %v1303_v1  ;;  %v695_v6 = vsel %vm1479_vm15, %v1128_v25, %v694_v0  ;;  %v709_v9 = vrot.slane %v701_v3, %v1363_v13  ;;  %v870_v61 = vsel %vm1423_vm10, %v865_v58, %v869_v54  ;;  %v625_v47 = vrot.slane %v617_v20, %v1363_v13 }
  0x2d   : > { %1217 = vmatmul.mubr.msk.bf16.vlgmr.msra.gmra.mxu1 %vm288_vm11, %v531_v2  ;;  %v702_v8 = vcombine.low %v428_v14, %v695_v6  ;;  %v450_v7 = vcombine.low %v442_v60, %v1539_v5  ;;  %v632_v28 = vrot.slane %v618_v4, %v1363_v13  ;;  %v876_v30 = vcombine.low %v611_v57, %v870_v61 }
  0x2e   : > { %1229 = vmatpush3.bf16.msra.mxu1 %v1286_v63  ;;  %1232 = vmatprep.mubr.msk.bf16.mxu1 %vm1304_vm0, %v1303_v1  ;;  %v782_v34 = vcombine.low %v1367_v15, %v1409_v26  ;;  %v945_v40 = vrot.slane %v1461_v29, 7  ;;  %v1292_v15 = vld [vmem:[%s1623_s1 + $0x70] sm:$0xff]   ;;  %v1291_v29 = vld [vmem:[%s1623_s1 + $0x60] sm:$0xff]  }
  0x2f   : > { %1207 = vmatpush3.bf16.msra.mxu0 %v1281_v19  ;;  %1230 = vmatprep.subr.bf16.mxu1 %v1303_v1  ;;  %v716_v27 = vrot.slane %v702_v8, %v1363_v13  ;;  %v633_v35 = vcombine.low %v625_v47, %v632_v28  ;;  %v883_v36 = vrot.slane %v876_v30, %v1363_v13 }
  0x30   : > { %1220 = vmatprep.subr.bf16.mxu0 %v1303_v1  ;;  %v789_v26 = vrot.slane %v782_v34, %v1363_v13  ;;  %v946_v41 = vsel %vm1479_vm15, %v1150_v39, %v945_v40 }
  0x31   : > { %v717_v32 = vcombine.low %v709_v9, %v716_v27  ;;  %v884_v51 = vcombine.low %v1488_v16, %v883_v36  ;;  %v952_v43 = vcombine.low %v695_v6, %v946_v41  ;;  %v1293_v16 = vld [vmem:[%s1623_s1 + $0x88] sm:$0xff]  }
  0x32   : > { %1209 = vmatmul.mubr.msk.bf16.vlgmr.msra.gmra.mxu0 %vm288_vm11, %v450_v7  ;;  %1231 = vmatpush3.bf16.msra.mxu1 %v1288_v10  ;;  %v790_v42 = vcombine.low %v1464_v21, %v789_v26 }
  0x33   : > { %1221 = vmatpush3.bf16.msra.mxu0 %v1285_v62  ;;  %1224 = vmatprep.mubr.msk.bf16.mxu0 %vm1304_vm0, %v1303_v1  ;;  %v959_v38 = vrot.slane %v952_v43, %v1363_v13 }
  0x34   : > { %1222 = vmatprep.subr.bf16.mxu0 %v1303_v1  ;;  %1244 = vmatprep.subr.bf16.mxu1 %v1303_v1 }
  0x35   : > { %1233 = vmatmul.mubr.msk.bf16.vlgmr.msra.gmra.mxu1 %vm288_vm11, %v717_v32  ;;  %v960_v21 = vcombine.low %v1539_v5, %v959_v38 }
  0x36   : > { %1245 = vmatpush3.bf16.msra.mxu1 %v1290_v33  ;;  %1248 = vmatprep.mubr.msk.bf16.mxu1 %vm1304_vm0, %v1303_v1 }
  0x37   : > { %1223 = vmatpush3.bf16.msra.mxu0 %v1287_v31  ;;  %1246 = vmatprep.subr.bf16.mxu1 %v1303_v1 }
  0x38   : > { %1236 = vmatprep.subr.bf16.mxu0 %v1303_v1 }
  0x3a   : > { %1225 = vmatmul.mubr.msk.bf16.vlgmr.msra.gmra.mxu0 %vm288_vm11, %v633_v35  ;;  %1247 = vmatpush3.bf16.msra.mxu1 %v1292_v15 }
  0x3b   : > { %1237 = vmatpush3.bf16.msra.mxu0 %v1289_v37  ;;  %1240 = vmatprep.mubr.msk.bf16.mxu0 %vm1304_vm0, %v1303_v1 }
  0x3c   : > { %1238 = vmatprep.subr.bf16.mxu0 %v1303_v1 }
  0x3d   : > { %1249 = vmatmul.mubr.msk.bf16.vlgmr.msra.gmra.mxu1 %vm288_vm11, %v884_v51 }
  0x3f   : > { %1239 = vmatpush3.bf16.msra.mxu0 %v1291_v29 }
  0x40   : > { %1252 = vmatprep.subr.bf16.mxu0 %v1303_v1 }
  0x42   : > { %1241 = vmatmul.mubr.msk.bf16.vlgmr.msra.gmra.mxu0 %vm288_vm11, %v790_v42 }
  0x43   : > { %1253 = vmatpush3.bf16.msra.mxu0 %v1293_v16  ;;  %1256 = vmatprep.mubr.msk.bf16.mxu0 %vm1304_vm0, %v1303_v1  ;;  %vm1025_vm0 = vcmask 257024  }
  0x44   : > { %1254 = vmatprep.subr.bf16.mxu0 %v1303_v1 }
  0x47   : > { %1255 = vmatpush3.bf16.msra.mxu0 %v1294_v44 }
  0x4a   : > { %1257 = vmatmul.mubr.msk.bf16.vlgmr.msra.gmra.mxu0 %vm288_vm11, %v960_v21 }
  0xe4   : > { %v399_v45 = vpop.f32.mrf.mxu1 }
  0xe6   : > { %v1202_v46 = vpop.f32.mrf.mxu1 }
  0xe8   : > { %v402_v17 = vpop.f32.mrf.mxu1 }
  0xea   : > { %v326_v48 = vpop.f32.mrf.mxu0  ;;  %v1203_v11 = vpop.f32.mrf.mxu1 }
  0xeb   : > { %v400_v54 = vadd.f32 %v399_v45, %v326_v48 }
  0xec   : > { %v1194_v13 = vpop.f32.mrf.mxu0 }
  0xed   : > { %v581_v18 = vpop.f32.mrf.mxu1 }
  0xee   : > { %v329_v12 = vpop.f32.mrf.mxu0 }
  0xef   : > { %v1218_v23 = vpop.f32.mrf.mxu1  ;;  %v403_v24 = vadd.f32 %v402_v17, %v329_v12 }
  0xf0   : > { %v1195_v22 = vpop.f32.mrf.mxu0 }
  0xf1   : > { %v584_v50 = vpop.f32.mrf.mxu1 }
  0xf2   : > { %v500_v49 = vpop.f32.mrf.mxu0 }
  0xf3   : > { %v1219_v53 = vpop.f32.mrf.mxu1  ;;  %v507_v57 = vadd.f32 %v500_v49, %v400_v54 }
  0xf4   : > { %v1210_v52 = vpop.f32.mrf.mxu0 }
  0xf5   : > { %v767_v55 = vpop.f32.mrf.mxu1  ;;  %v588_v59 = vadd.f32 %v581_v18, %v507_v57 }
  0xf6   : > { %v503_v1 = vpop.f32.mrf.mxu0 }
  0xf7   : > { %v1234_v19 = vpop.f32.mrf.mxu1  ;;  %v508_v60 = vadd.f32 %v503_v1, %v403_v24 }
  0xf8   : > { %v1211_v56 = vpop.f32.mrf.mxu0 }
  0xf9   : > { %v770_v25 = vpop.f32.mrf.mxu1  ;;  %v589_v4 = vadd.f32 %v584_v50, %v508_v60 }
  0xfa   : > { %v683_v14 = vpop.f32.mrf.mxu0 }
  0xfb   : > { %v1235_v63 = vpop.f32.mrf.mxu1  ;;  %v690_v2 = vadd.f32 %v683_v14, %v588_v59 }
  0xfc   : > { %v1226_v58 = vpop.f32.mrf.mxu0 }
  0xfd   : > { %v934_v3 = vpop.f32.mrf.mxu1  ;;  %v774_v62 = vadd.f32 %v767_v55, %v690_v2 }
  0xfe   : > { %v686_v0 = vpop.f32.mrf.mxu0 }
  0xff   : > { %v1250_v5 = vpop.f32.mrf.mxu1  ;;  %v691_v8 = vadd.f32 %v686_v0, %v589_v4 }
 0x100   : > { %v1227_v20 = vpop.f32.mrf.mxu0 }
 0x101   : > { %v937_v9 = vpop.f32.mrf.mxu1  ;;  %v775_v47 = vadd.f32 %v770_v25, %v691_v8 }
 0x102   : > { %v840_v6 = vpop.f32.mrf.mxu0 }
 0x103   : > { %v847_v7 = vadd.f32 %v840_v6, %v774_v62  ;;  %v1251_v10 = vpop.f32.mrf.mxu1 }
 0x104   : > { %v1242_v61 = vpop.f32.mrf.mxu0 }
 0x105   : > { %v941_v30 = vadd.f32 %v934_v3, %v847_v7 }
 0x106   : > { %v843_v27 = vpop.f32.mrf.mxu0 }
 0x107   : > { %v848_v31 = vadd.f32 %v843_v27, %v775_v47 }
 0x108   : > { %v1243_v28 = vpop.f32.mrf.mxu0 }
 0x109   : > { %v942_v35 = vadd.f32 %v937_v9, %v848_v31 }
 0x10a   : > { %v1010_v32 = vpop.f32.mrf.mxu0 }
 0x10b   : > { %v1017_v33 = vadd.f32 %v1010_v32, %v941_v30 }
 0x10c   : > { %v1258_v34 = vpop.f32.mrf.mxu0 }
 0x10d   : > { %v1021_v36 = vcombine.high %v1017_v33, %v1017_v33  ;;  %1026 = vst.msk [vmem:[%s143_s28] sm:$0xf] %vm1025_vm0, %v1017_v33 }
 0x10e   : > { %v1013_v37 = vpop.f32.mrf.mxu0 }
 0x10f   : > { %1027 = vst.msk [vmem:[%s143_s28 + $0x4] sm:$0xf] %vm1025_vm0, %v1021_v36  ;;  %v1018_v39 = vadd.f32 %v1013_v37, %v942_v35 }
 0x110   : > { %v1259_v40 = vpop.f32.mrf.mxu0 }
 0x111   : > { %v1022_v15 = vcombine.high %v1018_v39, %v1018_v39  ;;  %1028 = vst.msk [vmem:[%s143_s28 + $0x8] sm:$0xf] %vm1025_vm0, %v1018_v39 }
 0x113   : > { %1029 = vst.msk [vmem:[%s143_s28 + $0xc] sm:$0xf] %vm1025_vm0, %v1022_v15 }
 0x114 PF: > { %s12_s9 = sadd.s32 1, %s1301_s9  }
 0x115   : > { %p9_p4 = scmp.ge.s32.totalorder %s12_s9, 4  }
 0x117   :  { %11 = sbr.rel (!%p9_p4) target bundleno = 1 (0x1), region = 66 }

// kernel: vit_forward.55
= control target key start
LH: loop header
LB: loop body
LE: loop exit
PB: predicated region body
PF: predicated region fallthrough
CT: control target
= control target key end

     0   :  { %vm57_vm0 = vcmask 261120   ;;  %s217_s1 = inlined_call_operand.vmem [shape: bf16[32,128], index: 1, kind: input, shape index: {}]   ;;  %s218_s0 = inlined_call_operand.vmem [shape: bf16[32,32], index: 0, kind: input, shape index: {}]   ;;  %s219_s2 = inlined_call_operand.vmem [shape: f32[1,128], index: 2, kind: input, shape index: {}]   ;;  %s220_s3 = inlined_call_operand.vmem [shape: f32[32,128], index: 3, kind: output, shape index: {}]  }
   0x1   :  { %v166_v0 = vld [vmem:[%s217_s1 + $0x8] sm:$0xff]   ;;  %v167_v1 = vld [vmem:[%s217_s1] sm:$0xff]  }
   0x2   :  { %158 = vmatprep.subr.bf16.mxu0 %v166_v0  ;;  %v168_v2 = vld [vmem:[%s218_s0] sm:$0xff]   ;;  %v169_v3 = vld [vmem:[%s218_s0 + $0x8] sm:$0xff]  }
   0x3   :  { %159 = vmatpush3.bf16.msra.mxu0 %v166_v0  ;;  %162 = vmatprep.mubr.msk.bf16.mxu0 %vm57_vm0, %v168_v2  ;;  %v153_v4 = vld [vmem:[%s219_s2] ss:$0 sm:$0xff] }
   0x4   :  { %160 = vmatprep.subr.bf16.mxu0 %v167_v1 }
   0x7   :  { %161 = vmatpush3.bf16.msra.mxu0 %v167_v1 }
   0xa   :  { %163 = vmatmul.mubr.msk.bf16.vlgmr.msra.gmra.mxu0 %vm57_vm0, %v169_v3 }
  0xca   :  { %v164_v5 = vpop.f32.mrf.mxu0 }
  0xcb   :  { %v137_v6 = vadd.f32 %v164_v5, %v153_v4 }
  0xcc   :  { %v98_v7 = vpop.f32.mrf.mxu0 }
  0xcd   :  { %141 = vst [vmem:[%s220_s3 + $0x10] sm:$0xff] %v137_v6  ;;  %v135_v8 = vadd.f32 %v153_v4, %v98_v7 }
  0xce   :  { %v165_v9 = vpop.f32.mrf.mxu0 }
  0xcf   :  { %139 = vst [vmem:[%s220_s3] sm:$0xff] %v135_v8  ;;  %v138_v10 = vadd.f32 %v165_v9, %v153_v4 }
  0xd0   :  { %v101_v11 = vpop.f32.mrf.mxu0 }
  0xd1   :  { %142 = vst [vmem:[%s220_s3 + $0x18] sm:$0xff] %v138_v10  ;;  %v136_v12 = vadd.f32 %v153_v4, %v101_v11 }
  0xd3   :  { %140 = vst [vmem:[%s220_s3 + $0x8] sm:$0xff] %v136_v12 }

// kernel: vit_forward.56
= control target key start
LH: loop header
LB: loop body
LE: loop exit
PB: predicated region body
PF: predicated region fallthrough
CT: control target
= control target key end

     0   :  { %vm30_vm0 = vcmask 261120   ;;  %s666_s0 = inlined_call_operand.vmem [shape: f32[128,32], index: 0, kind: input, shape index: {}]   ;;  %s667_s1 = inlined_call_operand.vmem [shape: f32[1,32], index: 1, kind: input, shape index: {}]   ;;  %s668_s2 = inlined_call_operand.vmem [shape: f32[1,32], index: 2, kind: input, shape index: {}]   ;;  %s669_s3 = inlined_call_operand.vmem [shape: f32[128,32], index: 3, kind: output, shape index: {}]  }
   0x1   :  { %v14_v0 = vld [vmem:[%s666_s0] sm:$0xff]  ;;  %v16_v1 = vld [vmem:[%s666_s0 + $0x10] sm:$0xff]  ;;  %v15_v2 = vld [vmem:[%s666_s0 + $0x8] sm:$0xff] }
   0x2   :  { %v31_v3 = vsel %vm30_vm0, %v14_v0, 0.0  ;;  %v37_v4 = vsel %vm30_vm0, %v16_v1, 0.0  ;;  %v17_v5 = vld [vmem:[%s666_s0 + $0x18] sm:$0xff]  ;;  %v34_v6 = vsel %vm30_vm0, %v15_v2, 0.0  ;;  %v18_v8 = vld [vmem:[%s666_s0 + $0x20] sm:$0xff]  ;;  %v19_v9 = vld [vmem:[%s666_s0 + $0x28] sm:$0xff] }
   0x3   :  { %32 = vadd.xlane.f32.xlu0 %v31_v3  ;;  %38 = vadd.xlane.f32.xlu1 %v37_v4  ;;  %v40_v7 = vsel %vm30_vm0, %v17_v5, 0.0  ;;  %v43_v10 = vsel %vm30_vm0, %v18_v8, 0.0  ;;  %v46_v11 = vsel %vm30_vm0, %v19_v9, 0.0  ;;  %v387_v12 = vld [vmem:[%s666_s0 + $0x30] sm:$0xff]  ;;  %v392_v13 = vld [vmem:[%s666_s0 + $0x38] sm:$0xff]  ;;  %v401_v16 = vld [vmem:[%s666_s0 + $0x40] sm:$0xff] }
   0x4   :  { %v49_v14 = vsel %vm30_vm0, %v387_v12, 0.0  ;;  %v52_v15 = vsel %vm30_vm0, %v392_v13, 0.0  ;;  %v406_v17 = vld [vmem:[%s666_s0 + $0x48] sm:$0xff]  ;;  %v55_v18 = vsel %vm30_vm0, %v401_v16, 0.0  ;;  %v415_v20 = vld [vmem:[%s666_s0 + $0x50] sm:$0xff]  ;;  %v420_v21 = vld [vmem:[%s666_s0 + $0x58] sm:$0xff] }
   0x5   :  { %v58_v19 = vsel %vm30_vm0, %v406_v17, 0.0  ;;  %v61_v22 = vsel %vm30_vm0, %v415_v20, 0.0  ;;  %v64_v23 = vsel %vm30_vm0, %v420_v21, 0.0  ;;  %v429_v24 = vld [vmem:[%s666_s0 + $0x60] sm:$0xff]  ;;  %v434_v25 = vld [vmem:[%s666_s0 + $0x68] sm:$0xff]  ;;  %v443_v28 = vld [vmem:[%s666_s0 + $0x70] sm:$0xff] }
   0x6   :  { %v67_v26 = vsel %vm30_vm0, %v429_v24, 0.0  ;;  %v70_v27 = vsel %vm30_vm0, %v434_v25, 0.0  ;;  %v448_v29 = vld [vmem:[%s666_s0 + $0x78] sm:$0xff]  ;;  %v73_v30 = vsel %vm30_vm0, %v443_v28, 0.0 }
   0x7   :  { %35 = vadd.xlane.f32.xlu0 %v34_v6  ;;  %41 = vadd.xlane.f32.xlu1 %v40_v7  ;;  %v76_v31 = vsel %vm30_vm0, %v448_v29, 0.0 }
   0xb   :  { %44 = vadd.xlane.f32.xlu0 %v43_v10  ;;  %47 = vadd.xlane.f32.xlu1 %v46_v11 }
   0xf   :  { %50 = vadd.xlane.f32.xlu0 %v49_v14  ;;  %53 = vadd.xlane.f32.xlu1 %v52_v15 }
  0x13   :  { %56 = vadd.xlane.f32.xlu0 %v55_v18  ;;  %59 = vadd.xlane.f32.xlu1 %v58_v19 }
  0x17   :  { %62 = vadd.xlane.f32.xlu0 %v61_v22  ;;  %65 = vadd.xlane.f32.xlu1 %v64_v23 }
  0x1b   :  { %68 = vadd.xlane.f32.xlu0 %v67_v26  ;;  %71 = vadd.xlane.f32.xlu1 %v70_v27 }
  0x1f   :  { %74 = vadd.xlane.f32.xlu0 %v73_v30  ;;  %77 = vadd.xlane.f32.xlu1 %v76_v31 }
  0x8c   :  { %v33_v32 = vpop.xlane.xlu0 %32  ;;  %v39_v33 = vpop.xlane.xlu1 %38 }
  0x8d   :  { %v80_v34 = vmul.f32 0.03125, %v33_v32  ;;  %v82_v35 = vmul.f32 0.03125, %v39_v33 }
  0x8f   :  { %v454_v36 = vsub.f32 %v14_v0, %v80_v34  ;;  %v456_v37 = vsub.f32 %v16_v1, %v82_v35 }
  0x90   :  { %v36_v38 = vpop.xlane.xlu0 %35  ;;  %v42_v39 = vpop.xlane.xlu1 %41 }
  0x91   :  { %v81_v40 = vmul.f32 0.03125, %v36_v38  ;;  %v83_v41 = vmul.f32 0.03125, %v42_v39  ;;  %v112_v42 = vmul.f32 %v454_v36, %v454_v36  ;;  %v114_v43 = vmul.f32 %v456_v37, %v456_v37 }
  0x93   :  { %v462_v44 = vsub.f32 %v15_v2, %v81_v40  ;;  %v464_v45 = vsub.f32 %v17_v5, %v83_v41  ;;  %v128_v46 = vsel %vm30_vm0, %v112_v42, 0.0  ;;  %v134_v49 = vsel %vm30_vm0, %v114_v43, 0.0 }
  0x94   :  { %129 = vadd.xlane.f32.xlu0 %v128_v46  ;;  %v45_v47 = vpop.xlane.xlu0 %44  ;;  %v48_v48 = vpop.xlane.xlu1 %47 }
  0x95   :  { %v84_v50 = vmul.f32 0.03125, %v45_v47  ;;  %v85_v51 = vmul.f32 0.03125, %v48_v48  ;;  %v113_v52 = vmul.f32 %v462_v44, %v462_v44  ;;  %v115_v53 = vmul.f32 %v464_v45, %v464_v45 }
  0x97   :  { %v472_v54 = vsub.f32 %v18_v8, %v84_v50  ;;  %v474_v55 = vsub.f32 %v19_v9, %v85_v51  ;;  %v131_v56 = vsel %vm30_vm0, %v113_v52, 0.0  ;;  %v137_v59 = vsel %vm30_vm0, %v115_v53, 0.0 }
  0x98   :  { %135 = vadd.xlane.f32.xlu0 %v134_v49  ;;  %132 = vadd.xlane.f32.xlu1 %v131_v56  ;;  %v51_v57 = vpop.xlane.xlu0 %50  ;;  %v54_v58 = vpop.xlane.xlu1 %53 }
  0x99   :  { %v86_v60 = vmul.f32 0.03125, %v51_v57  ;;  %v87_v61 = vmul.f32 0.03125, %v54_v58  ;;  %v116_v62 = vmul.f32 %v472_v54, %v472_v54  ;;  %v117_v63 = vmul.f32 %v474_v55, %v474_v55 }
  0x9b   :  { %v483_v0 = vsub.f32 %v387_v12, %v86_v60  ;;  %v486_v1 = vsub.f32 %v392_v13, %v87_v61  ;;  %v140_v2 = vsel %vm30_vm0, %v116_v62, 0.0  ;;  %v143_v5 = vsel %vm30_vm0, %v117_v63, 0.0 }
  0x9c   :  { %138 = vadd.xlane.f32.xlu1 %v137_v59  ;;  %141 = vadd.xlane.f32.xlu0 %v140_v2  ;;  %v57_v3 = vpop.xlane.xlu0 %56  ;;  %v60_v4 = vpop.xlane.xlu1 %59 }
  0x9d   :  { %v88_v6 = vmul.f32 0.03125, %v57_v3  ;;  %v89_v7 = vmul.f32 0.03125, %v60_v4  ;;  %v118_v8 = vmul.f32 %v483_v0, %v483_v0  ;;  %v119_v9 = vmul.f32 %v486_v1, %v486_v1 }
  0x9f   :  { %v495_v10 = vsub.f32 %v401_v16, %v88_v6  ;;  %v498_v11 = vsub.f32 %v406_v17, %v89_v7  ;;  %v146_v12 = vsel %vm30_vm0, %v118_v8, 0.0  ;;  %v149_v15 = vsel %vm30_vm0, %v119_v9, 0.0 }
  0xa0   :  { %144 = vadd.xlane.f32.xlu1 %v143_v5  ;;  %147 = vadd.xlane.f32.xlu0 %v146_v12  ;;  %v63_v13 = vpop.xlane.xlu0 %62  ;;  %v66_v14 = vpop.xlane.xlu1 %65 }
  0xa1   :  { %v90_v18 = vmul.f32 0.03125, %v63_v13  ;;  %v91_v19 = vmul.f32 0.03125, %v66_v14  ;;  %v120_v22 = vmul.f32 %v495_v10, %v495_v10  ;;  %v121_v16 = vmul.f32 %v498_v11, %v498_v11 }
  0xa3   :  { %v507_v23 = vsub.f32 %v415_v20, %v90_v18  ;;  %v510_v17 = vsub.f32 %v420_v21, %v91_v19  ;;  %v152_v26 = vsel %vm30_vm0, %v120_v22, 0.0  ;;  %v155_v31 = vsel %vm30_vm0, %v121_v16, 0.0 }
  0xa4   :  { %150 = vadd.xlane.f32.xlu1 %v149_v15  ;;  %153 = vadd.xlane.f32.xlu0 %v152_v26  ;;  %v69_v27 = vpop.xlane.xlu0 %68  ;;  %v72_v30 = vpop.xlane.xlu1 %71  ;;  %v547_v26 = vld [vmem:[%s667_s1] ss:$0 sm:$0xff] }
  0xa5   :  { %v92_v32 = vmul.f32 0.03125, %v69_v27  ;;  %v93_v33 = vmul.f32 0.03125, %v72_v30  ;;  %v122_v34 = vmul.f32 %v507_v23, %v507_v23  ;;  %v123_v20 = vmul.f32 %v510_v17, %v510_v17 }
  0xa7   :  { %v519_v35 = vsub.f32 %v429_v24, %v92_v32  ;;  %v522_v21 = vsub.f32 %v434_v25, %v93_v33  ;;  %v158_v38 = vsel %vm30_vm0, %v122_v34, 0.0  ;;  %v161_v41 = vsel %vm30_vm0, %v123_v20, 0.0  ;;  %v553_v32 = vld [vmem:[%s668_s2] ss:$0 sm:$0xff] }
  0xa8   :  { %156 = vadd.xlane.f32.xlu1 %v155_v31  ;;  %159 = vadd.xlane.f32.xlu0 %v158_v38  ;;  %v75_v39 = vpop.xlane.xlu0 %74  ;;  %v78_v40 = vpop.xlane.xlu1 %77 }
  0xa9   :  { %v94_v42 = vmul.f32 0.03125, %v75_v39  ;;  %v95_v43 = vmul.f32 0.03125, %v78_v40  ;;  %v124_v46 = vmul.f32 %v519_v35, %v519_v35  ;;  %v125_v24 = vmul.f32 %v522_v21, %v522_v21 }
  0xab   :  { %v531_v47 = vsub.f32 %v443_v28, %v94_v42  ;;  %v534_v25 = vsub.f32 %v448_v29, %v95_v43  ;;  %v164_v48 = vsel %vm30_vm0, %v124_v46, 0.0  ;;  %v167_v49 = vsel %vm30_vm0, %v125_v24, 0.0 }
  0xac   :  { %162 = vadd.xlane.f32.xlu1 %v161_v41  ;;  %165 = vadd.xlane.f32.xlu0 %v164_v48 }
  0xad   :  { %v126_v50 = vmul.f32 %v531_v47, %v531_v47  ;;  %v127_v51 = vmul.f32 %v534_v25, %v534_v25 }
  0xaf   :  { %v170_v52 = vsel %vm30_vm0, %v126_v50, 0.0  ;;  %v173_v28 = vsel %vm30_vm0, %v127_v51, 0.0 }
  0xb0   :  { %168 = vadd.xlane.f32.xlu1 %v167_v49  ;;  %171 = vadd.xlane.f32.xlu0 %v170_v52 }
  0xb4   :  { %174 = vadd.xlane.f32.xlu1 %v173_v28 }
 0x11d   :  { %v130_v29 = vpop.xlane.xlu0 %129 }
 0x11e   :  { %v176_v53 = vmul.f32 0.03125, %v130_v29 }
 0x120   :  { %v192_v56 = vadd.f32 1e-06, %v176_v53 }
 0x121   :  { %v133_v57 = vpop.xlane.xlu1 %132  ;;  %v136_v58 = vpop.xlane.xlu0 %135 }
 0x122   :  { %308 = vrsqrt.f32 %v192_v56  ;;  %v177_v59 = vmul.f32 0.03125, %v133_v57  ;;  %v178_v60 = vmul.f32 0.03125, %v136_v58 }
 0x124   :  { %v193_v61 = vadd.f32 1e-06, %v177_v59  ;;  %v194_v62 = vadd.f32 1e-06, %v178_v60 }
 0x125   :  { %v139_v63 = vpop.xlane.xlu1 %138  ;;  %v142_v2 = vpop.xlane.xlu0 %141 }
 0x126   :  { %310 = vrsqrt.f32 %v193_v61  ;;  %v179_v3 = vmul.f32 0.03125, %v139_v63  ;;  %v180_v4 = vmul.f32 0.03125, %v142_v2 }
 0x127   :  { %312 = vrsqrt.f32 %v194_v62 }
 0x128   :  { %v195_v5 = vadd.f32 1e-06, %v179_v3  ;;  %v196_v6 = vadd.f32 1e-06, %v180_v4 }
 0x129   :  { %v145_v7 = vpop.xlane.xlu1 %144  ;;  %v148_v8 = vpop.xlane.xlu0 %147 }
 0x12a   :  { %314 = vrsqrt.f32 %v195_v5  ;;  %v181_v9 = vmul.f32 0.03125, %v145_v7  ;;  %v182_v12 = vmul.f32 0.03125, %v148_v8 }
 0x12b   :  { %316 = vrsqrt.f32 %v196_v6 }
 0x12c   :  { %v197_v13 = vadd.f32 1e-06, %v181_v9  ;;  %v198_v14 = vadd.f32 1e-06, %v182_v12 }
 0x12d   :  { %v151_v15 = vpop.xlane.xlu1 %150  ;;  %v154_v18 = vpop.xlane.xlu0 %153 }
 0x12e   :  { %318 = vrsqrt.f32 %v197_v13  ;;  %v183_v19 = vmul.f32 0.03125, %v151_v15  ;;  %v184_v22 = vmul.f32 0.03125, %v154_v18 }
 0x12f   :  { %v309_v16 = vpop.eup %308  ;;  %320 = vrsqrt.f32 %v198_v14 }
 0x130   :  { %v224_v27 = vmul.f32 %v309_v16, %v454_v36  ;;  %v199_v30 = vadd.f32 1e-06, %v183_v19  ;;  %v200_v31 = vadd.f32 1e-06, %v184_v22 }
 0x131   :  { %v157_v33 = vpop.xlane.xlu1 %156  ;;  %v160_v34 = vpop.xlane.xlu0 %159 }
 0x132   :  { %v247_v20 = vmul.f32 %v547_v26, %v224_v27  ;;  %322 = vrsqrt.f32 %v199_v30  ;;  %v185_v38 = vmul.f32 0.03125, %v157_v33  ;;  %v186_v39 = vmul.f32 0.03125, %v160_v34 }
 0x133   :  { %v311_v40 = vpop.eup %310  ;;  %324 = vrsqrt.f32 %v200_v31 }
 0x134   :  { %v313_v41 = vpop.eup %312  ;;  %v270_v42 = vadd.f32 %v553_v32, %v247_v20  ;;  %v225_v36 = vmul.f32 %v311_v40, %v462_v44  ;;  %v201_v43 = vadd.f32 1e-06, %v185_v38  ;;  %v202_v46 = vadd.f32 1e-06, %v186_v39 }
 0x135   :  { %v226_v24 = vmul.f32 %v313_v41, %v456_v37  ;;  %v163_v48 = vpop.xlane.xlu1 %162  ;;  %v166_v49 = vpop.xlane.xlu0 %165 }
 0x136   :  { %286 = vst.msk [vmem:[%s669_s3] sm:$0xff] %vm30_vm0, %v270_v42  ;;  %v248_v50 = vmul.f32 %v547_v26, %v225_v36  ;;  %326 = vrsqrt.f32 %v201_v43  ;;  %v187_v51 = vmul.f32 0.03125, %v163_v48  ;;  %v188_v52 = vmul.f32 0.03125, %v166_v49 }
 0x137   :  { %v315_v28 = vpop.eup %314  ;;  %v249_v29 = vmul.f32 %v547_v26, %v226_v24  ;;  %328 = vrsqrt.f32 %v202_v46 }
 0x138   :  { %v317_v44 = vpop.eup %316  ;;  %v271_v53 = vadd.f32 %v553_v32, %v248_v50  ;;  %v227_v37 = vmul.f32 %v315_v28, %v464_v45  ;;  %v203_v56 = vadd.f32 1e-06, %v187_v51  ;;  %v204_v57 = vadd.f32 1e-06, %v188_v52 }
 0x139   :  { %v272_v58 = vadd.f32 %v553_v32, %v249_v29  ;;  %v228_v59 = vmul.f32 %v317_v44, %v472_v54  ;;  %v169_v60 = vpop.xlane.xlu1 %168  ;;  %v172_v61 = vpop.xlane.xlu0 %171 }
 0x13a   :  { %287 = vst.msk [vmem:[%s669_s3 + $0x8] sm:$0xff] %vm30_vm0, %v271_v53  ;;  %v250_v62 = vmul.f32 %v547_v26, %v227_v37  ;;  %330 = vrsqrt.f32 %v203_v56  ;;  %v189_v63 = vmul.f32 0.03125, %v169_v60  ;;  %v190_v2 = vmul.f32 0.03125, %v172_v61 }
 0x13b   :  { %v319_v3 = vpop.eup %318  ;;  %288 = vst.msk [vmem:[%s669_s3 + $0x10] sm:$0xff] %vm30_vm0, %v272_v58  ;;  %v251_v45 = vmul.f32 %v547_v26, %v228_v59  ;;  %332 = vrsqrt.f32 %v204_v57 }
 0x13c   :  { %v321_v54 = vpop.eup %320  ;;  %v273_v4 = vadd.f32 %v553_v32, %v250_v62  ;;  %v229_v5 = vmul.f32 %v319_v3, %v474_v55  ;;  %v205_v6 = vadd.f32 1e-06, %v189_v63  ;;  %v206_v7 = vadd.f32 1e-06, %v190_v2 }
 0x13d   :  { %v274_v8 = vadd.f32 %v553_v32, %v251_v45  ;;  %v230_v9 = vmul.f32 %v321_v54, %v483_v0  ;;  %v175_v12 = vpop.xlane.xlu1 %174 }
 0x13e   :  { %289 = vst.msk [vmem:[%s669_s3 + $0x18] sm:$0xff] %vm30_vm0, %v273_v4  ;;  %v252_v13 = vmul.f32 %v547_v26, %v229_v5  ;;  %334 = vrsqrt.f32 %v205_v6  ;;  %v191_v14 = vmul.f32 0.03125, %v175_v12 }
 0x13f   :  { %v323_v15 = vpop.eup %322  ;;  %290 = vst.msk [vmem:[%s669_s3 + $0x20] sm:$0xff] %vm30_vm0, %v274_v8  ;;  %v253_v55 = vmul.f32 %v547_v26, %v230_v9  ;;  %336 = vrsqrt.f32 %v206_v7 }
 0x140   :  { %v325_v0 = vpop.eup %324  ;;  %v275_v18 = vadd.f32 %v553_v32, %v252_v13  ;;  %v231_v19 = vmul.f32 %v323_v15, %v486_v1  ;;  %v207_v22 = vadd.f32 1e-06, %v191_v14 }
 0x141   :  { %v276_v16 = vadd.f32 %v553_v32, %v253_v55  ;;  %v232_v27 = vmul.f32 %v325_v0, %v495_v10 }
 0x142   :  { %291 = vst.msk [vmem:[%s669_s3 + $0x28] sm:$0xff] %vm30_vm0, %v275_v18  ;;  %v254_v30 = vmul.f32 %v547_v26, %v231_v19  ;;  %338 = vrsqrt.f32 %v207_v22 }
 0x143   :  { %v327_v31 = vpop.eup %326  ;;  %292 = vst.msk [vmem:[%s669_s3 + $0x30] sm:$0xff] %vm30_vm0, %v276_v16  ;;  %v255_v1 = vmul.f32 %v547_v26, %v232_v27 }
 0x144   :  { %v329_v33 = vpop.eup %328  ;;  %v277_v34 = vadd.f32 %v553_v32, %v254_v30  ;;  %v233_v10 = vmul.f32 %v327_v31, %v498_v11 }
 0x145   :  { %v278_v20 = vadd.f32 %v553_v32, %v255_v1  ;;  %v234_v38 = vmul.f32 %v329_v33, %v507_v23 }
 0x146   :  { %293 = vst.msk [vmem:[%s669_s3 + $0x38] sm:$0xff] %vm30_vm0, %v277_v34  ;;  %v256_v39 = vmul.f32 %v547_v26, %v233_v10 }
 0x147   :  { %v331_v40 = vpop.eup %330  ;;  %294 = vst.msk [vmem:[%s669_s3 + $0x40] sm:$0xff] %vm30_vm0, %v278_v20  ;;  %v257_v41 = vmul.f32 %v547_v26, %v234_v38 }
 0x148   :  { %v333_v11 = vpop.eup %332  ;;  %v279_v42 = vadd.f32 %v553_v32, %v256_v39  ;;  %v235_v23 = vmul.f32 %v331_v40, %v510_v17 }
 0x149   :  { %v280_v36 = vadd.f32 %v553_v32, %v257_v41  ;;  %v236_v43 = vmul.f32 %v333_v11, %v519_v35 }
 0x14a   :  { %295 = vst.msk [vmem:[%s669_s3 + $0x48] sm:$0xff] %vm30_vm0, %v279_v42  ;;  %v258_v46 = vmul.f32 %v547_v26, %v235_v23 }
 0x14b   :  { %v335_v24 = vpop.eup %334  ;;  %296 = vst.msk [vmem:[%s669_s3 + $0x50] sm:$0xff] %vm30_vm0, %v280_v36  ;;  %v259_v48 = vmul.f32 %v547_v26, %v236_v43 }
 0x14c   :  { %v337_v17 = vpop.eup %336  ;;  %v281_v49 = vadd.f32 %v553_v32, %v258_v46  ;;  %v237_v35 = vmul.f32 %v335_v24, %v522_v21 }
 0x14d   :  { %v282_v50 = vadd.f32 %v553_v32, %v259_v48  ;;  %v238_v51 = vmul.f32 %v337_v17, %v531_v47 }
 0x14e   :  { %297 = vst.msk [vmem:[%s669_s3 + $0x58] sm:$0xff] %vm30_vm0, %v281_v49  ;;  %v260_v52 = vmul.f32 %v547_v26, %v237_v35 }
 0x14f   :  { %v339_v28 = vpop.eup %338  ;;  %298 = vst.msk [vmem:[%s669_s3 + $0x60] sm:$0xff] %vm30_vm0, %v282_v50  ;;  %v261_v29 = vmul.f32 %v547_v26, %v238_v51 }
 0x150   :  { %v283_v21 = vadd.f32 %v553_v32, %v260_v52  ;;  %v239_v44 = vmul.f32 %v339_v28, %v534_v25 }
 0x151   :  { %v284_v47 = vadd.f32 %v553_v32, %v261_v29 }
 0x152   :  { %299 = vst.msk [vmem:[%s669_s3 + $0x68] sm:$0xff] %vm30_vm0, %v283_v21  ;;  %v262_v53 = vmul.f32 %v547_v26, %v239_v44 }
 0x153   :  { %300 = vst.msk [vmem:[%s669_s3 + $0x70] sm:$0xff] %vm30_vm0, %v284_v47 }
 0x154   :  { %v285_v37 = vadd.f32 %v553_v32, %v262_v53 }
 0x156   :  { %301 = vst.msk [vmem:[%s669_s3 + $0x78] sm:$0xff] %vm30_vm0, %v285_v37 }

// kernel: vit_forward.57
= control target key start
LH: loop header
LB: loop body
LE: loop exit
PB: predicated region body
PF: predicated region fallthrough
CT: control target
= control target key end

     0   :  { %vm123_vm0 = vcmask 261120   ;;  %s511_s1 = inlined_call_operand.vmem [shape: bf16[32,128], index: 1, kind: input, shape index: {}]   ;;  %s512_s0 = inlined_call_operand.vmem [shape: bf16[128,32], index: 0, kind: input, shape index: {}]   ;;  %s513_s2 = inlined_call_operand.vmem [shape: f32[1,128], index: 2, kind: input, shape index: {}]   ;;  %s514_s3 = inlined_call_operand.vmem [shape: f32[128,128], index: 3, kind: output, shape index: {}]  }
   0x1   :  { %v392_v0 = vld [vmem:[%s511_s1 + $0x8] sm:$0xff]   ;;  %v393_v1 = vld [vmem:[%s511_s1] sm:$0xff]   ;;  %v398_v6 = vld [vmem:[%s512_s0 + $0x10] sm:$0xff]  }
   0x2   :  { %368 = vmatprep.subr.bf16.mxu0 %v392_v0  ;;  %388 = vmatprep.subr.bf16.mxu1 %v392_v0  ;;  %v394_v2 = vld [vmem:[%s512_s0] sm:$0xff]   ;;  %v396_v4 = vld [vmem:[%s512_s0 + $0x8] sm:$0xff]   ;;  %v399_v7 = vld [vmem:[%s512_s0 + $0x30] sm:$0xff]  }
   0x3   :  { %369 = vmatpush3.bf16.msra.mxu0 %v392_v0  ;;  %390 = vmatpush3.bf16.msra.mxu1 %v392_v0  ;;  %v395_v3 = vld [vmem:[%s512_s0 + $0x20] sm:$0xff]   ;;  %v397_v5 = vld [vmem:[%s512_s0 + $0x28] sm:$0xff]   ;;  %v400_v8 = vld [vmem:[%s512_s0 + $0x18] sm:$0xff]  }
   0x4   :  { %370 = vmatprep.subr.bf16.mxu0 %v393_v1  ;;  %389 = vmatprep.subr.bf16.mxu1 %v393_v1  ;;  %v401_v9 = vld [vmem:[%s512_s0 + $0x38] sm:$0xff]   ;;  %v357_v10 = vld [vmem:[%s513_s2] ss:$0 sm:$0xff] }
   0x5   :  { %372 = vmatprep.mubr.msk.bf16.mxu0 %vm123_vm0, %v394_v2  ;;  %380 = vmatprep.mubr.msk.bf16.mxu1 %vm123_vm0, %v395_v3 }
   0x7   :  { %371 = vmatpush3.bf16.msra.mxu0 %v393_v1  ;;  %391 = vmatpush3.bf16.msra.mxu1 %v393_v1 }
   0xa   :  { %373 = vmatmul.mubr.msk.bf16.vlgmr.msra.gmra.mxu0 %vm123_vm0, %v396_v4  ;;  %381 = vmatmul.mubr.msk.bf16.vlgmr.msra.gmra.mxu1 %vm123_vm0, %v397_v5 }
   0xb   :  { %376 = vmatprep.mubr.msk.bf16.mxu0 %vm123_vm0, %v398_v6  ;;  %384 = vmatprep.mubr.msk.bf16.mxu1 %vm123_vm0, %v399_v7 }
  0x12   :  { %377 = vmatmul.mubr.msk.bf16.gmra.mxu0 %vm123_vm0, %v400_v8  ;;  %385 = vmatmul.mubr.msk.bf16.gmra.mxu1 %vm123_vm0, %v401_v9 }
  0xca   :  { %v374_v11 = vpop.f32.mrf.mxu0  ;;  %v382_v12 = vpop.f32.mrf.mxu1 }
  0xcb   :  { %v305_v13 = vadd.f32 %v374_v11, %v357_v10  ;;  %v313_v14 = vadd.f32 %v382_v12, %v357_v10 }
  0xcc   :  { %v182_v15 = vpop.f32.mrf.mxu0  ;;  %v214_v16 = vpop.f32.mrf.mxu1 }
  0xcd   :  { %321 = vst [vmem:[%s514_s3 + $0x10] sm:$0xff] %v305_v13  ;;  %329 = vst [vmem:[%s514_s3 + $0x50] sm:$0xff] %v313_v14  ;;  %v303_v17 = vadd.f32 %v357_v10, %v182_v15  ;;  %v311_v18 = vadd.f32 %v357_v10, %v214_v16 }
  0xce   :  { %v375_v19 = vpop.f32.mrf.mxu0  ;;  %v383_v20 = vpop.f32.mrf.mxu1 }
  0xcf   :  { %319 = vst [vmem:[%s514_s3] sm:$0xff] %v303_v17  ;;  %327 = vst [vmem:[%s514_s3 + $0x40] sm:$0xff] %v311_v18  ;;  %v306_v21 = vadd.f32 %v375_v19, %v357_v10  ;;  %v314_v22 = vadd.f32 %v383_v20, %v357_v10 }
  0xd0   :  { %v185_v23 = vpop.f32.mrf.mxu0  ;;  %v217_v24 = vpop.f32.mrf.mxu1 }
  0xd1   :  { %322 = vst [vmem:[%s514_s3 + $0x18] sm:$0xff] %v306_v21  ;;  %330 = vst [vmem:[%s514_s3 + $0x58] sm:$0xff] %v314_v22  ;;  %v304_v25 = vadd.f32 %v357_v10, %v185_v23  ;;  %v312_v26 = vadd.f32 %v357_v10, %v217_v24 }
  0xd2   :  { %v378_v27 = vpop.f32.mrf.mxu0  ;;  %v386_v28 = vpop.f32.mrf.mxu1 }
  0xd3   :  { %320 = vst [vmem:[%s514_s3 + $0x8] sm:$0xff] %v304_v25  ;;  %328 = vst [vmem:[%s514_s3 + $0x48] sm:$0xff] %v312_v26  ;;  %v309_v29 = vadd.f32 %v378_v27, %v357_v10  ;;  %v317_v30 = vadd.f32 %v386_v28, %v357_v10 }
  0xd4   :  { %v198_v31 = vpop.f32.mrf.mxu0  ;;  %v230_v32 = vpop.f32.mrf.mxu1 }
  0xd5   :  { %325 = vst [vmem:[%s514_s3 + $0x30] sm:$0xff] %v309_v29  ;;  %333 = vst [vmem:[%s514_s3 + $0x70] sm:$0xff] %v317_v30  ;;  %v307_v33 = vadd.f32 %v357_v10, %v198_v31  ;;  %v315_v34 = vadd.f32 %v357_v10, %v230_v32 }
  0xd6   :  { %v379_v35 = vpop.f32.mrf.mxu0  ;;  %v387_v36 = vpop.f32.mrf.mxu1 }
  0xd7   :  { %323 = vst [vmem:[%s514_s3 + $0x20] sm:$0xff] %v307_v33  ;;  %331 = vst [vmem:[%s514_s3 + $0x60] sm:$0xff] %v315_v34  ;;  %v310_v37 = vadd.f32 %v379_v35, %v357_v10  ;;  %v318_v38 = vadd.f32 %v387_v36, %v357_v10 }
  0xd8   :  { %v201_v39 = vpop.f32.mrf.mxu0  ;;  %v233_v40 = vpop.f32.mrf.mxu1 }
  0xd9   :  { %326 = vst [vmem:[%s514_s3 + $0x38] sm:$0xff] %v310_v37  ;;  %334 = vst [vmem:[%s514_s3 + $0x78] sm:$0xff] %v318_v38  ;;  %v308_v41 = vadd.f32 %v357_v10, %v201_v39  ;;  %v316_v42 = vadd.f32 %v357_v10, %v233_v40 }
  0xdb   :  { %324 = vst [vmem:[%s514_s3 + $0x28] sm:$0xff] %v308_v41  ;;  %332 = vst [vmem:[%s514_s3 + $0x68] sm:$0xff] %v316_v42 }

</bundles_post_ra>
